<compile_context>
chip_gen: v5e
topology: v5e:2x2
jax: 0.10.0
libtpu: 0.0.40
codegen_flags: <defaults>
</compile_context>

<pallas_src>
import functools

import jax
import jax.numpy as jnp
from jax.experimental import pallas as pl
from jax.experimental.pallas import tpu as pltpu

# ----------------------------- config -----------------------------
NUM_TRAIN_TIMESTEPS = 1000
BETA_START, BETA_END = 1e-4, 0.02      # DDPMScheduler linear defaults
BETA_DPO = 2000.0

B_TOTAL = 4          # 2 * bsz (winner/loser pairs stacked along batch)
C = 8                # unet in_channels (tango-style latent channels)
H, W = 16, 16
HW = H * W           # 256 -> lane-dense
SEQ = 8              # text sequence length
TXT_H = 32           # text-encoder hidden size (surrogate)
HID = 32             # surrogate-unet hidden size


# ----------------------------- fused kernel -----------------------------
def dpo_fused_kernel(sa_ref, soma_ref, tn_ref,            # SMEM (B,) scalars
                     lat_ref, noise_ref, enc_ref,          # VMEM (B,C,HW),(B,C,HW),(B,SEQ,TXT_H)
                     w1t_ref, b1c_ref, w2t_ref, b2c_ref,   # per-branch UNet weights (NCHW form)
                     wct_ref, wtc_ref,                     # per-branch conditioning weights
                     sse_ref):                             # out: (B, 1) per-sample SSE
    """One grid step = one branch (0 = trainable unet, 1 = reference unet).

    Per sample b, fully resident in VMEM:
      noisy  = sqrt(ac[t]) * x0 + sqrt(1-ac[t]) * eps          (DDPM add_noise)
      cond   = wc.T @ mean_seq(text) + (t/T) * wt               (surrogate conditioning)
      pred   = w2.T @ tanh(w1.T @ noisy + b1 + cond) + b2       (surrogate UNet, NCHW)
      sse[b] = sum((pred - eps)^2)                              (epsilon target)
    """
    w1t = w1t_ref[...]   # (HID, C)
    b1c = b1c_ref[...]   # (HID, 1)
    w2t = w2t_ref[...]   # (C, HID)
    b2c = b2c_ref[...]   # (C, 1)
    wct = wct_ref[...]   # (HID, TXT_H)
    wtc = wtc_ref[...]   # (HID, 1)

    n_samples = lat_ref.shape[0]

    def fma_contract(wt, x):
        # (OUT, K) contracted with (K, HW) -> (OUT, HW).
        # K is tiny (8 or 32): unrolled VPU broadcast-FMAs over the 256-lane HW
        # axis avoid MXU push/pop latency for a <7%-filled systolic array.
        acc = wt[:, 0:1] * x[0:1, :]
        for k in range(1, x.shape[0]):
            acc = acc + wt[:, k:k + 1] * x[k:k + 1, :]
        return acc

    for b in range(n_samples):
        sa = sa_ref[b]          # SMEM scalar: sqrt(alpha_cumprod[t_b])
        soma = soma_ref[b]      # SMEM scalar: sqrt(1 - alpha_cumprod[t_b])
        tn = tn_ref[b]          # SMEM scalar: t_b / num_train_timesteps

        x0 = lat_ref[b]         # (C, HW)
        eps = noise_ref[b]      # (C, HW)
        noisy = sa * x0 + soma * eps                                       # add_noise

        # conditioning: mean-pooled text @ wc + timestep embedding (column form)
        pooled = jnp.mean(enc_ref[b], axis=0, keepdims=True)               # (1, TXT_H)
        cond = jnp.sum(wct * pooled, axis=-1, keepdims=True) + tn * wtc    # (HID, 1)

        h = jnp.tanh(fma_contract(w1t, noisy) + b1c + cond)                # (HID, HW)
        pred = fma_contract(w2t, h) + b2c                                  # (C, HW)

        d = pred - eps                                                     # epsilon target
        row = jnp.sum(d * d, axis=0, keepdims=True)                        # (1, HW)
        sse_ref[pl.ds(b, 1), :] = jnp.sum(row, axis=1, keepdims=True)      # (1, 1)


# ----------------------------- wrapper -----------------------------
def fused_dpo_losses(sa, soma, tnorm, lat, eps, enc,
                     w1t, b1c, w2t, b2c, wct, wtc):
    """Returns (2, B) per-sample sums of squared error: row 0 = model, row 1 = ref."""
    B, c, hw = lat.shape
    seq, txt_h = enc.shape[1], enc.shape[2]
    hid = w1t.shape[1]

    smem = pl.BlockSpec(memory_space=pltpu.MemorySpace.SMEM)

    sse = pl.pallas_call(
        dpo_fused_kernel,
        out_shape=jax.ShapeDtypeStruct((2, B, 1), jnp.float32),
        grid=(2,),
        in_specs=[
            smem, smem, smem,                                            # sa, soma, t/T
            pl.BlockSpec((B, c, hw), lambda i: (0, 0, 0)),               # latents (NCHW flat)
            pl.BlockSpec((B, c, hw), lambda i: (0, 0, 0)),               # noise
            pl.BlockSpec((B, seq, txt_h), lambda i: (0, 0, 0)),          # text hidden states
            pl.BlockSpec((pl.Squeezed(), hid, c), lambda i: (i, 0, 0)),      # w1.T
            pl.BlockSpec((pl.Squeezed(), hid, 1), lambda i: (i, 0, 0)),      # b1 (col)
            pl.BlockSpec((pl.Squeezed(), c, hid), lambda i: (i, 0, 0)),      # w2.T
            pl.BlockSpec((pl.Squeezed(), c, 1), lambda i: (i, 0, 0)),        # b2 (col)
            pl.BlockSpec((pl.Squeezed(), hid, txt_h), lambda i: (i, 0, 0)),  # wc.T
            pl.BlockSpec((pl.Squeezed(), hid, 1), lambda i: (i, 0, 0)),      # wt (col)
        ],
        out_specs=pl.BlockSpec((pl.Squeezed(), B, 1), lambda i: (i, 0, 0)),
        compiler_params=pltpu.CompilerParams(
            # model/ref branches are independent -> sharded across the 2 TCs on v7x.
            dimension_semantics=("parallel",)),
    )(sa, soma, tnorm, lat, eps, enc, w1t, b1c, w2t, b2c, wct, wtc)

    return sse[:, :, 0]


# ----------------------------- model glue -----------------------------
def make_unet_params(key, scale=0.1):
    k1, k2, k3, k4 = jax.random.split(key, 4)
    return {
        "w1": scale * jax.random.normal(k1, (C, HID), jnp.float32),
        "b1": jnp.zeros((1, HID), jnp.float32),
        "w2": scale * jax.random.normal(k2, (HID, C), jnp.float32),
        "b2": jnp.zeros((1, C), jnp.float32),
        "wc": scale * jax.random.normal(k3, (TXT_H, HID), jnp.float32),
        "wt": scale * jax.random.normal(k4, (HID,), jnp.float32),
    }


def alphas_cumprod():
    betas = jnp.linspace(BETA_START, BETA_END, NUM_TRAIN_TIMESTEPS, dtype=jnp.float32)
    return jnp.cumprod(1.0 - betas)


def dpo_forward(latents, enc_hidden_half, model_params, ref_params, key,
                beta_dpo=BETA_DPO):
    """DPO branch of DPOAudioDiffusion.forward (validation_mode=False, sft=False)."""
    B, c, h, w = latents.shape
    bsz = B // 2
    hw = h * w

    # TODO(synk): CLIPTokenizer / CLIPTextModel (or T5) text encoding has no Pallas
    # equivalent here; enc_hidden_half stands in for encode_text(prompt)[0].
    enc_hidden = jnp.tile(enc_hidden_half, (2, 1, 1)).astype(jnp.float32)   # .repeat(2,1,1)

    k_t, k_n = jax.random.split(key)
    t_half = jax.random.randint(k_t, (bsz,), 0, NUM_TRAIN_TIMESTEPS, dtype=jnp.int32)
    timesteps = jnp.tile(t_half, 2)                              # .repeat(2)

    noise_half = jax.random.normal(k_n, (bsz, c, h, w), jnp.float32)
    noise = jnp.concatenate([noise_half, noise_half], axis=0)    # chunk(2)[0].repeat(2,1,1,1)

    # DDPM scheduler tables (tiny gathers, stay in XLA).
    ac = alphas_cumprod()
    sa = jnp.sqrt(ac)[timesteps].astype(jnp.float32)             # (B,)
    soma = jnp.sqrt(1.0 - ac)[timesteps].astype(jnp.float32)     # (B,)
    tnorm = timesteps.astype(jnp.float32) / NUM_TRAIN_TIMESTEPS  # (B,)

    # NCHW kept native: (B, C, H*W) with HW lane-dense. No transposes anywhere.
    lat = latents.reshape(B, c, hw).astype(jnp.float32)
    eps = noise.reshape(B, c, hw)

    # Stack model/ref weights along a leading branch axis; pre-transpose (tiny,
    # one-time XLA ops on weights only) for the channels-on-sublanes formulation.
    def col(v):
        return jnp.reshape(v, (-1, 1))

    def stack(fn):
        return jnp.stack([fn(model_params), fn(ref_params)], axis=0)

    w1t = stack(lambda p: p["w1"].T)    # (2, HID, C)
    b1c = stack(lambda p: col(p["b1"]))  # (2, HID, 1)
    w2t = stack(lambda p: p["w2"].T)    # (2, C, HID)
    b2c = stack(lambda p: col(p["b2"]))  # (2, C, 1)
    wct = stack(lambda p: p["wc"].T)    # (2, HID, TXT_H)
    wtc = stack(lambda p: col(p["wt"]))  # (2, HID, 1)

    sse = fused_dpo_losses(sa, soma, tnorm, lat, eps, enc_hidden,
                           w1t, b1c, w2t, b2c, wct, wtc)         # (2, B)
    per_sample = sse / float(c * hw)                             # mean over C*H*W

    model_losses = per_sample[0]
    # torch.no_grad() on the reference branch.
    # TODO(synk): for training, wrap the fused call in a custom VJP so the ref path
    # stays gradient-free (stop_gradient here only covers the forward composition).
    ref_losses = jax.lax.stop_gradient(per_sample[1])

    model_diff = model_losses[:bsz] - model_losses[bsz:]
    ref_diff = ref_losses[:bsz] - ref_losses[bsz:]

    scale_term = -0.5 * beta_dpo
    inside_term = scale_term * (model_diff - ref_diff)
    loss = -1.0 * jnp.mean(jax.nn.log_sigmoid(inside_term))
    return loss


# ----------------------------- main -----------------------------
if __name__ == "__main__":
    root = jax.random.PRNGKey(0)
    k_lat, k_txt, k_model, k_ref, k_fwd = jax.random.split(root, 5)

    latents = jax.random.normal(k_lat, (B_TOTAL, C, H, W), jnp.float32)       # NCHW
    enc_hidden_half = jax.random.normal(k_txt, (B_TOTAL // 2, SEQ, TXT_H), jnp.float32)

    model_params = make_unet_params(k_model, scale=0.1)
    ref_params = make_unet_params(k_ref, scale=0.1)

    loss = jax.jit(functools.partial(dpo_forward, beta_dpo=BETA_DPO))(
        latents, enc_hidden_half, model_params, ref_params, k_fwd)
    jax.block_until_ready(loss)
    assert loss.shape == () and jnp.isfinite(loss)
    print("KERNEL_OK")
</pallas_src>

<mosaic_0001>
module attributes {stable_mosaic.version = 11 : i64} {
  func.func @dpo_fused_kernel(%arg0: i32, %arg1: memref<4xf32, #tpu.memory_space<smem>>, %arg2: memref<4xf32, #tpu.memory_space<smem>>, %arg3: memref<4xf32, #tpu.memory_space<smem>>, %arg4: memref<4x8x256xf32, #tpu.memory_space<vmem>>, %arg5: memref<4x8x256xf32, #tpu.memory_space<vmem>>, %arg6: memref<4x8x32xf32, #tpu.memory_space<vmem>>, %arg7: memref<1x32x8xf32, #tpu.memory_space<vmem>>, %arg8: memref<1x32x1xf32, #tpu.memory_space<vmem>>, %arg9: memref<1x8x32xf32, #tpu.memory_space<vmem>>, %arg10: memref<1x8x1xf32, #tpu.memory_space<vmem>>, %arg11: memref<1x32x32xf32, #tpu.memory_space<vmem>>, %arg12: memref<1x32x1xf32, #tpu.memory_space<vmem>>, %arg13: memref<1x4x1xf32, #tpu.memory_space<vmem>>) attributes {dimension_semantics = [#tpu.dimension_semantics<parallel>], iteration_bounds = array<i64: 2>, scalar_prefetch = 0 : i64, scratch_operands = 0 : i64, tpu.core_type = #tpu.core_type<tc>, window_params = [{transform_indices = @transform_0, window_bounds = array<i64: 4>}, {transform_indices = @transform_1, window_bounds = array<i64: 4>}, {transform_indices = @transform_2, window_bounds = array<i64: 4>}, {pipeline_mode = #tpu.pipeline_mode<synchronous>, transform_indices = @transform_3, window_bounds = array<i64: 4, 8, 256>}, {pipeline_mode = #tpu.pipeline_mode<synchronous>, transform_indices = @transform_4, window_bounds = array<i64: 4, 8, 256>}, {pipeline_mode = #tpu.pipeline_mode<synchronous>, transform_indices = @transform_5, window_bounds = array<i64: 4, 8, 32>}, {transform_indices = @transform_6, window_bounds = array<i64: 1, 32, 8>}, {transform_indices = @transform_7, window_bounds = array<i64: 1, 32, 1>}, {transform_indices = @transform_8, window_bounds = array<i64: 1, 8, 32>}, {transform_indices = @transform_9, window_bounds = array<i64: 1, 8, 1>}, {transform_indices = @transform_10, window_bounds = array<i64: 1, 32, 32>}, {transform_indices = @transform_11, window_bounds = array<i64: 1, 32, 1>}, {transform_indices = @transform_12, window_bounds = array<i64: 1, 4, 1>}]} {
    %c0 = arith.constant 0 : index
    %c0_0 = arith.constant 0 : index
    %c0_1 = arith.constant 0 : index
    %0 = vector.load %arg7[%c0, %c0_0, %c0_1] : memref<1x32x8xf32, #tpu.memory_space<vmem>>, vector<1x32x8xf32>
    %1 = vector.shape_cast %0 : vector<1x32x8xf32> to vector<32x8xf32>
    %c0_2 = arith.constant 0 : index
    %c0_3 = arith.constant 0 : index
    %c0_4 = arith.constant 0 : index
    %2 = vector.load %arg8[%c0_2, %c0_3, %c0_4] : memref<1x32x1xf32, #tpu.memory_space<vmem>>, vector<1x32x1xf32>
    %3 = vector.shape_cast %2 : vector<1x32x1xf32> to vector<32x1xf32>
    %c0_5 = arith.constant 0 : index
    %c0_6 = arith.constant 0 : index
    %c0_7 = arith.constant 0 : index
    %4 = vector.load %arg9[%c0_5, %c0_6, %c0_7] : memref<1x8x32xf32, #tpu.memory_space<vmem>>, vector<1x8x32xf32>
    %5 = vector.shape_cast %4 : vector<1x8x32xf32> to vector<8x32xf32>
    %c0_8 = arith.constant 0 : index
    %c0_9 = arith.constant 0 : index
    %c0_10 = arith.constant 0 : index
    %6 = vector.load %arg10[%c0_8, %c0_9, %c0_10] : memref<1x8x1xf32, #tpu.memory_space<vmem>>, vector<1x8x1xf32>
    %7 = vector.shape_cast %6 : vector<1x8x1xf32> to vector<8x1xf32>
    %c0_11 = arith.constant 0 : index
    %c0_12 = arith.constant 0 : index
    %c0_13 = arith.constant 0 : index
    %8 = vector.load %arg11[%c0_11, %c0_12, %c0_13] : memref<1x32x32xf32, #tpu.memory_space<vmem>>, vector<1x32x32xf32>
    %9 = vector.shape_cast %8 : vector<1x32x32xf32> to vector<32x32xf32>
    %c0_14 = arith.constant 0 : index
    %c0_15 = arith.constant 0 : index
    %c0_16 = arith.constant 0 : index
    %10 = vector.load %arg12[%c0_14, %c0_15, %c0_16] : memref<1x32x1xf32, #tpu.memory_space<vmem>>, vector<1x32x1xf32>
    %11 = vector.shape_cast %10 : vector<1x32x1xf32> to vector<32x1xf32>
    %c0_17 = arith.constant 0 : index
    %12 = memref.load %arg1[%c0_17] : memref<4xf32, #tpu.memory_space<smem>>
    %c0_18 = arith.constant 0 : index
    %13 = memref.load %arg2[%c0_18] : memref<4xf32, #tpu.memory_space<smem>>
    %c0_19 = arith.constant 0 : index
    %14 = memref.load %arg3[%c0_19] : memref<4xf32, #tpu.memory_space<smem>>
    %c0_20 = arith.constant 0 : index
    %c0_21 = arith.constant 0 : index
    %c0_22 = arith.constant 0 : index
    %15 = vector.load %arg4[%c0_20, %c0_21, %c0_22] : memref<4x8x256xf32, #tpu.memory_space<vmem>>, vector<1x8x256xf32>
    %16 = vector.shape_cast %15 : vector<1x8x256xf32> to vector<8x256xf32>
    %c0_23 = arith.constant 0 : index
    %c0_24 = arith.constant 0 : index
    %c0_25 = arith.constant 0 : index
    %17 = vector.load %arg5[%c0_23, %c0_24, %c0_25] : memref<4x8x256xf32, #tpu.memory_space<vmem>>, vector<1x8x256xf32>
    %18 = vector.shape_cast %17 : vector<1x8x256xf32> to vector<8x256xf32>
    %19 = vector.broadcast %12 : f32 to vector<8x256xf32>
    %20 = arith.mulf %19, %16 : vector<8x256xf32>
    %21 = vector.broadcast %13 : f32 to vector<8x256xf32>
    %22 = arith.mulf %21, %18 : vector<8x256xf32>
    %23 = arith.addf %20, %22 : vector<8x256xf32>
    %c0_26 = arith.constant 0 : index
    %c0_27 = arith.constant 0 : index
    %c0_28 = arith.constant 0 : index
    %24 = vector.load %arg6[%c0_26, %c0_27, %c0_28] : memref<4x8x32xf32, #tpu.memory_space<vmem>>, vector<1x8x32xf32>
    %25 = vector.shape_cast %24 : vector<1x8x32xf32> to vector<8x32xf32>
    %cst = arith.constant dense<0.000000e+00> : vector<32xf32>
    %26 = vector.multi_reduction <add>, %25, %cst [0] : vector<8x32xf32> to vector<32xf32>
    %27 = vector.shape_cast %26 : vector<32xf32> to vector<1x32xf32>
    %cst_29 = arith.constant 8.000000e+00 : f32
    %28 = vector.broadcast %cst_29 : f32 to vector<1x32xf32>
    %29 = arith.divf %27, %28 : vector<1x32xf32>
    %30 = vector.broadcast %29 : vector<1x32xf32> to vector<32x32xf32>
    %31 = arith.mulf %9, %30 : vector<32x32xf32>
    %cst_30 = arith.constant dense<0.000000e+00> : vector<32xf32>
    %32 = vector.multi_reduction <add>, %31, %cst_30 [1] : vector<32x32xf32> to vector<32xf32>
    %33 = vector.shape_cast %32 : vector<32xf32> to vector<32x1xf32>
    %34 = vector.broadcast %14 : f32 to vector<32x1xf32>
    %35 = arith.mulf %34, %11 : vector<32x1xf32>
    %36 = arith.addf %33, %35 : vector<32x1xf32>
    %37 = vector.extract_strided_slice %1 {offsets = [0, 0], sizes = [32, 1], strides = [1, 1]} : vector<32x8xf32> to vector<32x1xf32>
    %38 = vector.extract_strided_slice %23 {offsets = [0, 0], sizes = [1, 256], strides = [1, 1]} : vector<8x256xf32> to vector<1x256xf32>
    %39 = vector.broadcast %37 : vector<32x1xf32> to vector<32x256xf32>
    %40 = vector.broadcast %38 : vector<1x256xf32> to vector<32x256xf32>
    %41 = arith.mulf %39, %40 : vector<32x256xf32>
    %42 = vector.extract_strided_slice %1 {offsets = [0, 1], sizes = [32, 1], strides = [1, 1]} : vector<32x8xf32> to vector<32x1xf32>
    %43 = vector.extract_strided_slice %23 {offsets = [1, 0], sizes = [1, 256], strides = [1, 1]} : vector<8x256xf32> to vector<1x256xf32>
    %44 = vector.broadcast %42 : vector<32x1xf32> to vector<32x256xf32>
    %45 = vector.broadcast %43 : vector<1x256xf32> to vector<32x256xf32>
    %46 = arith.mulf %44, %45 : vector<32x256xf32>
    %47 = arith.addf %41, %46 : vector<32x256xf32>
    %48 = vector.extract_strided_slice %1 {offsets = [0, 2], sizes = [32, 1], strides = [1, 1]} : vector<32x8xf32> to vector<32x1xf32>
    %49 = vector.extract_strided_slice %23 {offsets = [2, 0], sizes = [1, 256], strides = [1, 1]} : vector<8x256xf32> to vector<1x256xf32>
    %50 = vector.broadcast %48 : vector<32x1xf32> to vector<32x256xf32>
    %51 = vector.broadcast %49 : vector<1x256xf32> to vector<32x256xf32>
    %52 = arith.mulf %50, %51 : vector<32x256xf32>
    %53 = arith.addf %47, %52 : vector<32x256xf32>
    %54 = vector.extract_strided_slice %1 {offsets = [0, 3], sizes = [32, 1], strides = [1, 1]} : vector<32x8xf32> to vector<32x1xf32>
    %55 = vector.extract_strided_slice %23 {offsets = [3, 0], sizes = [1, 256], strides = [1, 1]} : vector<8x256xf32> to vector<1x256xf32>
    %56 = vector.broadcast %54 : vector<32x1xf32> to vector<32x256xf32>
    %57 = vector.broadcast %55 : vector<1x256xf32> to vector<32x256xf32>
    %58 = arith.mulf %56, %57 : vector<32x256xf32>
    %59 = arith.addf %53, %58 : vector<32x256xf32>
    %60 = vector.extract_strided_slice %1 {offsets = [0, 4], sizes = [32, 1], strides = [1, 1]} : vector<32x8xf32> to vector<32x1xf32>
    %61 = vector.extract_strided_slice %23 {offsets = [4, 0], sizes = [1, 256], strides = [1, 1]} : vector<8x256xf32> to vector<1x256xf32>
    %62 = vector.broadcast %60 : vector<32x1xf32> to vector<32x256xf32>
    %63 = vector.broadcast %61 : vector<1x256xf32> to vector<32x256xf32>
    %64 = arith.mulf %62, %63 : vector<32x256xf32>
    %65 = arith.addf %59, %64 : vector<32x256xf32>
    %66 = vector.extract_strided_slice %1 {offsets = [0, 5], sizes = [32, 1], strides = [1, 1]} : vector<32x8xf32> to vector<32x1xf32>
    %67 = vector.extract_strided_slice %23 {offsets = [5, 0], sizes = [1, 256], strides = [1, 1]} : vector<8x256xf32> to vector<1x256xf32>
    %68 = vector.broadcast %66 : vector<32x1xf32> to vector<32x256xf32>
    %69 = vector.broadcast %67 : vector<1x256xf32> to vector<32x256xf32>
    %70 = arith.mulf %68, %69 : vector<32x256xf32>
    %71 = arith.addf %65, %70 : vector<32x256xf32>
    %72 = vector.extract_strided_slice %1 {offsets = [0, 6], sizes = [32, 1], strides = [1, 1]} : vector<32x8xf32> to vector<32x1xf32>
    %73 = vector.extract_strided_slice %23 {offsets = [6, 0], sizes = [1, 256], strides = [1, 1]} : vector<8x256xf32> to vector<1x256xf32>
    %74 = vector.broadcast %72 : vector<32x1xf32> to vector<32x256xf32>
    %75 = vector.broadcast %73 : vector<1x256xf32> to vector<32x256xf32>
    %76 = arith.mulf %74, %75 : vector<32x256xf32>
    %77 = arith.addf %71, %76 : vector<32x256xf32>
    %78 = vector.extract_strided_slice %1 {offsets = [0, 7], sizes = [32, 1], strides = [1, 1]} : vector<32x8xf32> to vector<32x1xf32>
    %79 = vector.extract_strided_slice %23 {offsets = [7, 0], sizes = [1, 256], strides = [1, 1]} : vector<8x256xf32> to vector<1x256xf32>
    %80 = vector.broadcast %78 : vector<32x1xf32> to vector<32x256xf32>
    %81 = vector.broadcast %79 : vector<1x256xf32> to vector<32x256xf32>
    %82 = arith.mulf %80, %81 : vector<32x256xf32>
    %83 = arith.addf %77, %82 : vector<32x256xf32>
    %84 = vector.broadcast %3 : vector<32x1xf32> to vector<32x256xf32>
    %85 = arith.addf %83, %84 : vector<32x256xf32>
    %86 = vector.broadcast %36 : vector<32x1xf32> to vector<32x256xf32>
    %87 = arith.addf %85, %86 : vector<32x256xf32>
    %88 = math.tanh %87 : vector<32x256xf32>
    %89 = vector.extract_strided_slice %5 {offsets = [0, 0], sizes = [8, 1], strides = [1, 1]} : vector<8x32xf32> to vector<8x1xf32>
    %90 = vector.extract_strided_slice %88 {offsets = [0, 0], sizes = [1, 256], strides = [1, 1]} : vector<32x256xf32> to vector<1x256xf32>
    %91 = vector.broadcast %89 : vector<8x1xf32> to vector<8x256xf32>
    %92 = vector.broadcast %90 : vector<1x256xf32> to vector<8x256xf32>
    %93 = arith.mulf %91, %92 : vector<8x256xf32>
    %94 = vector.extract_strided_slice %5 {offsets = [0, 1], sizes = [8, 1], strides = [1, 1]} : vector<8x32xf32> to vector<8x1xf32>
    %95 = vector.extract_strided_slice %88 {offsets = [1, 0], sizes = [1, 256], strides = [1, 1]} : vector<32x256xf32> to vector<1x256xf32>
    %96 = vector.broadcast %94 : vector<8x1xf32> to vector<8x256xf32>
    %97 = vector.broadcast %95 : vector<1x256xf32> to vector<8x256xf32>
    %98 = arith.mulf %96, %97 : vector<8x256xf32>
    %99 = arith.addf %93, %98 : vector<8x256xf32>
    %100 = vector.extract_strided_slice %5 {offsets = [0, 2], sizes = [8, 1], strides = [1, 1]} : vector<8x32xf32> to vector<8x1xf32>
    %101 = vector.extract_strided_slice %88 {offsets = [2, 0], sizes = [1, 256], strides = [1, 1]} : vector<32x256xf32> to vector<1x256xf32>
    %102 = vector.broadcast %100 : vector<8x1xf32> to vector<8x256xf32>
    %103 = vector.broadcast %101 : vector<1x256xf32> to vector<8x256xf32>
    %104 = arith.mulf %102, %103 : vector<8x256xf32>
    %105 = arith.addf %99, %104 : vector<8x256xf32>
    %106 = vector.extract_strided_slice %5 {offsets = [0, 3], sizes = [8, 1], strides = [1, 1]} : vector<8x32xf32> to vector<8x1xf32>
    %107 = vector.extract_strided_slice %88 {offsets = [3, 0], sizes = [1, 256], strides = [1, 1]} : vector<32x256xf32> to vector<1x256xf32>
    %108 = vector.broadcast %106 : vector<8x1xf32> to vector<8x256xf32>
    %109 = vector.broadcast %107 : vector<1x256xf32> to vector<8x256xf32>
    %110 = arith.mulf %108, %109 : vector<8x256xf32>
    %111 = arith.addf %105, %110 : vector<8x256xf32>
    %112 = vector.extract_strided_slice %5 {offsets = [0, 4], sizes = [8, 1], strides = [1, 1]} : vector<8x32xf32> to vector<8x1xf32>
    %113 = vector.extract_strided_slice %88 {offsets = [4, 0], sizes = [1, 256], strides = [1, 1]} : vector<32x256xf32> to vector<1x256xf32>
    %114 = vector.broadcast %112 : vector<8x1xf32> to vector<8x256xf32>
    %115 = vector.broadcast %113 : vector<1x256xf32> to vector<8x256xf32>
    %116 = arith.mulf %114, %115 : vector<8x256xf32>
    %117 = arith.addf %111, %116 : vector<8x256xf32>
    %118 = vector.extract_strided_slice %5 {offsets = [0, 5], sizes = [8, 1], strides = [1, 1]} : vector<8x32xf32> to vector<8x1xf32>
    %119 = vector.extract_strided_slice %88 {offsets = [5, 0], sizes = [1, 256], strides = [1, 1]} : vector<32x256xf32> to vector<1x256xf32>
    %120 = vector.broadcast %118 : vector<8x1xf32> to vector<8x256xf32>
    %121 = vector.broadcast %119 : vector<1x256xf32> to vector<8x256xf32>
    %122 = arith.mulf %120, %121 : vector<8x256xf32>
    %123 = arith.addf %117, %122 : vector<8x256xf32>
    %124 = vector.extract_strided_slice %5 {offsets = [0, 6], sizes = [8, 1], strides = [1, 1]} : vector<8x32xf32> to vector<8x1xf32>
    %125 = vector.extract_strided_slice %88 {offsets = [6, 0], sizes = [1, 256], strides = [1, 1]} : vector<32x256xf32> to vector<1x256xf32>
    %126 = vector.broadcast %124 : vector<8x1xf32> to vector<8x256xf32>
    %127 = vector.broadcast %125 : vector<1x256xf32> to vector<8x256xf32>
    %128 = arith.mulf %126, %127 : vector<8x256xf32>
    %129 = arith.addf %123, %128 : vector<8x256xf32>
    %130 = vector.extract_strided_slice %5 {offsets = [0, 7], sizes = [8, 1], strides = [1, 1]} : vector<8x32xf32> to vector<8x1xf32>
    %131 = vector.extract_strided_slice %88 {offsets = [7, 0], sizes = [1, 256], strides = [1, 1]} : vector<32x256xf32> to vector<1x256xf32>
    %132 = vector.broadcast %130 : vector<8x1xf32> to vector<8x256xf32>
    %133 = vector.broadcast %131 : vector<1x256xf32> to vector<8x256xf32>
    %134 = arith.mulf %132, %133 : vector<8x256xf32>
    %135 = arith.addf %129, %134 : vector<8x256xf32>
    %136 = vector.extract_strided_slice %5 {offsets = [0, 8], sizes = [8, 1], strides = [1, 1]} : vector<8x32xf32> to vector<8x1xf32>
    %137 = vector.extract_strided_slice %88 {offsets = [8, 0], sizes = [1, 256], strides = [1, 1]} : vector<32x256xf32> to vector<1x256xf32>
    %138 = vector.broadcast %136 : vector<8x1xf32> to vector<8x256xf32>
    %139 = vector.broadcast %137 : vector<1x256xf32> to vector<8x256xf32>
    %140 = arith.mulf %138, %139 : vector<8x256xf32>
    %141 = arith.addf %135, %140 : vector<8x256xf32>
    %142 = vector.extract_strided_slice %5 {offsets = [0, 9], sizes = [8, 1], strides = [1, 1]} : vector<8x32xf32> to vector<8x1xf32>
    %143 = vector.extract_strided_slice %88 {offsets = [9, 0], sizes = [1, 256], strides = [1, 1]} : vector<32x256xf32> to vector<1x256xf32>
    %144 = vector.broadcast %142 : vector<8x1xf32> to vector<8x256xf32>
    %145 = vector.broadcast %143 : vector<1x256xf32> to vector<8x256xf32>
    %146 = arith.mulf %144, %145 : vector<8x256xf32>
    %147 = arith.addf %141, %146 : vector<8x256xf32>
    %148 = vector.extract_strided_slice %5 {offsets = [0, 10], sizes = [8, 1], strides = [1, 1]} : vector<8x32xf32> to vector<8x1xf32>
    %149 = vector.extract_strided_slice %88 {offsets = [10, 0], sizes = [1, 256], strides = [1, 1]} : vector<32x256xf32> to vector<1x256xf32>
    %150 = vector.broadcast %148 : vector<8x1xf32> to vector<8x256xf32>
    %151 = vector.broadcast %149 : vector<1x256xf32> to vector<8x256xf32>
    %152 = arith.mulf %150, %151 : vector<8x256xf32>
    %153 = arith.addf %147, %152 : vector<8x256xf32>
    %154 = vector.extract_strided_slice %5 {offsets = [0, 11], sizes = [8, 1], strides = [1, 1]} : vector<8x32xf32> to vector<8x1xf32>
    %155 = vector.extract_strided_slice %88 {offsets = [11, 0], sizes = [1, 256], strides = [1, 1]} : vector<32x256xf32> to vector<1x256xf32>
    %156 = vector.broadcast %154 : vector<8x1xf32> to vector<8x256xf32>
    %157 = vector.broadcast %155 : vector<1x256xf32> to vector<8x256xf32>
    %158 = arith.mulf %156, %157 : vector<8x256xf32>
    %159 = arith.addf %153, %158 : vector<8x256xf32>
    %160 = vector.extract_strided_slice %5 {offsets = [0, 12], sizes = [8, 1], strides = [1, 1]} : vector<8x32xf32> to vector<8x1xf32>
    %161 = vector.extract_strided_slice %88 {offsets = [12, 0], sizes = [1, 256], strides = [1, 1]} : vector<32x256xf32> to vector<1x256xf32>
    %162 = vector.broadcast %160 : vector<8x1xf32> to vector<8x256xf32>
    %163 = vector.broadcast %161 : vector<1x256xf32> to vector<8x256xf32>
    %164 = arith.mulf %162, %163 : vector<8x256xf32>
    %165 = arith.addf %159, %164 : vector<8x256xf32>
    %166 = vector.extract_strided_slice %5 {offsets = [0, 13], sizes = [8, 1], strides = [1, 1]} : vector<8x32xf32> to vector<8x1xf32>
    %167 = vector.extract_strided_slice %88 {offsets = [13, 0], sizes = [1, 256], strides = [1, 1]} : vector<32x256xf32> to vector<1x256xf32>
    %168 = vector.broadcast %166 : vector<8x1xf32> to vector<8x256xf32>
    %169 = vector.broadcast %167 : vector<1x256xf32> to vector<8x256xf32>
    %170 = arith.mulf %168, %169 : vector<8x256xf32>
    %171 = arith.addf %165, %170 : vector<8x256xf32>
    %172 = vector.extract_strided_slice %5 {offsets = [0, 14], sizes = [8, 1], strides = [1, 1]} : vector<8x32xf32> to vector<8x1xf32>
    %173 = vector.extract_strided_slice %88 {offsets = [14, 0], sizes = [1, 256], strides = [1, 1]} : vector<32x256xf32> to vector<1x256xf32>
    %174 = vector.broadcast %172 : vector<8x1xf32> to vector<8x256xf32>
    %175 = vector.broadcast %173 : vector<1x256xf32> to vector<8x256xf32>
    %176 = arith.mulf %174, %175 : vector<8x256xf32>
    %177 = arith.addf %171, %176 : vector<8x256xf32>
    %178 = vector.extract_strided_slice %5 {offsets = [0, 15], sizes = [8, 1], strides = [1, 1]} : vector<8x32xf32> to vector<8x1xf32>
    %179 = vector.extract_strided_slice %88 {offsets = [15, 0], sizes = [1, 256], strides = [1, 1]} : vector<32x256xf32> to vector<1x256xf32>
    %180 = vector.broadcast %178 : vector<8x1xf32> to vector<8x256xf32>
    %181 = vector.broadcast %179 : vector<1x256xf32> to vector<8x256xf32>
    %182 = arith.mulf %180, %181 : vector<8x256xf32>
    %183 = arith.addf %177, %182 : vector<8x256xf32>
    %184 = vector.extract_strided_slice %5 {offsets = [0, 16], sizes = [8, 1], strides = [1, 1]} : vector<8x32xf32> to vector<8x1xf32>
    %185 = vector.extract_strided_slice %88 {offsets = [16, 0], sizes = [1, 256], strides = [1, 1]} : vector<32x256xf32> to vector<1x256xf32>
    %186 = vector.broadcast %184 : vector<8x1xf32> to vector<8x256xf32>
    %187 = vector.broadcast %185 : vector<1x256xf32> to vector<8x256xf32>
    %188 = arith.mulf %186, %187 : vector<8x256xf32>
    %189 = arith.addf %183, %188 : vector<8x256xf32>
    %190 = vector.extract_strided_slice %5 {offsets = [0, 17], sizes = [8, 1], strides = [1, 1]} : vector<8x32xf32> to vector<8x1xf32>
    %191 = vector.extract_strided_slice %88 {offsets = [17, 0], sizes = [1, 256], strides = [1, 1]} : vector<32x256xf32> to vector<1x256xf32>
    %192 = vector.broadcast %190 : vector<8x1xf32> to vector<8x256xf32>
    %193 = vector.broadcast %191 : vector<1x256xf32> to vector<8x256xf32>
    %194 = arith.mulf %192, %193 : vector<8x256xf32>
    %195 = arith.addf %189, %194 : vector<8x256xf32>
    %196 = vector.extract_strided_slice %5 {offsets = [0, 18], sizes = [8, 1], strides = [1, 1]} : vector<8x32xf32> to vector<8x1xf32>
    %197 = vector.extract_strided_slice %88 {offsets = [18, 0], sizes = [1, 256], strides = [1, 1]} : vector<32x256xf32> to vector<1x256xf32>
    %198 = vector.broadcast %196 : vector<8x1xf32> to vector<8x256xf32>
    %199 = vector.broadcast %197 : vector<1x256xf32> to vector<8x256xf32>
    %200 = arith.mulf %198, %199 : vector<8x256xf32>
    %201 = arith.addf %195, %200 : vector<8x256xf32>
    %202 = vector.extract_strided_slice %5 {offsets = [0, 19], sizes = [8, 1], strides = [1, 1]} : vector<8x32xf32> to vector<8x1xf32>
    %203 = vector.extract_strided_slice %88 {offsets = [19, 0], sizes = [1, 256], strides = [1, 1]} : vector<32x256xf32> to vector<1x256xf32>
    %204 = vector.broadcast %202 : vector<8x1xf32> to vector<8x256xf32>
    %205 = vector.broadcast %203 : vector<1x256xf32> to vector<8x256xf32>
    %206 = arith.mulf %204, %205 : vector<8x256xf32>
    %207 = arith.addf %201, %206 : vector<8x256xf32>
    %208 = vector.extract_strided_slice %5 {offsets = [0, 20], sizes = [8, 1], strides = [1, 1]} : vector<8x32xf32> to vector<8x1xf32>
    %209 = vector.extract_strided_slice %88 {offsets = [20, 0], sizes = [1, 256], strides = [1, 1]} : vector<32x256xf32> to vector<1x256xf32>
    %210 = vector.broadcast %208 : vector<8x1xf32> to vector<8x256xf32>
    %211 = vector.broadcast %209 : vector<1x256xf32> to vector<8x256xf32>
    %212 = arith.mulf %210, %211 : vector<8x256xf32>
    %213 = arith.addf %207, %212 : vector<8x256xf32>
    %214 = vector.extract_strided_slice %5 {offsets = [0, 21], sizes = [8, 1], strides = [1, 1]} : vector<8x32xf32> to vector<8x1xf32>
    %215 = vector.extract_strided_slice %88 {offsets = [21, 0], sizes = [1, 256], strides = [1, 1]} : vector<32x256xf32> to vector<1x256xf32>
    %216 = vector.broadcast %214 : vector<8x1xf32> to vector<8x256xf32>
    %217 = vector.broadcast %215 : vector<1x256xf32> to vector<8x256xf32>
    %218 = arith.mulf %216, %217 : vector<8x256xf32>
    %219 = arith.addf %213, %218 : vector<8x256xf32>
    %220 = vector.extract_strided_slice %5 {offsets = [0, 22], sizes = [8, 1], strides = [1, 1]} : vector<8x32xf32> to vector<8x1xf32>
    %221 = vector.extract_strided_slice %88 {offsets = [22, 0], sizes = [1, 256], strides = [1, 1]} : vector<32x256xf32> to vector<1x256xf32>
    %222 = vector.broadcast %220 : vector<8x1xf32> to vector<8x256xf32>
    %223 = vector.broadcast %221 : vector<1x256xf32> to vector<8x256xf32>
    %224 = arith.mulf %222, %223 : vector<8x256xf32>
    %225 = arith.addf %219, %224 : vector<8x256xf32>
    %226 = vector.extract_strided_slice %5 {offsets = [0, 23], sizes = [8, 1], strides = [1, 1]} : vector<8x32xf32> to vector<8x1xf32>
    %227 = vector.extract_strided_slice %88 {offsets = [23, 0], sizes = [1, 256], strides = [1, 1]} : vector<32x256xf32> to vector<1x256xf32>
    %228 = vector.broadcast %226 : vector<8x1xf32> to vector<8x256xf32>
    %229 = vector.broadcast %227 : vector<1x256xf32> to vector<8x256xf32>
    %230 = arith.mulf %228, %229 : vector<8x256xf32>
    %231 = arith.addf %225, %230 : vector<8x256xf32>
    %232 = vector.extract_strided_slice %5 {offsets = [0, 24], sizes = [8, 1], strides = [1, 1]} : vector<8x32xf32> to vector<8x1xf32>
    %233 = vector.extract_strided_slice %88 {offsets = [24, 0], sizes = [1, 256], strides = [1, 1]} : vector<32x256xf32> to vector<1x256xf32>
    %234 = vector.broadcast %232 : vector<8x1xf32> to vector<8x256xf32>
    %235 = vector.broadcast %233 : vector<1x256xf32> to vector<8x256xf32>
    %236 = arith.mulf %234, %235 : vector<8x256xf32>
    %237 = arith.addf %231, %236 : vector<8x256xf32>
    %238 = vector.extract_strided_slice %5 {offsets = [0, 25], sizes = [8, 1], strides = [1, 1]} : vector<8x32xf32> to vector<8x1xf32>
    %239 = vector.extract_strided_slice %88 {offsets = [25, 0], sizes = [1, 256], strides = [1, 1]} : vector<32x256xf32> to vector<1x256xf32>
    %240 = vector.broadcast %238 : vector<8x1xf32> to vector<8x256xf32>
    %241 = vector.broadcast %239 : vector<1x256xf32> to vector<8x256xf32>
    %242 = arith.mulf %240, %241 : vector<8x256xf32>
    %243 = arith.addf %237, %242 : vector<8x256xf32>
    %244 = vector.extract_strided_slice %5 {offsets = [0, 26], sizes = [8, 1], strides = [1, 1]} : vector<8x32xf32> to vector<8x1xf32>
    %245 = vector.extract_strided_slice %88 {offsets = [26, 0], sizes = [1, 256], strides = [1, 1]} : vector<32x256xf32> to vector<1x256xf32>
    %246 = vector.broadcast %244 : vector<8x1xf32> to vector<8x256xf32>
    %247 = vector.broadcast %245 : vector<1x256xf32> to vector<8x256xf32>
    %248 = arith.mulf %246, %247 : vector<8x256xf32>
    %249 = arith.addf %243, %248 : vector<8x256xf32>
    %250 = vector.extract_strided_slice %5 {offsets = [0, 27], sizes = [8, 1], strides = [1, 1]} : vector<8x32xf32> to vector<8x1xf32>
    %251 = vector.extract_strided_slice %88 {offsets = [27, 0], sizes = [1, 256], strides = [1, 1]} : vector<32x256xf32> to vector<1x256xf32>
    %252 = vector.broadcast %250 : vector<8x1xf32> to vector<8x256xf32>
    %253 = vector.broadcast %251 : vector<1x256xf32> to vector<8x256xf32>
    %254 = arith.mulf %252, %253 : vector<8x256xf32>
    %255 = arith.addf %249, %254 : vector<8x256xf32>
    %256 = vector.extract_strided_slice %5 {offsets = [0, 28], sizes = [8, 1], strides = [1, 1]} : vector<8x32xf32> to vector<8x1xf32>
    %257 = vector.extract_strided_slice %88 {offsets = [28, 0], sizes = [1, 256], strides = [1, 1]} : vector<32x256xf32> to vector<1x256xf32>
    %258 = vector.broadcast %256 : vector<8x1xf32> to vector<8x256xf32>
    %259 = vector.broadcast %257 : vector<1x256xf32> to vector<8x256xf32>
    %260 = arith.mulf %258, %259 : vector<8x256xf32>
    %261 = arith.addf %255, %260 : vector<8x256xf32>
    %262 = vector.extract_strided_slice %5 {offsets = [0, 29], sizes = [8, 1], strides = [1, 1]} : vector<8x32xf32> to vector<8x1xf32>
    %263 = vector.extract_strided_slice %88 {offsets = [29, 0], sizes = [1, 256], strides = [1, 1]} : vector<32x256xf32> to vector<1x256xf32>
    %264 = vector.broadcast %262 : vector<8x1xf32> to vector<8x256xf32>
    %265 = vector.broadcast %263 : vector<1x256xf32> to vector<8x256xf32>
    %266 = arith.mulf %264, %265 : vector<8x256xf32>
    %267 = arith.addf %261, %266 : vector<8x256xf32>
    %268 = vector.extract_strided_slice %5 {offsets = [0, 30], sizes = [8, 1], strides = [1, 1]} : vector<8x32xf32> to vector<8x1xf32>
    %269 = vector.extract_strided_slice %88 {offsets = [30, 0], sizes = [1, 256], strides = [1, 1]} : vector<32x256xf32> to vector<1x256xf32>
    %270 = vector.broadcast %268 : vector<8x1xf32> to vector<8x256xf32>
    %271 = vector.broadcast %269 : vector<1x256xf32> to vector<8x256xf32>
    %272 = arith.mulf %270, %271 : vector<8x256xf32>
    %273 = arith.addf %267, %272 : vector<8x256xf32>
    %274 = vector.extract_strided_slice %5 {offsets = [0, 31], sizes = [8, 1], strides = [1, 1]} : vector<8x32xf32> to vector<8x1xf32>
    %275 = vector.extract_strided_slice %88 {offsets = [31, 0], sizes = [1, 256], strides = [1, 1]} : vector<32x256xf32> to vector<1x256xf32>
    %276 = vector.broadcast %274 : vector<8x1xf32> to vector<8x256xf32>
    %277 = vector.broadcast %275 : vector<1x256xf32> to vector<8x256xf32>
    %278 = arith.mulf %276, %277 : vector<8x256xf32>
    %279 = arith.addf %273, %278 : vector<8x256xf32>
    %280 = vector.broadcast %7 : vector<8x1xf32> to vector<8x256xf32>
    %281 = arith.addf %279, %280 : vector<8x256xf32>
    %282 = arith.subf %281, %18 : vector<8x256xf32>
    %283 = arith.mulf %282, %282 : vector<8x256xf32>
    %cst_31 = arith.constant dense<0.000000e+00> : vector<256xf32>
    %284 = vector.multi_reduction <add>, %283, %cst_31 [0] : vector<8x256xf32> to vector<256xf32>
    %285 = vector.shape_cast %284 : vector<256xf32> to vector<1x256xf32>
    %cst_32 = arith.constant dense<0.000000e+00> : vector<1xf32>
    %286 = vector.multi_reduction <add>, %285, %cst_32 [1] : vector<1x256xf32> to vector<1xf32>
    %287 = vector.shape_cast %286 : vector<1xf32> to vector<1x1xf32>
    %c0_33 = arith.constant 0 : index
    %c0_34 = arith.constant 0 : index
    %c0_35 = arith.constant 0 : index
    %288 = vector.load %arg13[%c0_33, %c0_34, %c0_35] : memref<1x4x1xf32, #tpu.memory_space<vmem>>, vector<1x1x1xf32>
    %289 = vector.shape_cast %288 : vector<1x1x1xf32> to vector<1x1xf32>
    %290 = vector.shape_cast %287 : vector<1x1xf32> to vector<1x1x1xf32>
    tpu.vector_store %arg13[%c0_33, %c0_34, %c0_35], %290 {strides = array<i32>} : memref<1x4x1xf32, #tpu.memory_space<vmem>>, vector<1x1x1xf32>,
    %c1 = arith.constant 1 : index
    %291 = memref.load %arg1[%c1] : memref<4xf32, #tpu.memory_space<smem>>
    %c1_36 = arith.constant 1 : index
    %292 = memref.load %arg2[%c1_36] : memref<4xf32, #tpu.memory_space<smem>>
    %c1_37 = arith.constant 1 : index
    %293 = memref.load %arg3[%c1_37] : memref<4xf32, #tpu.memory_space<smem>>
    %c1_38 = arith.constant 1 : index
    %c0_39 = arith.constant 0 : index
    %c0_40 = arith.constant 0 : index
    %294 = vector.load %arg4[%c1_38, %c0_39, %c0_40] : memref<4x8x256xf32, #tpu.memory_space<vmem>>, vector<1x8x256xf32>
    %295 = vector.shape_cast %294 : vector<1x8x256xf32> to vector<8x256xf32>
    %c1_41 = arith.constant 1 : index
    %c0_42 = arith.constant 0 : index
    %c0_43 = arith.constant 0 : index
    %296 = vector.load %arg5[%c1_41, %c0_42, %c0_43] : memref<4x8x256xf32, #tpu.memory_space<vmem>>, vector<1x8x256xf32>
    %297 = vector.shape_cast %296 : vector<1x8x256xf32> to vector<8x256xf32>
    %298 = vector.broadcast %291 : f32 to vector<8x256xf32>
    %299 = arith.mulf %298, %295 : vector<8x256xf32>
    %300 = vector.broadcast %292 : f32 to vector<8x256xf32>
    %301 = arith.mulf %300, %297 : vector<8x256xf32>
    %302 = arith.addf %299, %301 : vector<8x256xf32>
    %c1_44 = arith.constant 1 : index
    %c0_45 = arith.constant 0 : index
    %c0_46 = arith.constant 0 : index
    %303 = vector.load %arg6[%c1_44, %c0_45, %c0_46] : memref<4x8x32xf32, #tpu.memory_space<vmem>>, vector<1x8x32xf32>
    %304 = vector.shape_cast %303 : vector<1x8x32xf32> to vector<8x32xf32>
    %cst_47 = arith.constant dense<0.000000e+00> : vector<32xf32>
    %305 = vector.multi_reduction <add>, %304, %cst_47 [0] : vector<8x32xf32> to vector<32xf32>
    %306 = vector.shape_cast %305 : vector<32xf32> to vector<1x32xf32>
    %cst_48 = arith.constant 8.000000e+00 : f32
    %307 = vector.broadcast %cst_48 : f32 to vector<1x32xf32>
    %308 = arith.divf %306, %307 : vector<1x32xf32>
    %309 = vector.broadcast %308 : vector<1x32xf32> to vector<32x32xf32>
    %310 = arith.mulf %9, %309 : vector<32x32xf32>
    %cst_49 = arith.constant dense<0.000000e+00> : vector<32xf32>
    %311 = vector.multi_reduction <add>, %310, %cst_49 [1] : vector<32x32xf32> to vector<32xf32>
    %312 = vector.shape_cast %311 : vector<32xf32> to vector<32x1xf32>
    %313 = vector.broadcast %293 : f32 to vector<32x1xf32>
    %314 = arith.mulf %313, %11 : vector<32x1xf32>
    %315 = arith.addf %312, %314 : vector<32x1xf32>
    %316 = vector.extract_strided_slice %1 {offsets = [0, 0], sizes = [32, 1], strides = [1, 1]} : vector<32x8xf32> to vector<32x1xf32>
    %317 = vector.extract_strided_slice %302 {offsets = [0, 0], sizes = [1, 256], strides = [1, 1]} : vector<8x256xf32> to vector<1x256xf32>
    %318 = vector.broadcast %316 : vector<32x1xf32> to vector<32x256xf32>
    %319 = vector.broadcast %317 : vector<1x256xf32> to vector<32x256xf32>
    %320 = arith.mulf %318, %319 : vector<32x256xf32>
    %321 = vector.extract_strided_slice %1 {offsets = [0, 1], sizes = [32, 1], strides = [1, 1]} : vector<32x8xf32> to vector<32x1xf32>
    %322 = vector.extract_strided_slice %302 {offsets = [1, 0], sizes = [1, 256], strides = [1, 1]} : vector<8x256xf32> to vector<1x256xf32>
    %323 = vector.broadcast %321 : vector<32x1xf32> to vector<32x256xf32>
    %324 = vector.broadcast %322 : vector<1x256xf32> to vector<32x256xf32>
    %325 = arith.mulf %323, %324 : vector<32x256xf32>
    %326 = arith.addf %320, %325 : vector<32x256xf32>
    %327 = vector.extract_strided_slice %1 {offsets = [0, 2], sizes = [32, 1], strides = [1, 1]} : vector<32x8xf32> to vector<32x1xf32>
    %328 = vector.extract_strided_slice %302 {offsets = [2, 0], sizes = [1, 256], strides = [1, 1]} : vector<8x256xf32> to vector<1x256xf32>
    %329 = vector.broadcast %327 : vector<32x1xf32> to vector<32x256xf32>
    %330 = vector.broadcast %328 : vector<1x256xf32> to vector<32x256xf32>
    %331 = arith.mulf %329, %330 : vector<32x256xf32>
    %332 = arith.addf %326, %331 : vector<32x256xf32>
    %333 = vector.extract_strided_slice %1 {offsets = [0, 3], sizes = [32, 1], strides = [1, 1]} : vector<32x8xf32> to vector<32x1xf32>
    %334 = vector.extract_strided_slice %302 {offsets = [3, 0], sizes = [1, 256], strides = [1, 1]} : vector<8x256xf32> to vector<1x256xf32>
    %335 = vector.broadcast %333 : vector<32x1xf32> to vector<32x256xf32>
    %336 = vector.broadcast %334 : vector<1x256xf32> to vector<32x256xf32>
    %337 = arith.mulf %335, %336 : vector<32x256xf32>
    %338 = arith.addf %332, %337 : vector<32x256xf32>
    %339 = vector.extract_strided_slice %1 {offsets = [0, 4], sizes = [32, 1], strides = [1, 1]} : vector<32x8xf32> to vector<32x1xf32>
    %340 = vector.extract_strided_slice %302 {offsets = [4, 0], sizes = [1, 256], strides = [1, 1]} : vector<8x256xf32> to vector<1x256xf32>
    %341 = vector.broadcast %339 : vector<32x1xf32> to vector<32x256xf32>
    %342 = vector.broadcast %340 : vector<1x256xf32> to vector<32x256xf32>
    %343 = arith.mulf %341, %342 : vector<32x256xf32>
    %344 = arith.addf %338, %343 : vector<32x256xf32>
    %345 = vector.extract_strided_slice %1 {offsets = [0, 5], sizes = [32, 1], strides = [1, 1]} : vector<32x8xf32> to vector<32x1xf32>
    %346 = vector.extract_strided_slice %302 {offsets = [5, 0], sizes = [1, 256], strides = [1, 1]} : vector<8x256xf32> to vector<1x256xf32>
    %347 = vector.broadcast %345 : vector<32x1xf32> to vector<32x256xf32>
    %348 = vector.broadcast %346 : vector<1x256xf32> to vector<32x256xf32>
    %349 = arith.mulf %347, %348 : vector<32x256xf32>
    %350 = arith.addf %344, %349 : vector<32x256xf32>
    %351 = vector.extract_strided_slice %1 {offsets = [0, 6], sizes = [32, 1], strides = [1, 1]} : vector<32x8xf32> to vector<32x1xf32>
    %352 = vector.extract_strided_slice %302 {offsets = [6, 0], sizes = [1, 256], strides = [1, 1]} : vector<8x256xf32> to vector<1x256xf32>
    %353 = vector.broadcast %351 : vector<32x1xf32> to vector<32x256xf32>
    %354 = vector.broadcast %352 : vector<1x256xf32> to vector<32x256xf32>
    %355 = arith.mulf %353, %354 : vector<32x256xf32>
    %356 = arith.addf %350, %355 : vector<32x256xf32>
    %357 = vector.extract_strided_slice %1 {offsets = [0, 7], sizes = [32, 1], strides = [1, 1]} : vector<32x8xf32> to vector<32x1xf32>
    %358 = vector.extract_strided_slice %302 {offsets = [7, 0], sizes = [1, 256], strides = [1, 1]} : vector<8x256xf32> to vector<1x256xf32>
    %359 = vector.broadcast %357 : vector<32x1xf32> to vector<32x256xf32>
    %360 = vector.broadcast %358 : vector<1x256xf32> to vector<32x256xf32>
    %361 = arith.mulf %359, %360 : vector<32x256xf32>
    %362 = arith.addf %356, %361 : vector<32x256xf32>
    %363 = vector.broadcast %3 : vector<32x1xf32> to vector<32x256xf32>
    %364 = arith.addf %362, %363 : vector<32x256xf32>
    %365 = vector.broadcast %315 : vector<32x1xf32> to vector<32x256xf32>
    %366 = arith.addf %364, %365 : vector<32x256xf32>
    %367 = math.tanh %366 : vector<32x256xf32>
    %368 = vector.extract_strided_slice %5 {offsets = [0, 0], sizes = [8, 1], strides = [1, 1]} : vector<8x32xf32> to vector<8x1xf32>
    %369 = vector.extract_strided_slice %367 {offsets = [0, 0], sizes = [1, 256], strides = [1, 1]} : vector<32x256xf32> to vector<1x256xf32>
    %370 = vector.broadcast %368 : vector<8x1xf32> to vector<8x256xf32>
    %371 = vector.broadcast %369 : vector<1x256xf32> to vector<8x256xf32>
    %372 = arith.mulf %370, %371 : vector<8x256xf32>
    %373 = vector.extract_strided_slice %5 {offsets = [0, 1], sizes = [8, 1], strides = [1, 1]} : vector<8x32xf32> to vector<8x1xf32>
    %374 = vector.extract_strided_slice %367 {offsets = [1, 0], sizes = [1, 256], strides = [1, 1]} : vector<32x256xf32> to vector<1x256xf32>
    %375 = vector.broadcast %373 : vector<8x1xf32> to vector<8x256xf32>
    %376 = vector.broadcast %374 : vector<1x256xf32> to vector<8x256xf32>
    %377 = arith.mulf %375, %376 : vector<8x256xf32>
    %378 = arith.addf %372, %377 : vector<8x256xf32>
    %379 = vector.extract_strided_slice %5 {offsets = [0, 2], sizes = [8, 1], strides = [1, 1]} : vector<8x32xf32> to vector<8x1xf32>
    %380 = vector.extract_strided_slice %367 {offsets = [2, 0], sizes = [1, 256], strides = [1, 1]} : vector<32x256xf32> to vector<1x256xf32>
    %381 = vector.broadcast %379 : vector<8x1xf32> to vector<8x256xf32>
    %382 = vector.broadcast %380 : vector<1x256xf32> to vector<8x256xf32>
    %383 = arith.mulf %381, %382 : vector<8x256xf32>
    %384 = arith.addf %378, %383 : vector<8x256xf32>
    %385 = vector.extract_strided_slice %5 {offsets = [0, 3], sizes = [8, 1], strides = [1, 1]} : vector<8x32xf32> to vector<8x1xf32>
    %386 = vector.extract_strided_slice %367 {offsets = [3, 0], sizes = [1, 256], strides = [1, 1]} : vector<32x256xf32> to vector<1x256xf32>
    %387 = vector.broadcast %385 : vector<8x1xf32> to vector<8x256xf32>
    %388 = vector.broadcast %386 : vector<1x256xf32> to vector<8x256xf32>
    %389 = arith.mulf %387, %388 : vector<8x256xf32>
    %390 = arith.addf %384, %389 : vector<8x256xf32>
    %391 = vector.extract_strided_slice %5 {offsets = [0, 4], sizes = [8, 1], strides = [1, 1]} : vector<8x32xf32> to vector<8x1xf32>
    %392 = vector.extract_strided_slice %367 {offsets = [4, 0], sizes = [1, 256], strides = [1, 1]} : vector<32x256xf32> to vector<1x256xf32>
    %393 = vector.broadcast %391 : vector<8x1xf32> to vector<8x256xf32>
    %394 = vector.broadcast %392 : vector<1x256xf32> to vector<8x256xf32>
    %395 = arith.mulf %393, %394 : vector<8x256xf32>
    %396 = arith.addf %390, %395 : vector<8x256xf32>
    %397 = vector.extract_strided_slice %5 {offsets = [0, 5], sizes = [8, 1], strides = [1, 1]} : vector<8x32xf32> to vector<8x1xf32>
    %398 = vector.extract_strided_slice %367 {offsets = [5, 0], sizes = [1, 256], strides = [1, 1]} : vector<32x256xf32> to vector<1x256xf32>
    %399 = vector.broadcast %397 : vector<8x1xf32> to vector<8x256xf32>
    %400 = vector.broadcast %398 : vector<1x256xf32> to vector<8x256xf32>
    %401 = arith.mulf %399, %400 : vector<8x256xf32>
    %402 = arith.addf %396, %401 : vector<8x256xf32>
    %403 = vector.extract_strided_slice %5 {offsets = [0, 6], sizes = [8, 1], strides = [1, 1]} : vector<8x32xf32> to vector<8x1xf32>
    %404 = vector.extract_strided_slice %367 {offsets = [6, 0], sizes = [1, 256], strides = [1, 1]} : vector<32x256xf32> to vector<1x256xf32>
    %405 = vector.broadcast %403 : vector<8x1xf32> to vector<8x256xf32>
    %406 = vector.broadcast %404 : vector<1x256xf32> to vector<8x256xf32>
    %407 = arith.mulf %405, %406 : vector<8x256xf32>
    %408 = arith.addf %402, %407 : vector<8x256xf32>
    %409 = vector.extract_strided_slice %5 {offsets = [0, 7], sizes = [8, 1], strides = [1, 1]} : vector<8x32xf32> to vector<8x1xf32>
    %410 = vector.extract_strided_slice %367 {offsets = [7, 0], sizes = [1, 256], strides = [1, 1]} : vector<32x256xf32> to vector<1x256xf32>
    %411 = vector.broadcast %409 : vector<8x1xf32> to vector<8x256xf32>
    %412 = vector.broadcast %410 : vector<1x256xf32> to vector<8x256xf32>
    %413 = arith.mulf %411, %412 : vector<8x256xf32>
    %414 = arith.addf %408, %413 : vector<8x256xf32>
    %415 = vector.extract_strided_slice %5 {offsets = [0, 8], sizes = [8, 1], strides = [1, 1]} : vector<8x32xf32> to vector<8x1xf32>
    %416 = vector.extract_strided_slice %367 {offsets = [8, 0], sizes = [1, 256], strides = [1, 1]} : vector<32x256xf32> to vector<1x256xf32>
    %417 = vector.broadcast %415 : vector<8x1xf32> to vector<8x256xf32>
    %418 = vector.broadcast %416 : vector<1x256xf32> to vector<8x256xf32>
    %419 = arith.mulf %417, %418 : vector<8x256xf32>
    %420 = arith.addf %414, %419 : vector<8x256xf32>
    %421 = vector.extract_strided_slice %5 {offsets = [0, 9], sizes = [8, 1], strides = [1, 1]} : vector<8x32xf32> to vector<8x1xf32>
    %422 = vector.extract_strided_slice %367 {offsets = [9, 0], sizes = [1, 256], strides = [1, 1]} : vector<32x256xf32> to vector<1x256xf32>
    %423 = vector.broadcast %421 : vector<8x1xf32> to vector<8x256xf32>
    %424 = vector.broadcast %422 : vector<1x256xf32> to vector<8x256xf32>
    %425 = arith.mulf %423, %424 : vector<8x256xf32>
    %426 = arith.addf %420, %425 : vector<8x256xf32>
    %427 = vector.extract_strided_slice %5 {offsets = [0, 10], sizes = [8, 1], strides = [1, 1]} : vector<8x32xf32> to vector<8x1xf32>
    %428 = vector.extract_strided_slice %367 {offsets = [10, 0], sizes = [1, 256], strides = [1, 1]} : vector<32x256xf32> to vector<1x256xf32>
    %429 = vector.broadcast %427 : vector<8x1xf32> to vector<8x256xf32>
    %430 = vector.broadcast %428 : vector<1x256xf32> to vector<8x256xf32>
    %431 = arith.mulf %429, %430 : vector<8x256xf32>
    %432 = arith.addf %426, %431 : vector<8x256xf32>
    %433 = vector.extract_strided_slice %5 {offsets = [0, 11], sizes = [8, 1], strides = [1, 1]} : vector<8x32xf32> to vector<8x1xf32>
    %434 = vector.extract_strided_slice %367 {offsets = [11, 0], sizes = [1, 256], strides = [1, 1]} : vector<32x256xf32> to vector<1x256xf32>
    %435 = vector.broadcast %433 : vector<8x1xf32> to vector<8x256xf32>
    %436 = vector.broadcast %434 : vector<1x256xf32> to vector<8x256xf32>
    %437 = arith.mulf %435, %436 : vector<8x256xf32>
    %438 = arith.addf %432, %437 : vector<8x256xf32>
    %439 = vector.extract_strided_slice %5 {offsets = [0, 12], sizes = [8, 1], strides = [1, 1]} : vector<8x32xf32> to vector<8x1xf32>
    %440 = vector.extract_strided_slice %367 {offsets = [12, 0], sizes = [1, 256], strides = [1, 1]} : vector<32x256xf32> to vector<1x256xf32>
    %441 = vector.broadcast %439 : vector<8x1xf32> to vector<8x256xf32>
    %442 = vector.broadcast %440 : vector<1x256xf32> to vector<8x256xf32>
    %443 = arith.mulf %441, %442 : vector<8x256xf32>
    %444 = arith.addf %438, %443 : vector<8x256xf32>
    %445 = vector.extract_strided_slice %5 {offsets = [0, 13], sizes = [8, 1], strides = [1, 1]} : vector<8x32xf32> to vector<8x1xf32>
    %446 = vector.extract_strided_slice %367 {offsets = [13, 0], sizes = [1, 256], strides = [1, 1]} : vector<32x256xf32> to vector<1x256xf32>
    %447 = vector.broadcast %445 : vector<8x1xf32> to vector<8x256xf32>
    %448 = vector.broadcast %446 : vector<1x256xf32> to vector<8x256xf32>
    %449 = arith.mulf %447, %448 : vector<8x256xf32>
    %450 = arith.addf %444, %449 : vector<8x256xf32>
    %451 = vector.extract_strided_slice %5 {offsets = [0, 14], sizes = [8, 1], strides = [1, 1]} : vector<8x32xf32> to vector<8x1xf32>
    %452 = vector.extract_strided_slice %367 {offsets = [14, 0], sizes = [1, 256], strides = [1, 1]} : vector<32x256xf32> to vector<1x256xf32>
    %453 = vector.broadcast %451 : vector<8x1xf32> to vector<8x256xf32>
    %454 = vector.broadcast %452 : vector<1x256xf32> to vector<8x256xf32>
    %455 = arith.mulf %453, %454 : vector<8x256xf32>
    %456 = arith.addf %450, %455 : vector<8x256xf32>
    %457 = vector.extract_strided_slice %5 {offsets = [0, 15], sizes = [8, 1], strides = [1, 1]} : vector<8x32xf32> to vector<8x1xf32>
    %458 = vector.extract_strided_slice %367 {offsets = [15, 0], sizes = [1, 256], strides = [1, 1]} : vector<32x256xf32> to vector<1x256xf32>
    %459 = vector.broadcast %457 : vector<8x1xf32> to vector<8x256xf32>
    %460 = vector.broadcast %458 : vector<1x256xf32> to vector<8x256xf32>
    %461 = arith.mulf %459, %460 : vector<8x256xf32>
    %462 = arith.addf %456, %461 : vector<8x256xf32>
    %463 = vector.extract_strided_slice %5 {offsets = [0, 16], sizes = [8, 1], strides = [1, 1]} : vector<8x32xf32> to vector<8x1xf32>
    %464 = vector.extract_strided_slice %367 {offsets = [16, 0], sizes = [1, 256], strides = [1, 1]} : vector<32x256xf32> to vector<1x256xf32>
    %465 = vector.broadcast %463 : vector<8x1xf32> to vector<8x256xf32>
    %466 = vector.broadcast %464 : vector<1x256xf32> to vector<8x256xf32>
    %467 = arith.mulf %465, %466 : vector<8x256xf32>
    %468 = arith.addf %462, %467 : vector<8x256xf32>
    %469 = vector.extract_strided_slice %5 {offsets = [0, 17], sizes = [8, 1], strides = [1, 1]} : vector<8x32xf32> to vector<8x1xf32>
    %470 = vector.extract_strided_slice %367 {offsets = [17, 0], sizes = [1, 256], strides = [1, 1]} : vector<32x256xf32> to vector<1x256xf32>
    %471 = vector.broadcast %469 : vector<8x1xf32> to vector<8x256xf32>
    %472 = vector.broadcast %470 : vector<1x256xf32> to vector<8x256xf32>
    %473 = arith.mulf %471, %472 : vector<8x256xf32>
    %474 = arith.addf %468, %473 : vector<8x256xf32>
    %475 = vector.extract_strided_slice %5 {offsets = [0, 18], sizes = [8, 1], strides = [1, 1]} : vector<8x32xf32> to vector<8x1xf32>
    %476 = vector.extract_strided_slice %367 {offsets = [18, 0], sizes = [1, 256], strides = [1, 1]} : vector<32x256xf32> to vector<1x256xf32>
    %477 = vector.broadcast %475 : vector<8x1xf32> to vector<8x256xf32>
    %478 = vector.broadcast %476 : vector<1x256xf32> to vector<8x256xf32>
    %479 = arith.mulf %477, %478 : vector<8x256xf32>
    %480 = arith.addf %474, %479 : vector<8x256xf32>
    %481 = vector.extract_strided_slice %5 {offsets = [0, 19], sizes = [8, 1], strides = [1, 1]} : vector<8x32xf32> to vector<8x1xf32>
    %482 = vector.extract_strided_slice %367 {offsets = [19, 0], sizes = [1, 256], strides = [1, 1]} : vector<32x256xf32> to vector<1x256xf32>
    %483 = vector.broadcast %481 : vector<8x1xf32> to vector<8x256xf32>
    %484 = vector.broadcast %482 : vector<1x256xf32> to vector<8x256xf32>
    %485 = arith.mulf %483, %484 : vector<8x256xf32>
    %486 = arith.addf %480, %485 : vector<8x256xf32>
    %487 = vector.extract_strided_slice %5 {offsets = [0, 20], sizes = [8, 1], strides = [1, 1]} : vector<8x32xf32> to vector<8x1xf32>
    %488 = vector.extract_strided_slice %367 {offsets = [20, 0], sizes = [1, 256], strides = [1, 1]} : vector<32x256xf32> to vector<1x256xf32>
    %489 = vector.broadcast %487 : vector<8x1xf32> to vector<8x256xf32>
    %490 = vector.broadcast %488 : vector<1x256xf32> to vector<8x256xf32>
    %491 = arith.mulf %489, %490 : vector<8x256xf32>
    %492 = arith.addf %486, %491 : vector<8x256xf32>
    %493 = vector.extract_strided_slice %5 {offsets = [0, 21], sizes = [8, 1], strides = [1, 1]} : vector<8x32xf32> to vector<8x1xf32>
    %494 = vector.extract_strided_slice %367 {offsets = [21, 0], sizes = [1, 256], strides = [1, 1]} : vector<32x256xf32> to vector<1x256xf32>
    %495 = vector.broadcast %493 : vector<8x1xf32> to vector<8x256xf32>
    %496 = vector.broadcast %494 : vector<1x256xf32> to vector<8x256xf32>
    %497 = arith.mulf %495, %496 : vector<8x256xf32>
    %498 = arith.addf %492, %497 : vector<8x256xf32>
    %499 = vector.extract_strided_slice %5 {offsets = [0, 22], sizes = [8, 1], strides = [1, 1]} : vector<8x32xf32> to vector<8x1xf32>
    %500 = vector.extract_strided_slice %367 {offsets = [22, 0], sizes = [1, 256], strides = [1, 1]} : vector<32x256xf32> to vector<1x256xf32>
    %501 = vector.broadcast %499 : vector<8x1xf32> to vector<8x256xf32>
    %502 = vector.broadcast %500 : vector<1x256xf32> to vector<8x256xf32>
    %503 = arith.mulf %501, %502 : vector<8x256xf32>
    %504 = arith.addf %498, %503 : vector<8x256xf32>
    %505 = vector.extract_strided_slice %5 {offsets = [0, 23], sizes = [8, 1], strides = [1, 1]} : vector<8x32xf32> to vector<8x1xf32>
    %506 = vector.extract_strided_slice %367 {offsets = [23, 0], sizes = [1, 256], strides = [1, 1]} : vector<32x256xf32> to vector<1x256xf32>
    %507 = vector.broadcast %505 : vector<8x1xf32> to vector<8x256xf32>
    %508 = vector.broadcast %506 : vector<1x256xf32> to vector<8x256xf32>
    %509 = arith.mulf %507, %508 : vector<8x256xf32>
    %510 = arith.addf %504, %509 : vector<8x256xf32>
    %511 = vector.extract_strided_slice %5 {offsets = [0, 24], sizes = [8, 1], strides = [1, 1]} : vector<8x32xf32> to vector<8x1xf32>
    %512 = vector.extract_strided_slice %367 {offsets = [24, 0], sizes = [1, 256], strides = [1, 1]} : vector<32x256xf32> to vector<1x256xf32>
    %513 = vector.broadcast %511 : vector<8x1xf32> to vector<8x256xf32>
    %514 = vector.broadcast %512 : vector<1x256xf32> to vector<8x256xf32>
    %515 = arith.mulf %513, %514 : vector<8x256xf32>
    %516 = arith.addf %510, %515 : vector<8x256xf32>
    %517 = vector.extract_strided_slice %5 {offsets = [0, 25], sizes = [8, 1], strides = [1, 1]} : vector<8x32xf32> to vector<8x1xf32>
    %518 = vector.extract_strided_slice %367 {offsets = [25, 0], sizes = [1, 256], strides = [1, 1]} : vector<32x256xf32> to vector<1x256xf32>
    %519 = vector.broadcast %517 : vector<8x1xf32> to vector<8x256xf32>
    %520 = vector.broadcast %518 : vector<1x256xf32> to vector<8x256xf32>
    %521 = arith.mulf %519, %520 : vector<8x256xf32>
    %522 = arith.addf %516, %521 : vector<8x256xf32>
    %523 = vector.extract_strided_slice %5 {offsets = [0, 26], sizes = [8, 1], strides = [1, 1]} : vector<8x32xf32> to vector<8x1xf32>
    %524 = vector.extract_strided_slice %367 {offsets = [26, 0], sizes = [1, 256], strides = [1, 1]} : vector<32x256xf32> to vector<1x256xf32>
    %525 = vector.broadcast %523 : vector<8x1xf32> to vector<8x256xf32>
    %526 = vector.broadcast %524 : vector<1x256xf32> to vector<8x256xf32>
    %527 = arith.mulf %525, %526 : vector<8x256xf32>
    %528 = arith.addf %522, %527 : vector<8x256xf32>
    %529 = vector.extract_strided_slice %5 {offsets = [0, 27], sizes = [8, 1], strides = [1, 1]} : vector<8x32xf32> to vector<8x1xf32>
    %530 = vector.extract_strided_slice %367 {offsets = [27, 0], sizes = [1, 256], strides = [1, 1]} : vector<32x256xf32> to vector<1x256xf32>
    %531 = vector.broadcast %529 : vector<8x1xf32> to vector<8x256xf32>
    %532 = vector.broadcast %530 : vector<1x256xf32> to vector<8x256xf32>
    %533 = arith.mulf %531, %532 : vector<8x256xf32>
    %534 = arith.addf %528, %533 : vector<8x256xf32>
    %535 = vector.extract_strided_slice %5 {offsets = [0, 28], sizes = [8, 1], strides = [1, 1]} : vector<8x32xf32> to vector<8x1xf32>
    %536 = vector.extract_strided_slice %367 {offsets = [28, 0], sizes = [1, 256], strides = [1, 1]} : vector<32x256xf32> to vector<1x256xf32>
    %537 = vector.broadcast %535 : vector<8x1xf32> to vector<8x256xf32>
    %538 = vector.broadcast %536 : vector<1x256xf32> to vector<8x256xf32>
    %539 = arith.mulf %537, %538 : vector<8x256xf32>
    %540 = arith.addf %534, %539 : vector<8x256xf32>
    %541 = vector.extract_strided_slice %5 {offsets = [0, 29], sizes = [8, 1], strides = [1, 1]} : vector<8x32xf32> to vector<8x1xf32>
    %542 = vector.extract_strided_slice %367 {offsets = [29, 0], sizes = [1, 256], strides = [1, 1]} : vector<32x256xf32> to vector<1x256xf32>
    %543 = vector.broadcast %541 : vector<8x1xf32> to vector<8x256xf32>
    %544 = vector.broadcast %542 : vector<1x256xf32> to vector<8x256xf32>
    %545 = arith.mulf %543, %544 : vector<8x256xf32>
    %546 = arith.addf %540, %545 : vector<8x256xf32>
    %547 = vector.extract_strided_slice %5 {offsets = [0, 30], sizes = [8, 1], strides = [1, 1]} : vector<8x32xf32> to vector<8x1xf32>
    %548 = vector.extract_strided_slice %367 {offsets = [30, 0], sizes = [1, 256], strides = [1, 1]} : vector<32x256xf32> to vector<1x256xf32>
    %549 = vector.broadcast %547 : vector<8x1xf32> to vector<8x256xf32>
    %550 = vector.broadcast %548 : vector<1x256xf32> to vector<8x256xf32>
    %551 = arith.mulf %549, %550 : vector<8x256xf32>
    %552 = arith.addf %546, %551 : vector<8x256xf32>
    %553 = vector.extract_strided_slice %5 {offsets = [0, 31], sizes = [8, 1], strides = [1, 1]} : vector<8x32xf32> to vector<8x1xf32>
    %554 = vector.extract_strided_slice %367 {offsets = [31, 0], sizes = [1, 256], strides = [1, 1]} : vector<32x256xf32> to vector<1x256xf32>
    %555 = vector.broadcast %553 : vector<8x1xf32> to vector<8x256xf32>
    %556 = vector.broadcast %554 : vector<1x256xf32> to vector<8x256xf32>
    %557 = arith.mulf %555, %556 : vector<8x256xf32>
    %558 = arith.addf %552, %557 : vector<8x256xf32>
    %559 = vector.broadcast %7 : vector<8x1xf32> to vector<8x256xf32>
    %560 = arith.addf %558, %559 : vector<8x256xf32>
    %561 = arith.subf %560, %297 : vector<8x256xf32>
    %562 = arith.mulf %561, %561 : vector<8x256xf32>
    %cst_50 = arith.constant dense<0.000000e+00> : vector<256xf32>
    %563 = vector.multi_reduction <add>, %562, %cst_50 [0] : vector<8x256xf32> to vector<256xf32>
    %564 = vector.shape_cast %563 : vector<256xf32> to vector<1x256xf32>
    %cst_51 = arith.constant dense<0.000000e+00> : vector<1xf32>
    %565 = vector.multi_reduction <add>, %564, %cst_51 [1] : vector<1x256xf32> to vector<1xf32>
    %566 = vector.shape_cast %565 : vector<1xf32> to vector<1x1xf32>
    %c0_52 = arith.constant 0 : index
    %c1_53 = arith.constant 1 : index
    %c0_54 = arith.constant 0 : index
    %567 = vector.load %arg13[%c0_52, %c1_53, %c0_54] : memref<1x4x1xf32, #tpu.memory_space<vmem>>, vector<1x1x1xf32>
    %568 = vector.shape_cast %567 : vector<1x1x1xf32> to vector<1x1xf32>
    %569 = vector.shape_cast %566 : vector<1x1xf32> to vector<1x1x1xf32>
    tpu.vector_store %arg13[%c0_52, %c1_53, %c0_54], %569 {strides = array<i32>} : memref<1x4x1xf32, #tpu.memory_space<vmem>>, vector<1x1x1xf32>,
    %c2 = arith.constant 2 : index
    %570 = memref.load %arg1[%c2] : memref<4xf32, #tpu.memory_space<smem>>
    %c2_55 = arith.constant 2 : index
    %571 = memref.load %arg2[%c2_55] : memref<4xf32, #tpu.memory_space<smem>>
    %c2_56 = arith.constant 2 : index
    %572 = memref.load %arg3[%c2_56] : memref<4xf32, #tpu.memory_space<smem>>
    %c2_57 = arith.constant 2 : index
    %c0_58 = arith.constant 0 : index
    %c0_59 = arith.constant 0 : index
    %573 = vector.load %arg4[%c2_57, %c0_58, %c0_59] : memref<4x8x256xf32, #tpu.memory_space<vmem>>, vector<1x8x256xf32>
    %574 = vector.shape_cast %573 : vector<1x8x256xf32> to vector<8x256xf32>
    %c2_60 = arith.constant 2 : index
    %c0_61 = arith.constant 0 : index
    %c0_62 = arith.constant 0 : index
    %575 = vector.load %arg5[%c2_60, %c0_61, %c0_62] : memref<4x8x256xf32, #tpu.memory_space<vmem>>, vector<1x8x256xf32>
    %576 = vector.shape_cast %575 : vector<1x8x256xf32> to vector<8x256xf32>
    %577 = vector.broadcast %570 : f32 to vector<8x256xf32>
    %578 = arith.mulf %577, %574 : vector<8x256xf32>
    %579 = vector.broadcast %571 : f32 to vector<8x256xf32>
    %580 = arith.mulf %579, %576 : vector<8x256xf32>
    %581 = arith.addf %578, %580 : vector<8x256xf32>
    %c2_63 = arith.constant 2 : index
    %c0_64 = arith.constant 0 : index
    %c0_65 = arith.constant 0 : index
    %582 = vector.load %arg6[%c2_63, %c0_64, %c0_65] : memref<4x8x32xf32, #tpu.memory_space<vmem>>, vector<1x8x32xf32>
    %583 = vector.shape_cast %582 : vector<1x8x32xf32> to vector<8x32xf32>
    %cst_66 = arith.constant dense<0.000000e+00> : vector<32xf32>
    %584 = vector.multi_reduction <add>, %583, %cst_66 [0] : vector<8x32xf32> to vector<32xf32>
    %585 = vector.shape_cast %584 : vector<32xf32> to vector<1x32xf32>
    %cst_67 = arith.constant 8.000000e+00 : f32
    %586 = vector.broadcast %cst_67 : f32 to vector<1x32xf32>
    %587 = arith.divf %585, %586 : vector<1x32xf32>
    %588 = vector.broadcast %587 : vector<1x32xf32> to vector<32x32xf32>
    %589 = arith.mulf %9, %588 : vector<32x32xf32>
    %cst_68 = arith.constant dense<0.000000e+00> : vector<32xf32>
    %590 = vector.multi_reduction <add>, %589, %cst_68 [1] : vector<32x32xf32> to vector<32xf32>
    %591 = vector.shape_cast %590 : vector<32xf32> to vector<32x1xf32>
    %592 = vector.broadcast %572 : f32 to vector<32x1xf32>
    %593 = arith.mulf %592, %11 : vector<32x1xf32>
    %594 = arith.addf %591, %593 : vector<32x1xf32>
    %595 = vector.extract_strided_slice %1 {offsets = [0, 0], sizes = [32, 1], strides = [1, 1]} : vector<32x8xf32> to vector<32x1xf32>
    %596 = vector.extract_strided_slice %581 {offsets = [0, 0], sizes = [1, 256], strides = [1, 1]} : vector<8x256xf32> to vector<1x256xf32>
    %597 = vector.broadcast %595 : vector<32x1xf32> to vector<32x256xf32>
    %598 = vector.broadcast %596 : vector<1x256xf32> to vector<32x256xf32>
    %599 = arith.mulf %597, %598 : vector<32x256xf32>
    %600 = vector.extract_strided_slice %1 {offsets = [0, 1], sizes = [32, 1], strides = [1, 1]} : vector<32x8xf32> to vector<32x1xf32>
    %601 = vector.extract_strided_slice %581 {offsets = [1, 0], sizes = [1, 256], strides = [1, 1]} : vector<8x256xf32> to vector<1x256xf32>
    %602 = vector.broadcast %600 : vector<32x1xf32> to vector<32x256xf32>
    %603 = vector.broadcast %601 : vector<1x256xf32> to vector<32x256xf32>
    %604 = arith.mulf %602, %603 : vector<32x256xf32>
    %605 = arith.addf %599, %604 : vector<32x256xf32>
    %606 = vector.extract_strided_slice %1 {offsets = [0, 2], sizes = [32, 1], strides = [1, 1]} : vector<32x8xf32> to vector<32x1xf32>
    %607 = vector.extract_strided_slice %581 {offsets = [2, 0], sizes = [1, 256], strides = [1, 1]} : vector<8x256xf32> to vector<1x256xf32>
    %608 = vector.broadcast %606 : vector<32x1xf32> to vector<32x256xf32>
    %609 = vector.broadcast %607 : vector<1x256xf32> to vector<32x256xf32>
    %610 = arith.mulf %608, %609 : vector<32x256xf32>
    %611 = arith.addf %605, %610 : vector<32x256xf32>
    %612 = vector.extract_strided_slice %1 {offsets = [0, 3], sizes = [32, 1], strides = [1, 1]} : vector<32x8xf32> to vector<32x1xf32>
    %613 = vector.extract_strided_slice %581 {offsets = [3, 0], sizes = [1, 256], strides = [1, 1]} : vector<8x256xf32> to vector<1x256xf32>
    %614 = vector.broadcast %612 : vector<32x1xf32> to vector<32x256xf32>
    %615 = vector.broadcast %613 : vector<1x256xf32> to vector<32x256xf32>
    %616 = arith.mulf %614, %615 : vector<32x256xf32>
    %617 = arith.addf %611, %616 : vector<32x256xf32>
    %618 = vector.extract_strided_slice %1 {offsets = [0, 4], sizes = [32, 1], strides = [1, 1]} : vector<32x8xf32> to vector<32x1xf32>
    %619 = vector.extract_strided_slice %581 {offsets = [4, 0], sizes = [1, 256], strides = [1, 1]} : vector<8x256xf32> to vector<1x256xf32>
    %620 = vector.broadcast %618 : vector<32x1xf32> to vector<32x256xf32>
    %621 = vector.broadcast %619 : vector<1x256xf32> to vector<32x256xf32>
    %622 = arith.mulf %620, %621 : vector<32x256xf32>
    %623 = arith.addf %617, %622 : vector<32x256xf32>
    %624 = vector.extract_strided_slice %1 {offsets = [0, 5], sizes = [32, 1], strides = [1, 1]} : vector<32x8xf32> to vector<32x1xf32>
    %625 = vector.extract_strided_slice %581 {offsets = [5, 0], sizes = [1, 256], strides = [1, 1]} : vector<8x256xf32> to vector<1x256xf32>
    %626 = vector.broadcast %624 : vector<32x1xf32> to vector<32x256xf32>
    %627 = vector.broadcast %625 : vector<1x256xf32> to vector<32x256xf32>
    %628 = arith.mulf %626, %627 : vector<32x256xf32>
    %629 = arith.addf %623, %628 : vector<32x256xf32>
    %630 = vector.extract_strided_slice %1 {offsets = [0, 6], sizes = [32, 1], strides = [1, 1]} : vector<32x8xf32> to vector<32x1xf32>
    %631 = vector.extract_strided_slice %581 {offsets = [6, 0], sizes = [1, 256], strides = [1, 1]} : vector<8x256xf32> to vector<1x256xf32>
    %632 = vector.broadcast %630 : vector<32x1xf32> to vector<32x256xf32>
    %633 = vector.broadcast %631 : vector<1x256xf32> to vector<32x256xf32>
    %634 = arith.mulf %632, %633 : vector<32x256xf32>
    %635 = arith.addf %629, %634 : vector<32x256xf32>
    %636 = vector.extract_strided_slice %1 {offsets = [0, 7], sizes = [32, 1], strides = [1, 1]} : vector<32x8xf32> to vector<32x1xf32>
    %637 = vector.extract_strided_slice %581 {offsets = [7, 0], sizes = [1, 256], strides = [1, 1]} : vector<8x256xf32> to vector<1x256xf32>
    %638 = vector.broadcast %636 : vector<32x1xf32> to vector<32x256xf32>
    %639 = vector.broadcast %637 : vector<1x256xf32> to vector<32x256xf32>
    %640 = arith.mulf %638, %639 : vector<32x256xf32>
    %641 = arith.addf %635, %640 : vector<32x256xf32>
    %642 = vector.broadcast %3 : vector<32x1xf32> to vector<32x256xf32>
    %643 = arith.addf %641, %642 : vector<32x256xf32>
    %644 = vector.broadcast %594 : vector<32x1xf32> to vector<32x256xf32>
    %645 = arith.addf %643, %644 : vector<32x256xf32>
    %646 = math.tanh %645 : vector<32x256xf32>
    %647 = vector.extract_strided_slice %5 {offsets = [0, 0], sizes = [8, 1], strides = [1, 1]} : vector<8x32xf32> to vector<8x1xf32>
    %648 = vector.extract_strided_slice %646 {offsets = [0, 0], sizes = [1, 256], strides = [1, 1]} : vector<32x256xf32> to vector<1x256xf32>
    %649 = vector.broadcast %647 : vector<8x1xf32> to vector<8x256xf32>
    %650 = vector.broadcast %648 : vector<1x256xf32> to vector<8x256xf32>
    %651 = arith.mulf %649, %650 : vector<8x256xf32>
    %652 = vector.extract_strided_slice %5 {offsets = [0, 1], sizes = [8, 1], strides = [1, 1]} : vector<8x32xf32> to vector<8x1xf32>
    %653 = vector.extract_strided_slice %646 {offsets = [1, 0], sizes = [1, 256], strides = [1, 1]} : vector<32x256xf32> to vector<1x256xf32>
    %654 = vector.broadcast %652 : vector<8x1xf32> to vector<8x256xf32>
    %655 = vector.broadcast %653 : vector<1x256xf32> to vector<8x256xf32>
    %656 = arith.mulf %654, %655 : vector<8x256xf32>
    %657 = arith.addf %651, %656 : vector<8x256xf32>
    %658 = vector.extract_strided_slice %5 {offsets = [0, 2], sizes = [8, 1], strides = [1, 1]} : vector<8x32xf32> to vector<8x1xf32>
    %659 = vector.extract_strided_slice %646 {offsets = [2, 0], sizes = [1, 256], strides = [1, 1]} : vector<32x256xf32> to vector<1x256xf32>
    %660 = vector.broadcast %658 : vector<8x1xf32> to vector<8x256xf32>
    %661 = vector.broadcast %659 : vector<1x256xf32> to vector<8x256xf32>
    %662 = arith.mulf %660, %661 : vector<8x256xf32>
    %663 = arith.addf %657, %662 : vector<8x256xf32>
    %664 = vector.extract_strided_slice %5 {offsets = [0, 3], sizes = [8, 1], strides = [1, 1]} : vector<8x32xf32> to vector<8x1xf32>
    %665 = vector.extract_strided_slice %646 {offsets = [3, 0], sizes = [1, 256], strides = [1, 1]} : vector<32x256xf32> to vector<1x256xf32>
    %666 = vector.broadcast %664 : vector<8x1xf32> to vector<8x256xf32>
    %667 = vector.broadcast %665 : vector<1x256xf32> to vector<8x256xf32>
    %668 = arith.mulf %666, %667 : vector<8x256xf32>
    %669 = arith.addf %663, %668 : vector<8x256xf32>
    %670 = vector.extract_strided_slice %5 {offsets = [0, 4], sizes = [8, 1], strides = [1, 1]} : vector<8x32xf32> to vector<8x1xf32>
    %671 = vector.extract_strided_slice %646 {offsets = [4, 0], sizes = [1, 256], strides = [1, 1]} : vector<32x256xf32> to vector<1x256xf32>
    %672 = vector.broadcast %670 : vector<8x1xf32> to vector<8x256xf32>
    %673 = vector.broadcast %671 : vector<1x256xf32> to vector<8x256xf32>
    %674 = arith.mulf %672, %673 : vector<8x256xf32>
    %675 = arith.addf %669, %674 : vector<8x256xf32>
    %676 = vector.extract_strided_slice %5 {offsets = [0, 5], sizes = [8, 1], strides = [1, 1]} : vector<8x32xf32> to vector<8x1xf32>
    %677 = vector.extract_strided_slice %646 {offsets = [5, 0], sizes = [1, 256], strides = [1, 1]} : vector<32x256xf32> to vector<1x256xf32>
    %678 = vector.broadcast %676 : vector<8x1xf32> to vector<8x256xf32>
    %679 = vector.broadcast %677 : vector<1x256xf32> to vector<8x256xf32>
    %680 = arith.mulf %678, %679 : vector<8x256xf32>
    %681 = arith.addf %675, %680 : vector<8x256xf32>
    %682 = vector.extract_strided_slice %5 {offsets = [0, 6], sizes = [8, 1], strides = [1, 1]} : vector<8x32xf32> to vector<8x1xf32>
    %683 = vector.extract_strided_slice %646 {offsets = [6, 0], sizes = [1, 256], strides = [1, 1]} : vector<32x256xf32> to vector<1x256xf32>
    %684 = vector.broadcast %682 : vector<8x1xf32> to vector<8x256xf32>
    %685 = vector.broadcast %683 : vector<1x256xf32> to vector<8x256xf32>
    %686 = arith.mulf %684, %685 : vector<8x256xf32>
    %687 = arith.addf %681, %686 : vector<8x256xf32>
    %688 = vector.extract_strided_slice %5 {offsets = [0, 7], sizes = [8, 1], strides = [1, 1]} : vector<8x32xf32> to vector<8x1xf32>
    %689 = vector.extract_strided_slice %646 {offsets = [7, 0], sizes = [1, 256], strides = [1, 1]} : vector<32x256xf32> to vector<1x256xf32>
    %690 = vector.broadcast %688 : vector<8x1xf32> to vector<8x256xf32>
    %691 = vector.broadcast %689 : vector<1x256xf32> to vector<8x256xf32>
    %692 = arith.mulf %690, %691 : vector<8x256xf32>
    %693 = arith.addf %687, %692 : vector<8x256xf32>
    %694 = vector.extract_strided_slice %5 {offsets = [0, 8], sizes = [8, 1], strides = [1, 1]} : vector<8x32xf32> to vector<8x1xf32>
    %695 = vector.extract_strided_slice %646 {offsets = [8, 0], sizes = [1, 256], strides = [1, 1]} : vector<32x256xf32> to vector<1x256xf32>
    %696 = vector.broadcast %694 : vector<8x1xf32> to vector<8x256xf32>
    %697 = vector.broadcast %695 : vector<1x256xf32> to vector<8x256xf32>
    %698 = arith.mulf %696, %697 : vector<8x256xf32>
    %699 = arith.addf %693, %698 : vector<8x256xf32>
    %700 = vector.extract_strided_slice %5 {offsets = [0, 9], sizes = [8, 1], strides = [1, 1]} : vector<8x32xf32> to vector<8x1xf32>
    %701 = vector.extract_strided_slice %646 {offsets = [9, 0], sizes = [1, 256], strides = [1, 1]} : vector<32x256xf32> to vector<1x256xf32>
    %702 = vector.broadcast %700 : vector<8x1xf32> to vector<8x256xf32>
    %703 = vector.broadcast %701 : vector<1x256xf32> to vector<8x256xf32>
    %704 = arith.mulf %702, %703 : vector<8x256xf32>
    %705 = arith.addf %699, %704 : vector<8x256xf32>
    %706 = vector.extract_strided_slice %5 {offsets = [0, 10], sizes = [8, 1], strides = [1, 1]} : vector<8x32xf32> to vector<8x1xf32>
    %707 = vector.extract_strided_slice %646 {offsets = [10, 0], sizes = [1, 256], strides = [1, 1]} : vector<32x256xf32> to vector<1x256xf32>
    %708 = vector.broadcast %706 : vector<8x1xf32> to vector<8x256xf32>
    %709 = vector.broadcast %707 : vector<1x256xf32> to vector<8x256xf32>
    %710 = arith.mulf %708, %709 : vector<8x256xf32>
    %711 = arith.addf %705, %710 : vector<8x256xf32>
    %712 = vector.extract_strided_slice %5 {offsets = [0, 11], sizes = [8, 1], strides = [1, 1]} : vector<8x32xf32> to vector<8x1xf32>
    %713 = vector.extract_strided_slice %646 {offsets = [11, 0], sizes = [1, 256], strides = [1, 1]} : vector<32x256xf32> to vector<1x256xf32>
    %714 = vector.broadcast %712 : vector<8x1xf32> to vector<8x256xf32>
    %715 = vector.broadcast %713 : vector<1x256xf32> to vector<8x256xf32>
    %716 = arith.mulf %714, %715 : vector<8x256xf32>
    %717 = arith.addf %711, %716 : vector<8x256xf32>
    %718 = vector.extract_strided_slice %5 {offsets = [0, 12], sizes = [8, 1], strides = [1, 1]} : vector<8x32xf32> to vector<8x1xf32>
    %719 = vector.extract_strided_slice %646 {offsets = [12, 0], sizes = [1, 256], strides = [1, 1]} : vector<32x256xf32> to vector<1x256xf32>
    %720 = vector.broadcast %718 : vector<8x1xf32> to vector<8x256xf32>
    %721 = vector.broadcast %719 : vector<1x256xf32> to vector<8x256xf32>
    %722 = arith.mulf %720, %721 : vector<8x256xf32>
    %723 = arith.addf %717, %722 : vector<8x256xf32>
    %724 = vector.extract_strided_slice %5 {offsets = [0, 13], sizes = [8, 1], strides = [1, 1]} : vector<8x32xf32> to vector<8x1xf32>
    %725 = vector.extract_strided_slice %646 {offsets = [13, 0], sizes = [1, 256], strides = [1, 1]} : vector<32x256xf32> to vector<1x256xf32>
    %726 = vector.broadcast %724 : vector<8x1xf32> to vector<8x256xf32>
    %727 = vector.broadcast %725 : vector<1x256xf32> to vector<8x256xf32>
    %728 = arith.mulf %726, %727 : vector<8x256xf32>
    %729 = arith.addf %723, %728 : vector<8x256xf32>
    %730 = vector.extract_strided_slice %5 {offsets = [0, 14], sizes = [8, 1], strides = [1, 1]} : vector<8x32xf32> to vector<8x1xf32>
    %731 = vector.extract_strided_slice %646 {offsets = [14, 0], sizes = [1, 256], strides = [1, 1]} : vector<32x256xf32> to vector<1x256xf32>
    %732 = vector.broadcast %730 : vector<8x1xf32> to vector<8x256xf32>
    %733 = vector.broadcast %731 : vector<1x256xf32> to vector<8x256xf32>
    %734 = arith.mulf %732, %733 : vector<8x256xf32>
    %735 = arith.addf %729, %734 : vector<8x256xf32>
    %736 = vector.extract_strided_slice %5 {offsets = [0, 15], sizes = [8, 1], strides = [1, 1]} : vector<8x32xf32> to vector<8x1xf32>
    %737 = vector.extract_strided_slice %646 {offsets = [15, 0], sizes = [1, 256], strides = [1, 1]} : vector<32x256xf32> to vector<1x256xf32>
    %738 = vector.broadcast %736 : vector<8x1xf32> to vector<8x256xf32>
    %739 = vector.broadcast %737 : vector<1x256xf32> to vector<8x256xf32>
    %740 = arith.mulf %738, %739 : vector<8x256xf32>
    %741 = arith.addf %735, %740 : vector<8x256xf32>
    %742 = vector.extract_strided_slice %5 {offsets = [0, 16], sizes = [8, 1], strides = [1, 1]} : vector<8x32xf32> to vector<8x1xf32>
    %743 = vector.extract_strided_slice %646 {offsets = [16, 0], sizes = [1, 256], strides = [1, 1]} : vector<32x256xf32> to vector<1x256xf32>
    %744 = vector.broadcast %742 : vector<8x1xf32> to vector<8x256xf32>
    %745 = vector.broadcast %743 : vector<1x256xf32> to vector<8x256xf32>
    %746 = arith.mulf %744, %745 : vector<8x256xf32>
    %747 = arith.addf %741, %746 : vector<8x256xf32>
    %748 = vector.extract_strided_slice %5 {offsets = [0, 17], sizes = [8, 1], strides = [1, 1]} : vector<8x32xf32> to vector<8x1xf32>
    %749 = vector.extract_strided_slice %646 {offsets = [17, 0], sizes = [1, 256], strides = [1, 1]} : vector<32x256xf32> to vector<1x256xf32>
    %750 = vector.broadcast %748 : vector<8x1xf32> to vector<8x256xf32>
    %751 = vector.broadcast %749 : vector<1x256xf32> to vector<8x256xf32>
    %752 = arith.mulf %750, %751 : vector<8x256xf32>
    %753 = arith.addf %747, %752 : vector<8x256xf32>
    %754 = vector.extract_strided_slice %5 {offsets = [0, 18], sizes = [8, 1], strides = [1, 1]} : vector<8x32xf32> to vector<8x1xf32>
    %755 = vector.extract_strided_slice %646 {offsets = [18, 0], sizes = [1, 256], strides = [1, 1]} : vector<32x256xf32> to vector<1x256xf32>
    %756 = vector.broadcast %754 : vector<8x1xf32> to vector<8x256xf32>
    %757 = vector.broadcast %755 : vector<1x256xf32> to vector<8x256xf32>
    %758 = arith.mulf %756, %757 : vector<8x256xf32>
    %759 = arith.addf %753, %758 : vector<8x256xf32>
    %760 = vector.extract_strided_slice %5 {offsets = [0, 19], sizes = [8, 1], strides = [1, 1]} : vector<8x32xf32> to vector<8x1xf32>
    %761 = vector.extract_strided_slice %646 {offsets = [19, 0], sizes = [1, 256], strides = [1, 1]} : vector<32x256xf32> to vector<1x256xf32>
    %762 = vector.broadcast %760 : vector<8x1xf32> to vector<8x256xf32>
    %763 = vector.broadcast %761 : vector<1x256xf32> to vector<8x256xf32>
    %764 = arith.mulf %762, %763 : vector<8x256xf32>
    %765 = arith.addf %759, %764 : vector<8x256xf32>
    %766 = vector.extract_strided_slice %5 {offsets = [0, 20], sizes = [8, 1], strides = [1, 1]} : vector<8x32xf32> to vector<8x1xf32>
    %767 = vector.extract_strided_slice %646 {offsets = [20, 0], sizes = [1, 256], strides = [1, 1]} : vector<32x256xf32> to vector<1x256xf32>
    %768 = vector.broadcast %766 : vector<8x1xf32> to vector<8x256xf32>
    %769 = vector.broadcast %767 : vector<1x256xf32> to vector<8x256xf32>
    %770 = arith.mulf %768, %769 : vector<8x256xf32>
    %771 = arith.addf %765, %770 : vector<8x256xf32>
    %772 = vector.extract_strided_slice %5 {offsets = [0, 21], sizes = [8, 1], strides = [1, 1]} : vector<8x32xf32> to vector<8x1xf32>
    %773 = vector.extract_strided_slice %646 {offsets = [21, 0], sizes = [1, 256], strides = [1, 1]} : vector<32x256xf32> to vector<1x256xf32>
    %774 = vector.broadcast %772 : vector<8x1xf32> to vector<8x256xf32>
    %775 = vector.broadcast %773 : vector<1x256xf32> to vector<8x256xf32>
    %776 = arith.mulf %774, %775 : vector<8x256xf32>
    %777 = arith.addf %771, %776 : vector<8x256xf32>
    %778 = vector.extract_strided_slice %5 {offsets = [0, 22], sizes = [8, 1], strides = [1, 1]} : vector<8x32xf32> to vector<8x1xf32>
    %779 = vector.extract_strided_slice %646 {offsets = [22, 0], sizes = [1, 256], strides = [1, 1]} : vector<32x256xf32> to vector<1x256xf32>
    %780 = vector.broadcast %778 : vector<8x1xf32> to vector<8x256xf32>
    %781 = vector.broadcast %779 : vector<1x256xf32> to vector<8x256xf32>
    %782 = arith.mulf %780, %781 : vector<8x256xf32>
    %783 = arith.addf %777, %782 : vector<8x256xf32>
    %784 = vector.extract_strided_slice %5 {offsets = [0, 23], sizes = [8, 1], strides = [1, 1]} : vector<8x32xf32> to vector<8x1xf32>
    %785 = vector.extract_strided_slice %646 {offsets = [23, 0], sizes = [1, 256], strides = [1, 1]} : vector<32x256xf32> to vector<1x256xf32>
    %786 = vector.broadcast %784 : vector<8x1xf32> to vector<8x256xf32>
    %787 = vector.broadcast %785 : vector<1x256xf32> to vector<8x256xf32>
    %788 = arith.mulf %786, %787 : vector<8x256xf32>
    %789 = arith.addf %783, %788 : vector<8x256xf32>
    %790 = vector.extract_strided_slice %5 {offsets = [0, 24], sizes = [8, 1], strides = [1, 1]} : vector<8x32xf32> to vector<8x1xf32>
    %791 = vector.extract_strided_slice %646 {offsets = [24, 0], sizes = [1, 256], strides = [1, 1]} : vector<32x256xf32> to vector<1x256xf32>
    %792 = vector.broadcast %790 : vector<8x1xf32> to vector<8x256xf32>
    %793 = vector.broadcast %791 : vector<1x256xf32> to vector<8x256xf32>
    %794 = arith.mulf %792, %793 : vector<8x256xf32>
    %795 = arith.addf %789, %794 : vector<8x256xf32>
    %796 = vector.extract_strided_slice %5 {offsets = [0, 25], sizes = [8, 1], strides = [1, 1]} : vector<8x32xf32> to vector<8x1xf32>
    %797 = vector.extract_strided_slice %646 {offsets = [25, 0], sizes = [1, 256], strides = [1, 1]} : vector<32x256xf32> to vector<1x256xf32>
    %798 = vector.broadcast %796 : vector<8x1xf32> to vector<8x256xf32>
    %799 = vector.broadcast %797 : vector<1x256xf32> to vector<8x256xf32>
    %800 = arith.mulf %798, %799 : vector<8x256xf32>
    %801 = arith.addf %795, %800 : vector<8x256xf32>
    %802 = vector.extract_strided_slice %5 {offsets = [0, 26], sizes = [8, 1], strides = [1, 1]} : vector<8x32xf32> to vector<8x1xf32>
    %803 = vector.extract_strided_slice %646 {offsets = [26, 0], sizes = [1, 256], strides = [1, 1]} : vector<32x256xf32> to vector<1x256xf32>
    %804 = vector.broadcast %802 : vector<8x1xf32> to vector<8x256xf32>
    %805 = vector.broadcast %803 : vector<1x256xf32> to vector<8x256xf32>
    %806 = arith.mulf %804, %805 : vector<8x256xf32>
    %807 = arith.addf %801, %806 : vector<8x256xf32>
    %808 = vector.extract_strided_slice %5 {offsets = [0, 27], sizes = [8, 1], strides = [1, 1]} : vector<8x32xf32> to vector<8x1xf32>
    %809 = vector.extract_strided_slice %646 {offsets = [27, 0], sizes = [1, 256], strides = [1, 1]} : vector<32x256xf32> to vector<1x256xf32>
    %810 = vector.broadcast %808 : vector<8x1xf32> to vector<8x256xf32>
    %811 = vector.broadcast %809 : vector<1x256xf32> to vector<8x256xf32>
    %812 = arith.mulf %810, %811 : vector<8x256xf32>
    %813 = arith.addf %807, %812 : vector<8x256xf32>
    %814 = vector.extract_strided_slice %5 {offsets = [0, 28], sizes = [8, 1], strides = [1, 1]} : vector<8x32xf32> to vector<8x1xf32>
    %815 = vector.extract_strided_slice %646 {offsets = [28, 0], sizes = [1, 256], strides = [1, 1]} : vector<32x256xf32> to vector<1x256xf32>
    %816 = vector.broadcast %814 : vector<8x1xf32> to vector<8x256xf32>
    %817 = vector.broadcast %815 : vector<1x256xf32> to vector<8x256xf32>
    %818 = arith.mulf %816, %817 : vector<8x256xf32>
    %819 = arith.addf %813, %818 : vector<8x256xf32>
    %820 = vector.extract_strided_slice %5 {offsets = [0, 29], sizes = [8, 1], strides = [1, 1]} : vector<8x32xf32> to vector<8x1xf32>
    %821 = vector.extract_strided_slice %646 {offsets = [29, 0], sizes = [1, 256], strides = [1, 1]} : vector<32x256xf32> to vector<1x256xf32>
    %822 = vector.broadcast %820 : vector<8x1xf32> to vector<8x256xf32>
    %823 = vector.broadcast %821 : vector<1x256xf32> to vector<8x256xf32>
    %824 = arith.mulf %822, %823 : vector<8x256xf32>
    %825 = arith.addf %819, %824 : vector<8x256xf32>
    %826 = vector.extract_strided_slice %5 {offsets = [0, 30], sizes = [8, 1], strides = [1, 1]} : vector<8x32xf32> to vector<8x1xf32>
    %827 = vector.extract_strided_slice %646 {offsets = [30, 0], sizes = [1, 256], strides = [1, 1]} : vector<32x256xf32> to vector<1x256xf32>
    %828 = vector.broadcast %826 : vector<8x1xf32> to vector<8x256xf32>
    %829 = vector.broadcast %827 : vector<1x256xf32> to vector<8x256xf32>
    %830 = arith.mulf %828, %829 : vector<8x256xf32>
    %831 = arith.addf %825, %830 : vector<8x256xf32>
    %832 = vector.extract_strided_slice %5 {offsets = [0, 31], sizes = [8, 1], strides = [1, 1]} : vector<8x32xf32> to vector<8x1xf32>
    %833 = vector.extract_strided_slice %646 {offsets = [31, 0], sizes = [1, 256], strides = [1, 1]} : vector<32x256xf32> to vector<1x256xf32>
    %834 = vector.broadcast %832 : vector<8x1xf32> to vector<8x256xf32>
    %835 = vector.broadcast %833 : vector<1x256xf32> to vector<8x256xf32>
    %836 = arith.mulf %834, %835 : vector<8x256xf32>
    %837 = arith.addf %831, %836 : vector<8x256xf32>
    %838 = vector.broadcast %7 : vector<8x1xf32> to vector<8x256xf32>
    %839 = arith.addf %837, %838 : vector<8x256xf32>
    %840 = arith.subf %839, %576 : vector<8x256xf32>
    %841 = arith.mulf %840, %840 : vector<8x256xf32>
    %cst_69 = arith.constant dense<0.000000e+00> : vector<256xf32>
    %842 = vector.multi_reduction <add>, %841, %cst_69 [0] : vector<8x256xf32> to vector<256xf32>
    %843 = vector.shape_cast %842 : vector<256xf32> to vector<1x256xf32>
    %cst_70 = arith.constant dense<0.000000e+00> : vector<1xf32>
    %844 = vector.multi_reduction <add>, %843, %cst_70 [1] : vector<1x256xf32> to vector<1xf32>
    %845 = vector.shape_cast %844 : vector<1xf32> to vector<1x1xf32>
    %c0_71 = arith.constant 0 : index
    %c2_72 = arith.constant 2 : index
    %c0_73 = arith.constant 0 : index
    %846 = vector.load %arg13[%c0_71, %c2_72, %c0_73] : memref<1x4x1xf32, #tpu.memory_space<vmem>>, vector<1x1x1xf32>
    %847 = vector.shape_cast %846 : vector<1x1x1xf32> to vector<1x1xf32>
    %848 = vector.shape_cast %845 : vector<1x1xf32> to vector<1x1x1xf32>
    tpu.vector_store %arg13[%c0_71, %c2_72, %c0_73], %848 {strides = array<i32>} : memref<1x4x1xf32, #tpu.memory_space<vmem>>, vector<1x1x1xf32>,
    %c3 = arith.constant 3 : index
    %849 = memref.load %arg1[%c3] : memref<4xf32, #tpu.memory_space<smem>>
    %c3_74 = arith.constant 3 : index
    %850 = memref.load %arg2[%c3_74] : memref<4xf32, #tpu.memory_space<smem>>
    %c3_75 = arith.constant 3 : index
    %851 = memref.load %arg3[%c3_75] : memref<4xf32, #tpu.memory_space<smem>>
    %c3_76 = arith.constant 3 : index
    %c0_77 = arith.constant 0 : index
    %c0_78 = arith.constant 0 : index
    %852 = vector.load %arg4[%c3_76, %c0_77, %c0_78] : memref<4x8x256xf32, #tpu.memory_space<vmem>>, vector<1x8x256xf32>
    %853 = vector.shape_cast %852 : vector<1x8x256xf32> to vector<8x256xf32>
    %c3_79 = arith.constant 3 : index
    %c0_80 = arith.constant 0 : index
    %c0_81 = arith.constant 0 : index
    %854 = vector.load %arg5[%c3_79, %c0_80, %c0_81] : memref<4x8x256xf32, #tpu.memory_space<vmem>>, vector<1x8x256xf32>
    %855 = vector.shape_cast %854 : vector<1x8x256xf32> to vector<8x256xf32>
    %856 = vector.broadcast %849 : f32 to vector<8x256xf32>
    %857 = arith.mulf %856, %853 : vector<8x256xf32>
    %858 = vector.broadcast %850 : f32 to vector<8x256xf32>
    %859 = arith.mulf %858, %855 : vector<8x256xf32>
    %860 = arith.addf %857, %859 : vector<8x256xf32>
    %c3_82 = arith.constant 3 : index
    %c0_83 = arith.constant 0 : index
    %c0_84 = arith.constant 0 : index
    %861 = vector.load %arg6[%c3_82, %c0_83, %c0_84] : memref<4x8x32xf32, #tpu.memory_space<vmem>>, vector<1x8x32xf32>
    %862 = vector.shape_cast %861 : vector<1x8x32xf32> to vector<8x32xf32>
    %cst_85 = arith.constant dense<0.000000e+00> : vector<32xf32>
    %863 = vector.multi_reduction <add>, %862, %cst_85 [0] : vector<8x32xf32> to vector<32xf32>
    %864 = vector.shape_cast %863 : vector<32xf32> to vector<1x32xf32>
    %cst_86 = arith.constant 8.000000e+00 : f32
    %865 = vector.broadcast %cst_86 : f32 to vector<1x32xf32>
    %866 = arith.divf %864, %865 : vector<1x32xf32>
    %867 = vector.broadcast %866 : vector<1x32xf32> to vector<32x32xf32>
    %868 = arith.mulf %9, %867 : vector<32x32xf32>
    %cst_87 = arith.constant dense<0.000000e+00> : vector<32xf32>
    %869 = vector.multi_reduction <add>, %868, %cst_87 [1] : vector<32x32xf32> to vector<32xf32>
    %870 = vector.shape_cast %869 : vector<32xf32> to vector<32x1xf32>
    %871 = vector.broadcast %851 : f32 to vector<32x1xf32>
    %872 = arith.mulf %871, %11 : vector<32x1xf32>
    %873 = arith.addf %870, %872 : vector<32x1xf32>
    %874 = vector.extract_strided_slice %1 {offsets = [0, 0], sizes = [32, 1], strides = [1, 1]} : vector<32x8xf32> to vector<32x1xf32>
    %875 = vector.extract_strided_slice %860 {offsets = [0, 0], sizes = [1, 256], strides = [1, 1]} : vector<8x256xf32> to vector<1x256xf32>
    %876 = vector.broadcast %874 : vector<32x1xf32> to vector<32x256xf32>
    %877 = vector.broadcast %875 : vector<1x256xf32> to vector<32x256xf32>
    %878 = arith.mulf %876, %877 : vector<32x256xf32>
    %879 = vector.extract_strided_slice %1 {offsets = [0, 1], sizes = [32, 1], strides = [1, 1]} : vector<32x8xf32> to vector<32x1xf32>
    %880 = vector.extract_strided_slice %860 {offsets = [1, 0], sizes = [1, 256], strides = [1, 1]} : vector<8x256xf32> to vector<1x256xf32>
    %881 = vector.broadcast %879 : vector<32x1xf32> to vector<32x256xf32>
    %882 = vector.broadcast %880 : vector<1x256xf32> to vector<32x256xf32>
    %883 = arith.mulf %881, %882 : vector<32x256xf32>
    %884 = arith.addf %878, %883 : vector<32x256xf32>
    %885 = vector.extract_strided_slice %1 {offsets = [0, 2], sizes = [32, 1], strides = [1, 1]} : vector<32x8xf32> to vector<32x1xf32>
    %886 = vector.extract_strided_slice %860 {offsets = [2, 0], sizes = [1, 256], strides = [1, 1]} : vector<8x256xf32> to vector<1x256xf32>
    %887 = vector.broadcast %885 : vector<32x1xf32> to vector<32x256xf32>
    %888 = vector.broadcast %886 : vector<1x256xf32> to vector<32x256xf32>
    %889 = arith.mulf %887, %888 : vector<32x256xf32>
    %890 = arith.addf %884, %889 : vector<32x256xf32>
    %891 = vector.extract_strided_slice %1 {offsets = [0, 3], sizes = [32, 1], strides = [1, 1]} : vector<32x8xf32> to vector<32x1xf32>
    %892 = vector.extract_strided_slice %860 {offsets = [3, 0], sizes = [1, 256], strides = [1, 1]} : vector<8x256xf32> to vector<1x256xf32>
    %893 = vector.broadcast %891 : vector<32x1xf32> to vector<32x256xf32>
    %894 = vector.broadcast %892 : vector<1x256xf32> to vector<32x256xf32>
    %895 = arith.mulf %893, %894 : vector<32x256xf32>
    %896 = arith.addf %890, %895 : vector<32x256xf32>
    %897 = vector.extract_strided_slice %1 {offsets = [0, 4], sizes = [32, 1], strides = [1, 1]} : vector<32x8xf32> to vector<32x1xf32>
    %898 = vector.extract_strided_slice %860 {offsets = [4, 0], sizes = [1, 256], strides = [1, 1]} : vector<8x256xf32> to vector<1x256xf32>
    %899 = vector.broadcast %897 : vector<32x1xf32> to vector<32x256xf32>
    %900 = vector.broadcast %898 : vector<1x256xf32> to vector<32x256xf32>
    %901 = arith.mulf %899, %900 : vector<32x256xf32>
    %902 = arith.addf %896, %901 : vector<32x256xf32>
    %903 = vector.extract_strided_slice %1 {offsets = [0, 5], sizes = [32, 1], strides = [1, 1]} : vector<32x8xf32> to vector<32x1xf32>
    %904 = vector.extract_strided_slice %860 {offsets = [5, 0], sizes = [1, 256], strides = [1, 1]} : vector<8x256xf32> to vector<1x256xf32>
    %905 = vector.broadcast %903 : vector<32x1xf32> to vector<32x256xf32>
    %906 = vector.broadcast %904 : vector<1x256xf32> to vector<32x256xf32>
    %907 = arith.mulf %905, %906 : vector<32x256xf32>
    %908 = arith.addf %902, %907 : vector<32x256xf32>
    %909 = vector.extract_strided_slice %1 {offsets = [0, 6], sizes = [32, 1], strides = [1, 1]} : vector<32x8xf32> to vector<32x1xf32>
    %910 = vector.extract_strided_slice %860 {offsets = [6, 0], sizes = [1, 256], strides = [1, 1]} : vector<8x256xf32> to vector<1x256xf32>
    %911 = vector.broadcast %909 : vector<32x1xf32> to vector<32x256xf32>
    %912 = vector.broadcast %910 : vector<1x256xf32> to vector<32x256xf32>
    %913 = arith.mulf %911, %912 : vector<32x256xf32>
    %914 = arith.addf %908, %913 : vector<32x256xf32>
    %915 = vector.extract_strided_slice %1 {offsets = [0, 7], sizes = [32, 1], strides = [1, 1]} : vector<32x8xf32> to vector<32x1xf32>
    %916 = vector.extract_strided_slice %860 {offsets = [7, 0], sizes = [1, 256], strides = [1, 1]} : vector<8x256xf32> to vector<1x256xf32>
    %917 = vector.broadcast %915 : vector<32x1xf32> to vector<32x256xf32>
    %918 = vector.broadcast %916 : vector<1x256xf32> to vector<32x256xf32>
    %919 = arith.mulf %917, %918 : vector<32x256xf32>
    %920 = arith.addf %914, %919 : vector<32x256xf32>
    %921 = vector.broadcast %3 : vector<32x1xf32> to vector<32x256xf32>
    %922 = arith.addf %920, %921 : vector<32x256xf32>
    %923 = vector.broadcast %873 : vector<32x1xf32> to vector<32x256xf32>
    %924 = arith.addf %922, %923 : vector<32x256xf32>
    %925 = math.tanh %924 : vector<32x256xf32>
    %926 = vector.extract_strided_slice %5 {offsets = [0, 0], sizes = [8, 1], strides = [1, 1]} : vector<8x32xf32> to vector<8x1xf32>
    %927 = vector.extract_strided_slice %925 {offsets = [0, 0], sizes = [1, 256], strides = [1, 1]} : vector<32x256xf32> to vector<1x256xf32>
    %928 = vector.broadcast %926 : vector<8x1xf32> to vector<8x256xf32>
    %929 = vector.broadcast %927 : vector<1x256xf32> to vector<8x256xf32>
    %930 = arith.mulf %928, %929 : vector<8x256xf32>
    %931 = vector.extract_strided_slice %5 {offsets = [0, 1], sizes = [8, 1], strides = [1, 1]} : vector<8x32xf32> to vector<8x1xf32>
    %932 = vector.extract_strided_slice %925 {offsets = [1, 0], sizes = [1, 256], strides = [1, 1]} : vector<32x256xf32> to vector<1x256xf32>
    %933 = vector.broadcast %931 : vector<8x1xf32> to vector<8x256xf32>
    %934 = vector.broadcast %932 : vector<1x256xf32> to vector<8x256xf32>
    %935 = arith.mulf %933, %934 : vector<8x256xf32>
    %936 = arith.addf %930, %935 : vector<8x256xf32>
    %937 = vector.extract_strided_slice %5 {offsets = [0, 2], sizes = [8, 1], strides = [1, 1]} : vector<8x32xf32> to vector<8x1xf32>
    %938 = vector.extract_strided_slice %925 {offsets = [2, 0], sizes = [1, 256], strides = [1, 1]} : vector<32x256xf32> to vector<1x256xf32>
    %939 = vector.broadcast %937 : vector<8x1xf32> to vector<8x256xf32>
    %940 = vector.broadcast %938 : vector<1x256xf32> to vector<8x256xf32>
    %941 = arith.mulf %939, %940 : vector<8x256xf32>
    %942 = arith.addf %936, %941 : vector<8x256xf32>
    %943 = vector.extract_strided_slice %5 {offsets = [0, 3], sizes = [8, 1], strides = [1, 1]} : vector<8x32xf32> to vector<8x1xf32>
    %944 = vector.extract_strided_slice %925 {offsets = [3, 0], sizes = [1, 256], strides = [1, 1]} : vector<32x256xf32> to vector<1x256xf32>
    %945 = vector.broadcast %943 : vector<8x1xf32> to vector<8x256xf32>
    %946 = vector.broadcast %944 : vector<1x256xf32> to vector<8x256xf32>
    %947 = arith.mulf %945, %946 : vector<8x256xf32>
    %948 = arith.addf %942, %947 : vector<8x256xf32>
    %949 = vector.extract_strided_slice %5 {offsets = [0, 4], sizes = [8, 1], strides = [1, 1]} : vector<8x32xf32> to vector<8x1xf32>
    %950 = vector.extract_strided_slice %925 {offsets = [4, 0], sizes = [1, 256], strides = [1, 1]} : vector<32x256xf32> to vector<1x256xf32>
    %951 = vector.broadcast %949 : vector<8x1xf32> to vector<8x256xf32>
    %952 = vector.broadcast %950 : vector<1x256xf32> to vector<8x256xf32>
    %953 = arith.mulf %951, %952 : vector<8x256xf32>
    %954 = arith.addf %948, %953 : vector<8x256xf32>
    %955 = vector.extract_strided_slice %5 {offsets = [0, 5], sizes = [8, 1], strides = [1, 1]} : vector<8x32xf32> to vector<8x1xf32>
    %956 = vector.extract_strided_slice %925 {offsets = [5, 0], sizes = [1, 256], strides = [1, 1]} : vector<32x256xf32> to vector<1x256xf32>
    %957 = vector.broadcast %955 : vector<8x1xf32> to vector<8x256xf32>
    %958 = vector.broadcast %956 : vector<1x256xf32> to vector<8x256xf32>
    %959 = arith.mulf %957, %958 : vector<8x256xf32>
    %960 = arith.addf %954, %959 : vector<8x256xf32>
    %961 = vector.extract_strided_slice %5 {offsets = [0, 6], sizes = [8, 1], strides = [1, 1]} : vector<8x32xf32> to vector<8x1xf32>
    %962 = vector.extract_strided_slice %925 {offsets = [6, 0], sizes = [1, 256], strides = [1, 1]} : vector<32x256xf32> to vector<1x256xf32>
    %963 = vector.broadcast %961 : vector<8x1xf32> to vector<8x256xf32>
    %964 = vector.broadcast %962 : vector<1x256xf32> to vector<8x256xf32>
    %965 = arith.mulf %963, %964 : vector<8x256xf32>
    %966 = arith.addf %960, %965 : vector<8x256xf32>
    %967 = vector.extract_strided_slice %5 {offsets = [0, 7], sizes = [8, 1], strides = [1, 1]} : vector<8x32xf32> to vector<8x1xf32>
    %968 = vector.extract_strided_slice %925 {offsets = [7, 0], sizes = [1, 256], strides = [1, 1]} : vector<32x256xf32> to vector<1x256xf32>
    %969 = vector.broadcast %967 : vector<8x1xf32> to vector<8x256xf32>
    %970 = vector.broadcast %968 : vector<1x256xf32> to vector<8x256xf32>
    %971 = arith.mulf %969, %970 : vector<8x256xf32>
    %972 = arith.addf %966, %971 : vector<8x256xf32>
    %973 = vector.extract_strided_slice %5 {offsets = [0, 8], sizes = [8, 1], strides = [1, 1]} : vector<8x32xf32> to vector<8x1xf32>
    %974 = vector.extract_strided_slice %925 {offsets = [8, 0], sizes = [1, 256], strides = [1, 1]} : vector<32x256xf32> to vector<1x256xf32>
    %975 = vector.broadcast %973 : vector<8x1xf32> to vector<8x256xf32>
    %976 = vector.broadcast %974 : vector<1x256xf32> to vector<8x256xf32>
    %977 = arith.mulf %975, %976 : vector<8x256xf32>
    %978 = arith.addf %972, %977 : vector<8x256xf32>
    %979 = vector.extract_strided_slice %5 {offsets = [0, 9], sizes = [8, 1], strides = [1, 1]} : vector<8x32xf32> to vector<8x1xf32>
    %980 = vector.extract_strided_slice %925 {offsets = [9, 0], sizes = [1, 256], strides = [1, 1]} : vector<32x256xf32> to vector<1x256xf32>
    %981 = vector.broadcast %979 : vector<8x1xf32> to vector<8x256xf32>
    %982 = vector.broadcast %980 : vector<1x256xf32> to vector<8x256xf32>
    %983 = arith.mulf %981, %982 : vector<8x256xf32>
    %984 = arith.addf %978, %983 : vector<8x256xf32>
    %985 = vector.extract_strided_slice %5 {offsets = [0, 10], sizes = [8, 1], strides = [1, 1]} : vector<8x32xf32> to vector<8x1xf32>
    %986 = vector.extract_strided_slice %925 {offsets = [10, 0], sizes = [1, 256], strides = [1, 1]} : vector<32x256xf32> to vector<1x256xf32>
    %987 = vector.broadcast %985 : vector<8x1xf32> to vector<8x256xf32>
    %988 = vector.broadcast %986 : vector<1x256xf32> to vector<8x256xf32>
    %989 = arith.mulf %987, %988 : vector<8x256xf32>
    %990 = arith.addf %984, %989 : vector<8x256xf32>
    %991 = vector.extract_strided_slice %5 {offsets = [0, 11], sizes = [8, 1], strides = [1, 1]} : vector<8x32xf32> to vector<8x1xf32>
    %992 = vector.extract_strided_slice %925 {offsets = [11, 0], sizes = [1, 256], strides = [1, 1]} : vector<32x256xf32> to vector<1x256xf32>
    %993 = vector.broadcast %991 : vector<8x1xf32> to vector<8x256xf32>
    %994 = vector.broadcast %992 : vector<1x256xf32> to vector<8x256xf32>
    %995 = arith.mulf %993, %994 : vector<8x256xf32>
    %996 = arith.addf %990, %995 : vector<8x256xf32>
    %997 = vector.extract_strided_slice %5 {offsets = [0, 12], sizes = [8, 1], strides = [1, 1]} : vector<8x32xf32> to vector<8x1xf32>
    %998 = vector.extract_strided_slice %925 {offsets = [12, 0], sizes = [1, 256], strides = [1, 1]} : vector<32x256xf32> to vector<1x256xf32>
    %999 = vector.broadcast %997 : vector<8x1xf32> to vector<8x256xf32>
    %1000 = vector.broadcast %998 : vector<1x256xf32> to vector<8x256xf32>
    %1001 = arith.mulf %999, %1000 : vector<8x256xf32>
    %1002 = arith.addf %996, %1001 : vector<8x256xf32>
    %1003 = vector.extract_strided_slice %5 {offsets = [0, 13], sizes = [8, 1], strides = [1, 1]} : vector<8x32xf32> to vector<8x1xf32>
    %1004 = vector.extract_strided_slice %925 {offsets = [13, 0], sizes = [1, 256], strides = [1, 1]} : vector<32x256xf32> to vector<1x256xf32>
    %1005 = vector.broadcast %1003 : vector<8x1xf32> to vector<8x256xf32>
    %1006 = vector.broadcast %1004 : vector<1x256xf32> to vector<8x256xf32>
    %1007 = arith.mulf %1005, %1006 : vector<8x256xf32>
    %1008 = arith.addf %1002, %1007 : vector<8x256xf32>
    %1009 = vector.extract_strided_slice %5 {offsets = [0, 14], sizes = [8, 1], strides = [1, 1]} : vector<8x32xf32> to vector<8x1xf32>
    %1010 = vector.extract_strided_slice %925 {offsets = [14, 0], sizes = [1, 256], strides = [1, 1]} : vector<32x256xf32> to vector<1x256xf32>
    %1011 = vector.broadcast %1009 : vector<8x1xf32> to vector<8x256xf32>
    %1012 = vector.broadcast %1010 : vector<1x256xf32> to vector<8x256xf32>
    %1013 = arith.mulf %1011, %1012 : vector<8x256xf32>
    %1014 = arith.addf %1008, %1013 : vector<8x256xf32>
    %1015 = vector.extract_strided_slice %5 {offsets = [0, 15], sizes = [8, 1], strides = [1, 1]} : vector<8x32xf32> to vector<8x1xf32>
    %1016 = vector.extract_strided_slice %925 {offsets = [15, 0], sizes = [1, 256], strides = [1, 1]} : vector<32x256xf32> to vector<1x256xf32>
    %1017 = vector.broadcast %1015 : vector<8x1xf32> to vector<8x256xf32>
    %1018 = vector.broadcast %1016 : vector<1x256xf32> to vector<8x256xf32>
    %1019 = arith.mulf %1017, %1018 : vector<8x256xf32>
    %1020 = arith.addf %1014, %1019 : vector<8x256xf32>
    %1021 = vector.extract_strided_slice %5 {offsets = [0, 16], sizes = [8, 1], strides = [1, 1]} : vector<8x32xf32> to vector<8x1xf32>
    %1022 = vector.extract_strided_slice %925 {offsets = [16, 0], sizes = [1, 256], strides = [1, 1]} : vector<32x256xf32> to vector<1x256xf32>
    %1023 = vector.broadcast %1021 : vector<8x1xf32> to vector<8x256xf32>
    %1024 = vector.broadcast %1022 : vector<1x256xf32> to vector<8x256xf32>
    %1025 = arith.mulf %1023, %1024 : vector<8x256xf32>
    %1026 = arith.addf %1020, %1025 : vector<8x256xf32>
    %1027 = vector.extract_strided_slice %5 {offsets = [0, 17], sizes = [8, 1], strides = [1, 1]} : vector<8x32xf32> to vector<8x1xf32>
    %1028 = vector.extract_strided_slice %925 {offsets = [17, 0], sizes = [1, 256], strides = [1, 1]} : vector<32x256xf32> to vector<1x256xf32>
    %1029 = vector.broadcast %1027 : vector<8x1xf32> to vector<8x256xf32>
    %1030 = vector.broadcast %1028 : vector<1x256xf32> to vector<8x256xf32>
    %1031 = arith.mulf %1029, %1030 : vector<8x256xf32>
    %1032 = arith.addf %1026, %1031 : vector<8x256xf32>
    %1033 = vector.extract_strided_slice %5 {offsets = [0, 18], sizes = [8, 1], strides = [1, 1]} : vector<8x32xf32> to vector<8x1xf32>
    %1034 = vector.extract_strided_slice %925 {offsets = [18, 0], sizes = [1, 256], strides = [1, 1]} : vector<32x256xf32> to vector<1x256xf32>
    %1035 = vector.broadcast %1033 : vector<8x1xf32> to vector<8x256xf32>
    %1036 = vector.broadcast %1034 : vector<1x256xf32> to vector<8x256xf32>
    %1037 = arith.mulf %1035, %1036 : vector<8x256xf32>
    %1038 = arith.addf %1032, %1037 : vector<8x256xf32>
    %1039 = vector.extract_strided_slice %5 {offsets = [0, 19], sizes = [8, 1], strides = [1, 1]} : vector<8x32xf32> to vector<8x1xf32>
    %1040 = vector.extract_strided_slice %925 {offsets = [19, 0], sizes = [1, 256], strides = [1, 1]} : vector<32x256xf32> to vector<1x256xf32>
    %1041 = vector.broadcast %1039 : vector<8x1xf32> to vector<8x256xf32>
    %1042 = vector.broadcast %1040 : vector<1x256xf32> to vector<8x256xf32>
    %1043 = arith.mulf %1041, %1042 : vector<8x256xf32>
    %1044 = arith.addf %1038, %1043 : vector<8x256xf32>
    %1045 = vector.extract_strided_slice %5 {offsets = [0, 20], sizes = [8, 1], strides = [1, 1]} : vector<8x32xf32> to vector<8x1xf32>
    %1046 = vector.extract_strided_slice %925 {offsets = [20, 0], sizes = [1, 256], strides = [1, 1]} : vector<32x256xf32> to vector<1x256xf32>
    %1047 = vector.broadcast %1045 : vector<8x1xf32> to vector<8x256xf32>
    %1048 = vector.broadcast %1046 : vector<1x256xf32> to vector<8x256xf32>
    %1049 = arith.mulf %1047, %1048 : vector<8x256xf32>
    %1050 = arith.addf %1044, %1049 : vector<8x256xf32>
    %1051 = vector.extract_strided_slice %5 {offsets = [0, 21], sizes = [8, 1], strides = [1, 1]} : vector<8x32xf32> to vector<8x1xf32>
    %1052 = vector.extract_strided_slice %925 {offsets = [21, 0], sizes = [1, 256], strides = [1, 1]} : vector<32x256xf32> to vector<1x256xf32>
    %1053 = vector.broadcast %1051 : vector<8x1xf32> to vector<8x256xf32>
    %1054 = vector.broadcast %1052 : vector<1x256xf32> to vector<8x256xf32>
    %1055 = arith.mulf %1053, %1054 : vector<8x256xf32>
    %1056 = arith.addf %1050, %1055 : vector<8x256xf32>
    %1057 = vector.extract_strided_slice %5 {offsets = [0, 22], sizes = [8, 1], strides = [1, 1]} : vector<8x32xf32> to vector<8x1xf32>
    %1058 = vector.extract_strided_slice %925 {offsets = [22, 0], sizes = [1, 256], strides = [1, 1]} : vector<32x256xf32> to vector<1x256xf32>
    %1059 = vector.broadcast %1057 : vector<8x1xf32> to vector<8x256xf32>
    %1060 = vector.broadcast %1058 : vector<1x256xf32> to vector<8x256xf32>
    %1061 = arith.mulf %1059, %1060 : vector<8x256xf32>
    %1062 = arith.addf %1056, %1061 : vector<8x256xf32>
    %1063 = vector.extract_strided_slice %5 {offsets = [0, 23], sizes = [8, 1], strides = [1, 1]} : vector<8x32xf32> to vector<8x1xf32>
    %1064 = vector.extract_strided_slice %925 {offsets = [23, 0], sizes = [1, 256], strides = [1, 1]} : vector<32x256xf32> to vector<1x256xf32>
    %1065 = vector.broadcast %1063 : vector<8x1xf32> to vector<8x256xf32>
    %1066 = vector.broadcast %1064 : vector<1x256xf32> to vector<8x256xf32>
    %1067 = arith.mulf %1065, %1066 : vector<8x256xf32>
    %1068 = arith.addf %1062, %1067 : vector<8x256xf32>
    %1069 = vector.extract_strided_slice %5 {offsets = [0, 24], sizes = [8, 1], strides = [1, 1]} : vector<8x32xf32> to vector<8x1xf32>
    %1070 = vector.extract_strided_slice %925 {offsets = [24, 0], sizes = [1, 256], strides = [1, 1]} : vector<32x256xf32> to vector<1x256xf32>
    %1071 = vector.broadcast %1069 : vector<8x1xf32> to vector<8x256xf32>
    %1072 = vector.broadcast %1070 : vector<1x256xf32> to vector<8x256xf32>
    %1073 = arith.mulf %1071, %1072 : vector<8x256xf32>
    %1074 = arith.addf %1068, %1073 : vector<8x256xf32>
    %1075 = vector.extract_strided_slice %5 {offsets = [0, 25], sizes = [8, 1], strides = [1, 1]} : vector<8x32xf32> to vector<8x1xf32>
    %1076 = vector.extract_strided_slice %925 {offsets = [25, 0], sizes = [1, 256], strides = [1, 1]} : vector<32x256xf32> to vector<1x256xf32>
    %1077 = vector.broadcast %1075 : vector<8x1xf32> to vector<8x256xf32>
    %1078 = vector.broadcast %1076 : vector<1x256xf32> to vector<8x256xf32>
    %1079 = arith.mulf %1077, %1078 : vector<8x256xf32>
    %1080 = arith.addf %1074, %1079 : vector<8x256xf32>
    %1081 = vector.extract_strided_slice %5 {offsets = [0, 26], sizes = [8, 1], strides = [1, 1]} : vector<8x32xf32> to vector<8x1xf32>
    %1082 = vector.extract_strided_slice %925 {offsets = [26, 0], sizes = [1, 256], strides = [1, 1]} : vector<32x256xf32> to vector<1x256xf32>
    %1083 = vector.broadcast %1081 : vector<8x1xf32> to vector<8x256xf32>
    %1084 = vector.broadcast %1082 : vector<1x256xf32> to vector<8x256xf32>
    %1085 = arith.mulf %1083, %1084 : vector<8x256xf32>
    %1086 = arith.addf %1080, %1085 : vector<8x256xf32>
    %1087 = vector.extract_strided_slice %5 {offsets = [0, 27], sizes = [8, 1], strides = [1, 1]} : vector<8x32xf32> to vector<8x1xf32>
    %1088 = vector.extract_strided_slice %925 {offsets = [27, 0], sizes = [1, 256], strides = [1, 1]} : vector<32x256xf32> to vector<1x256xf32>
    %1089 = vector.broadcast %1087 : vector<8x1xf32> to vector<8x256xf32>
    %1090 = vector.broadcast %1088 : vector<1x256xf32> to vector<8x256xf32>
    %1091 = arith.mulf %1089, %1090 : vector<8x256xf32>
    %1092 = arith.addf %1086, %1091 : vector<8x256xf32>
    %1093 = vector.extract_strided_slice %5 {offsets = [0, 28], sizes = [8, 1], strides = [1, 1]} : vector<8x32xf32> to vector<8x1xf32>
    %1094 = vector.extract_strided_slice %925 {offsets = [28, 0], sizes = [1, 256], strides = [1, 1]} : vector<32x256xf32> to vector<1x256xf32>
    %1095 = vector.broadcast %1093 : vector<8x1xf32> to vector<8x256xf32>
    %1096 = vector.broadcast %1094 : vector<1x256xf32> to vector<8x256xf32>
    %1097 = arith.mulf %1095, %1096 : vector<8x256xf32>
    %1098 = arith.addf %1092, %1097 : vector<8x256xf32>
    %1099 = vector.extract_strided_slice %5 {offsets = [0, 29], sizes = [8, 1], strides = [1, 1]} : vector<8x32xf32> to vector<8x1xf32>
    %1100 = vector.extract_strided_slice %925 {offsets = [29, 0], sizes = [1, 256], strides = [1, 1]} : vector<32x256xf32> to vector<1x256xf32>
    %1101 = vector.broadcast %1099 : vector<8x1xf32> to vector<8x256xf32>
    %1102 = vector.broadcast %1100 : vector<1x256xf32> to vector<8x256xf32>
    %1103 = arith.mulf %1101, %1102 : vector<8x256xf32>
    %1104 = arith.addf %1098, %1103 : vector<8x256xf32>
    %1105 = vector.extract_strided_slice %5 {offsets = [0, 30], sizes = [8, 1], strides = [1, 1]} : vector<8x32xf32> to vector<8x1xf32>
    %1106 = vector.extract_strided_slice %925 {offsets = [30, 0], sizes = [1, 256], strides = [1, 1]} : vector<32x256xf32> to vector<1x256xf32>
    %1107 = vector.broadcast %1105 : vector<8x1xf32> to vector<8x256xf32>
    %1108 = vector.broadcast %1106 : vector<1x256xf32> to vector<8x256xf32>
    %1109 = arith.mulf %1107, %1108 : vector<8x256xf32>
    %1110 = arith.addf %1104, %1109 : vector<8x256xf32>
    %1111 = vector.extract_strided_slice %5 {offsets = [0, 31], sizes = [8, 1], strides = [1, 1]} : vector<8x32xf32> to vector<8x1xf32>
    %1112 = vector.extract_strided_slice %925 {offsets = [31, 0], sizes = [1, 256], strides = [1, 1]} : vector<32x256xf32> to vector<1x256xf32>
    %1113 = vector.broadcast %1111 : vector<8x1xf32> to vector<8x256xf32>
    %1114 = vector.broadcast %1112 : vector<1x256xf32> to vector<8x256xf32>
    %1115 = arith.mulf %1113, %1114 : vector<8x256xf32>
    %1116 = arith.addf %1110, %1115 : vector<8x256xf32>
    %1117 = vector.broadcast %7 : vector<8x1xf32> to vector<8x256xf32>
    %1118 = arith.addf %1116, %1117 : vector<8x256xf32>
    %1119 = arith.subf %1118, %855 : vector<8x256xf32>
    %1120 = arith.mulf %1119, %1119 : vector<8x256xf32>
    %cst_88 = arith.constant dense<0.000000e+00> : vector<256xf32>
    %1121 = vector.multi_reduction <add>, %1120, %cst_88 [0] : vector<8x256xf32> to vector<256xf32>
    %1122 = vector.shape_cast %1121 : vector<256xf32> to vector<1x256xf32>
    %cst_89 = arith.constant dense<0.000000e+00> : vector<1xf32>
    %1123 = vector.multi_reduction <add>, %1122, %cst_89 [1] : vector<1x256xf32> to vector<1xf32>
    %1124 = vector.shape_cast %1123 : vector<1xf32> to vector<1x1xf32>
    %c0_90 = arith.constant 0 : index
    %c3_91 = arith.constant 3 : index
    %c0_92 = arith.constant 0 : index
    %1125 = vector.load %arg13[%c0_90, %c3_91, %c0_92] : memref<1x4x1xf32, #tpu.memory_space<vmem>>, vector<1x1x1xf32>
    %1126 = vector.shape_cast %1125 : vector<1x1x1xf32> to vector<1x1xf32>
    %1127 = vector.shape_cast %1124 : vector<1x1xf32> to vector<1x1x1xf32>
    tpu.vector_store %arg13[%c0_90, %c3_91, %c0_92], %1127 {strides = array<i32>} : memref<1x4x1xf32, #tpu.memory_space<vmem>>, vector<1x1x1xf32>,
    return
  }
  func.func @transform_0(%arg0: i32) -> i32 {
    %c0_i32 = arith.constant 0 : i32
    %c0_i32_0 = arith.constant 0 : i32
    return %c0_i32 : i32
  }
  func.func @transform_1(%arg0: i32) -> i32 {
    %c0_i32 = arith.constant 0 : i32
    %c0_i32_0 = arith.constant 0 : i32
    return %c0_i32 : i32
  }
  func.func @transform_2(%arg0: i32) -> i32 {
    %c0_i32 = arith.constant 0 : i32
    %c0_i32_0 = arith.constant 0 : i32
    return %c0_i32 : i32
  }
  func.func @transform_3(%arg0: i32) -> (i32, i32, i32) {
    %c0_i32 = arith.constant 0 : i32
    %c0_i32_0 = arith.constant 0 : i32
    %c0_i32_1 = arith.constant 0 : i32
    %c0_i32_2 = arith.constant 0 : i32
    return %c0_i32, %c0_i32_0, %c0_i32_1 : i32, i32, i32
  }
  func.func @transform_4(%arg0: i32) -> (i32, i32, i32) {
    %c0_i32 = arith.constant 0 : i32
    %c0_i32_0 = arith.constant 0 : i32
    %c0_i32_1 = arith.constant 0 : i32
    %c0_i32_2 = arith.constant 0 : i32
    return %c0_i32, %c0_i32_0, %c0_i32_1 : i32, i32, i32
  }
  func.func @transform_5(%arg0: i32) -> (i32, i32, i32) {
    %c0_i32 = arith.constant 0 : i32
    %c0_i32_0 = arith.constant 0 : i32
    %c0_i32_1 = arith.constant 0 : i32
    %c0_i32_2 = arith.constant 0 : i32
    return %c0_i32, %c0_i32_0, %c0_i32_1 : i32, i32, i32
  }
  func.func @transform_6(%arg0: i32) -> (i32, i32, i32) {
    %c0_i32 = arith.constant 0 : i32
    %c0_i32_0 = arith.constant 0 : i32
    %c0_i32_1 = arith.constant 0 : i32
    return %arg0, %c0_i32, %c0_i32_0 : i32, i32, i32
  }
  func.func @transform_7(%arg0: i32) -> (i32, i32, i32) {
    %c0_i32 = arith.constant 0 : i32
    %c0_i32_0 = arith.constant 0 : i32
    %c0_i32_1 = arith.constant 0 : i32
    return %arg0, %c0_i32, %c0_i32_0 : i32, i32, i32
  }
  func.func @transform_8(%arg0: i32) -> (i32, i32, i32) {
    %c0_i32 = arith.constant 0 : i32
    %c0_i32_0 = arith.constant 0 : i32
    %c0_i32_1 = arith.constant 0 : i32
    return %arg0, %c0_i32, %c0_i32_0 : i32, i32, i32
  }
  func.func @transform_9(%arg0: i32) -> (i32, i32, i32) {
    %c0_i32 = arith.constant 0 : i32
    %c0_i32_0 = arith.constant 0 : i32
    %c0_i32_1 = arith.constant 0 : i32
    return %arg0, %c0_i32, %c0_i32_0 : i32, i32, i32
  }
  func.func @transform_10(%arg0: i32) -> (i32, i32, i32) {
    %c0_i32 = arith.constant 0 : i32
    %c0_i32_0 = arith.constant 0 : i32
    %c0_i32_1 = arith.constant 0 : i32
    return %arg0, %c0_i32, %c0_i32_0 : i32, i32, i32
  }
  func.func @transform_11(%arg0: i32) -> (i32, i32, i32) {
    %c0_i32 = arith.constant 0 : i32
    %c0_i32_0 = arith.constant 0 : i32
    %c0_i32_1 = arith.constant 0 : i32
    return %arg0, %c0_i32, %c0_i32_0 : i32, i32, i32
  }
  func.func @transform_12(%arg0: i32) -> (i32, i32, i32) {
    %c0_i32 = arith.constant 0 : i32
    %c0_i32_0 = arith.constant 0 : i32
    %c0_i32_1 = arith.constant 0 : i32
    return %arg0, %c0_i32, %c0_i32_0 : i32, i32, i32
  }
}

</mosaic_0001>

<bundles_post_ra>
// kernel: tile.18
= control target key start
LH: loop header
LB: loop body
LE: loop exit
PB: predicated region body
PF: predicated region fallthrough
CT: control target
= control target key end

     0   :  { %s22_s0 = inlined_call_operand.vmem [shape: s32[2], index: 0, kind: input, shape index: {}]   ;;  %s23_s1 = inlined_call_operand.vmem [shape: s32[2,2], index: 1, kind: output, shape index: {}]  }
   0x1   :  { %v4_v0 = vld [vmem:[%s22_s0] ss:$0 sm:$0xff] }
   0x2   :  { %5 = vst [vmem:[%s23_s1] sm:$0x3] %v4_v0 }

// kernel: dpo_forward.21
= control target key start
LH: loop header
LB: loop body
LE: loop exit
PB: predicated region body
PF: predicated region fallthrough
CT: control target
= control target key end

     0   :  { %s6007_s0 = inlined_call_operand.vmem [shape: f32[4], index: 0, kind: input, shape index: {}]   ;;  %s6008_s1 = inlined_call_operand.vmem [shape: f32[4], index: 1, kind: input, shape index: {}]   ;;  %s6009_s2 = inlined_call_operand.vmem [shape: f32[4], index: 2, kind: input, shape index: {}]   ;;  %s6010_s3 = inlined_call_operand.vmem [shape: f32[4,8,256], index: 3, kind: input, shape index: {}]   ;;  %s6011_s4 = inlined_call_operand.vmem [shape: f32[4,8,256], index: 4, kind: input, shape index: {}]   ;;  %s6012_s5 = inlined_call_operand.vmem [shape: f32[4,8,32], index: 5, kind: input, shape index: {}]   ;;  %s6013_s6 = inlined_call_operand.vmem [shape: f32[2,32,8], index: 6, kind: input, shape index: {}]   ;;  %s6014_s7 = inlined_call_operand.vmem [shape: f32[2,32,1], index: 7, kind: input, shape index: {}]   ;;  %s6015_s8 = inlined_call_operand.vmem [shape: f32[2,8,32], index: 8, kind: input, shape index: {}]   ;;  %s6016_s9 = inlined_call_operand.vmem [shape: f32[2,8,1], index: 9, kind: input, shape index: {}]   ;;  %s6017_s10 = inlined_call_operand.vmem [shape: f32[2,32,32], index: 10, kind: input, shape index: {}]   ;;  %s6018_s11 = inlined_call_operand.vmem [shape: f32[2,32,1], index: 11, kind: input, shape index: {}]   ;;  %s6019_s12 = inlined_call_operand.vmem [shape: f32[2,4,1], index: 12, kind: output, shape index: {}]  }
   0x1   :  { %6270 = sst [smem:[#allocation172_spill]] %s6007_s0 }
   0x2   :  { %6271 = sst [smem:[#allocation173_spill]] %s6008_s1 }
   0x3   :  { %6272 = sst [smem:[#allocation174_spill]] %s6009_s2 }
   0x4   :  { %6273 = sst [smem:[#allocation175_spill]] %s6012_s5 }
   0x5   :  { %17 = vsyncpa [#allocation3], 0 }
   0x6   :  { %18 = vsyncpa [#allocation5], 0  ;;  %s3193_s21 = smov 0  }
   0x7 LB: > { %s3199_s22 = sadd.s32 4294967295, %s3090_s21   ;;  %p2777_p0 = scmp.ge.s32.totalorder %s3090_s21, 1  ;;  %s3090_s21 = sphi %s3193_s21, %s24_s21  }
   0x8   : > { %p337_p1 = scmp.lt.s32.totalorder %s3090_s21, 3  ;;  %s6274_s1 = sld [smem:[#allocation173_spill]] }
   0x9   : > { %p2849_p3 = scmp.eq.s32.totalorder %s3199_s22, 0  ;;  %s6276_s0 = sld [smem:[#allocation172_spill]] }
   0xa   : > { %p3206_p2 = pnand %p2777_p0, %p337_p1  ;;  %s6277_s2 = sld [smem:[#allocation174_spill]] }
   0xb   : > { %s3092_s15 = smov [#allocation4]   ;;  %s3093_s16 = smov [#allocation2]  }
   0xc   : > { %p2839_p4 = pneg %p3206_p2  ;;  %s3094_s17 = smov [#allocation6]  }
   0xe   : > { %s359_s25 = sshll.u32 %s6274_s1, 4  ;;  %p2840_p5 = pnand %p2849_p3, %p2839_p4  ;;  %s360_s25 = int_to_ptr.vmem [resolvable:$true] %s359_s25 }
   0xf   : > { %s349_s29 = sshll.u32 %s6276_s0, 4  ;;  %437 = sbr.rel (%p3206_p2) target bundleno = 931 (0x3a3), region = 68  ;;  %s350_s29 = int_to_ptr.vmem [resolvable:$true] %s349_s29 }
  0x10   : > { %s369_s14 = sshll.u32 %s6277_s2, 4  ;;  %s370_s14 = int_to_ptr.vmem [resolvable:$true] %s369_s14 }
  0x11   : > { %2845 = dma.vmem_to_smem (!%p2840_p5), %s360_s25, 16, %s3092_s15, [#allocation5]  }
  0x12   : > { %2842 = dma.vmem_to_smem (!%p2840_p5), %s350_s29, 16, %s3093_s16, [#allocation3]  }
  0x13   : > { %2848 = dma.vmem_to_smem (!%p2840_p5), %s370_s14, 16, %s3094_s17, [#allocation5]  }
  0x14   : > { %3081 = dma.done.wait (%p2849_p3), [#allocation3], 16  }
  0x15   : > { %3083 = vsyncadd (%p2849_p3), [#allocation3], 4294967280 }
  0x16   : > { %3085 = dma.done.wait (%p2849_p3), [#allocation5], 32  }
  0x17   : > { %3087 = vsyncadd (%p2849_p3), [#allocation5], 4294967264 }
  0x18   : > { %454 = sfence }
  0x19   : > { %p513_p6 = scmp.lt.s32.totalorder %s3199_s22, 1  ;;  %s6278_s5 = sld [smem:[#allocation175_spill]]  ;;  %vm579_vm0 = vcmask 261120   ;;  %v3095_v1 = vmov 2   ;;  %v3096_v2 = vmov 1   ;;  %v3097_v4 = vmov 8.0  }
  0x1a   : > { %2900 = vset.pattern.permute.xlu1 %v3095_v1  ;;  %2899 = vset.pattern.permute.xlu2 %v3096_v2  ;;  %2952 = vrcp.f32 %v3097_v4  ;;  %v3098_v32 = vmov 3   ;;  %v3099_v35 = vmov 4   ;;  %v3100_v36 = vmov 5   ;;  %s565_s19 = sld [smem:[#allocation6]] }
  0x1b   : > { %s6881_s22 = smov (!%p513_p6, %s3199_s22), 1  ;;  %2902 = vset.pattern.permute.xlu0 %v3095_v1  ;;  %v3101_v37 = vmov 7   ;;  %v3102_v39 = vmov 6   ;;  %v3103_v40 = vmov 11   ;;  %v3104_v41 = vmov 16   ;;  %s3492_s30 = sld [smem:[#allocation2 + $0x3]] }
  0x1c   : > { %s3243_s20 = sshll.u32 %s6881_s22, 5  ;;  %s6020_s29 = sshll.u32 %s6881_s22, 3  ;;  %v3105_v42 = vmov 21   ;;  %v3106_v44 = vmov 26   ;;  %v3107_v48 = vmov 9   ;;  %v3108_v54 = vmov 12  }
  0x1d   : > { %s517_s25 = scalar_lea.vmem %s6013_s6, %s3243_s20  ;;  %s3259_s28 = scalar_lea.vmem %s6017_s10, %s3243_s20  ;;  %vm1297_vm2 = vcmask 0  }
  0x1e   : > { %v3249_v7 = vld [vmem:[%s517_s25] sm:$0xff]  ;;  %v3253_v14 = vld [vmem:[%s517_s25 + $0x8] sm:$0xff]  ;;  %v3269_v22 = vld [vmem:[%s517_s25 + $0x10] sm:$0xff]  ;;  %s3306_s14 = scalar_lea.vmem %s6015_s8, %s6020_s29  ;;  %s3494_s13 = sld [smem:[#allocation4 + $0x3]] }
  0x1f   : > { %v578_v0 = vld [vmem:[%s6278_s5] sm:$0xff]  ;;  %685 = vperm.xlu1 %2900, %v3249_v7   ;;  %651 = vperm.xlu2 %2899, %v3249_v7   ;;  %v3272_v23 = vld [vmem:[%s3259_s28 + $0x8] sm:$0xff]  ;;  %v3278_v27 = vld [vmem:[%s517_s25 + $0x18] sm:$0xff]  ;;  %s3359_s25 = scalar_lea.vmem %s6018_s11, %s3243_s20  ;;  %s3496_s15 = sld [smem:[#allocation2]] }
  0x20   : > { %v580_v3 = vsel %vm579_vm0, %v578_v0, 0.0  ;;  %v2953_v9 = vpop.eup %2952  ;;  %v3263_v18 = vld [vmem:[%s3259_s28] sm:$0xff]  ;;  %v3283_v28 = vld [vmem:[%s3259_s28 + $0x10] sm:$0xff]  ;;  %v558_v31 = vld [vmem:[%s3259_s28 + $0x18] sm:$0xff]  ;;  %v3364_v59 = vstv %s565_s19  ;;  %v3109_v0 = vmov 14   ;;  %s3500_s16 = sld [smem:[#allocation4]] }
  0x21   : > { %v581_v5 = vrot.slane %v580_v3, 4  ;;  %v588_v11 = vmul.f32 8.0, %v2953_v9  ;;  %vm592_vm1 = vweird.f32 %v2953_v9  ;;  %v3311_v38 = vld [vmem:[%s3306_s14] sm:$0xff]  ;;  %v2820_v45 = vld [vmem:[%s6278_s5 + $0x18] sm:$0xff]  ;;  %v2804_v50 = vld [vmem:[%s6278_s5 + $0x8] sm:$0xff]  ;;  %s3502_s17 = sld [smem:[#allocation2 + $0x1]] }
  0x22   : > { %6279 = vst [vmem:[#allocation9_spill] sm:$0xff] %v3311_v38  ;;  %v2206_v47 = vsel %vm579_vm0, %v2820_v45, 0.0  ;;  %v1318_v52 = vsel %vm579_vm0, %v2804_v50, 0.0  ;;  %v561_v58 = vld [vmem:[%s3359_s25 + $0x10] sm:$0xff]  ;;  %v3117_v45 = vmov 24   ;;  %v3421_v50 = vld [vmem:[%s3359_s25] sm:$0xff] }
  0x23   : > { %v582_v6 = vadd.f32 %v581_v5, %v580_v3  ;;  %v589_v13 = vsub.f32 1.0, %v588_v11  ;;  %v2207_v49 = vrot.slane %v2206_v47, 4  ;;  %v1319_v56 = vrot.slane %v1318_v52, 4  ;;  %v562_v5 = vld [vmem:[%s3359_s25 + $0x18] sm:$0xff]  ;;  %6294 = vst [vmem:[#allocation24_spill] sm:$0xff] %v3421_v50  ;;  %s3504_s18 = sld [smem:[#allocation4 + $0x1]] }
  0x24   : > { %v614_v62 = vmul.f32 %v3364_v59, %v561_v58  ;;  %v3120_v58 = vmov 18   ;;  %s3508_s19 = sld [smem:[#allocation2 + $0x2]] }
  0x25   : > { %v583_v8 = vrot.slane %v582_v6, 2  ;;  %v590_v15 = vmul.f32 %v2953_v9, %v589_v13  ;;  %v2208_v51 = vadd.f32 %v2207_v49, %v2206_v47  ;;  %v1320_v61 = vadd.f32 %v1319_v56, %v1318_v52  ;;  %s3510_s23 = sld [smem:[#allocation4 + $0x2]] }
  0x26   : > { %v3118_v49 = vmov 15   ;;  %s2799_s26 = sld [smem:[#allocation6 + $0x1]] }
  0x27   : > { %v584_v10 = vadd.f32 %v583_v8, %v582_v6  ;;  %v591_v17 = vadd.f32 %v2953_v9, %v590_v15  ;;  %655 = vperm.xlu2 %2899, %v3253_v14   ;;  %v2209_v55 = vrot.slane %v2208_v51, 2  ;;  %v3110_v15 = vmov 17  }
  0x29   : > { %v585_v12 = vrot.slane %v584_v10, 1  ;;  %v3265_v19 = vsel %vm592_vm1, %v2953_v9, %v591_v17  ;;  %v2210_v60 = vadd.f32 %v2209_v55, %v2208_v51  ;;  %v615_v9 = vmul.f32 %v3364_v59, %v562_v5 }
  0x2a   : > { %v3119_v51 = vmov 27  }
  0x2b   : > { %v586_v16 = vadd.f32 %v585_v12, %v584_v10 }
  0x2d   : > { %v594_v20 = vmul.f32 %v3265_v19, %v586_v16 }
  0x2f   : > { %v595_v21 = vmul.f32 %v594_v20, %v3263_v18  ;;  %659 = vperm.xlu2 %2899, %v3269_v22   ;;  %v596_v25 = vmul.f32 %v594_v20, %v3272_v23  ;;  %v597_v29 = vmul.f32 %v594_v20, %v3283_v28  ;;  %v598_v33 = vmul.f32 %v594_v20, %v558_v31 }
  0x31   : > { %v599_v24 = vsel %vm579_vm0, %v595_v21, 0.0  ;;  %v602_v26 = vsel %vm579_vm0, %v596_v25, 0.0  ;;  %v605_v30 = vsel %vm579_vm0, %v597_v29, 0.0  ;;  %v608_v34 = vsel %vm579_vm0, %v598_v33, 0.0 }
  0x32   : > { %600 = vadd.xlane.f32.xlu0 %v599_v24  ;;  %v6021_v24 = vmov 0   ;;  %v3112_v25 = vmov 8  }
  0x37   : > { %663 = vperm.xlu2 %2899, %v3278_v27  }
  0x3a   : > { %603 = vadd.xlane.f32.xlu0 %v602_v26  ;;  %v3390_v26 = vld [vmem:[%s3359_s25 + $0x8] sm:$0xff] }
  0x3b   : > { %6288 = vst [vmem:[#allocation18_spill] sm:$0xff] %v3390_v26  ;;  %v613_v31 = vmul.f32 %v3364_v59, %v3390_v26 }
  0x3f   : > { %2901 = vset.pattern.permute.xlu2 %v3095_v1 }
  0x40   : > { %689 = vperm.xlu2 %2901, %v3253_v14  }
  0x48   : > { %2903 = vset.pattern.permute.xlu2 %v3098_v32 }
  0x49   : > { %606 = vadd.xlane.f32.xlu1 %v605_v30  ;;  %719 = vperm.xlu2 %2903, %v3249_v7  }
  0x4e   : > { %697 = vperm.xlu0 %2902, %v3278_v27  }
  0x51   : > { %609 = vadd.xlane.f32.xlu1 %v608_v34  ;;  %727 = vperm.xlu2 %2903, %v3269_v22   ;;  %v3113_v34 = vmov 19  }
  0x56   : > { %2905 = vset.pattern.permute.xlu0 %v3099_v35 }
  0x57   : > { %753 = vperm.xlu0 %2905, %v3249_v7  }
  0x59   : > { %2906 = vset.pattern.permute.xlu2 %v3099_v35 }
  0x5a   : > { %757 = vperm.xlu2 %2906, %v3253_v14  }
  0x5f   : > { %2909 = vset.pattern.permute.xlu0 %v3100_v36 }
  0x60   : > { %791 = vperm.xlu0 %2909, %v3253_v14  }
  0x62   : > { %765 = vperm.xlu2 %2906, %v3278_v27  }
  0x68   : > { %2915 = vset.pattern.permute.xlu0 %v3101_v37 }
  0x69   : > { %867 = vperm.xlu0 %2915, %v3278_v27  }
  0x6a   : > { %693 = vperm.xlu1 %2900, %v3269_v22   ;;  %2910 = vset.pattern.permute.xlu2 %v3100_v36 }
  0x6b   : > { %795 = vperm.xlu2 %2910, %v3269_v22  }
  0x71   : > { %2916 = vset.pattern.permute.xlu0 %v3096_v2  ;;  %v1321_v2 = vrot.slane %v1320_v61, 2 }
  0x72   : > { %962 = vperm.xlu0 %2916, %v3311_v38   ;;  %2904 = vset.pattern.permute.xlu1 %v3098_v32 }
  0x73   : > { %723 = vperm.xlu1 %2904, %v3253_v14   ;;  %2911 = vset.pattern.permute.xlu2 %v3102_v39  ;;  %v1322_v8 = vadd.f32 %v1321_v2, %v1320_v61  ;;  %v3122_v2 = vmov 23  }
  0x74   : > { %821 = vperm.xlu2 %2911, %v3249_v7  }
  0x75   : > { %v1323_v13 = vrot.slane %v1322_v8, 1 }
  0x77   : > { %v1324_v21 = vadd.f32 %v1323_v13, %v1322_v8  ;;  %v3123_v8 = vmov 25  }
  0x79   : > { %v3334_v43 = vpop.permute.xlu2 %651  ;;  %v3395_v30 = vmul.f32 %v1324_v21, %v3265_v19 }
  0x7a   : > { %2917 = vset.pattern.permute.xlu0 %v3102_v39  ;;  %6280 = vst [vmem:[#allocation10_spill] sm:$0xff] %v3334_v43 }
  0x7b   : > { %829 = vperm.xlu0 %2917, %v3269_v22   ;;  %731 = vperm.xlu1 %2904, %v3278_v27   ;;  %6289 = vst [vmem:[#allocation19_spill] sm:$0xff] %v3395_v30  ;;  %v1327_v21 = vmul.f32 %v3395_v30, %v3272_v23 }
  0x7c   : > { %833 = vperm.xlu2 %2911, %v3278_v27  }
  0x81   : > { %v3342_v46 = vpop.permute.xlu2 %655 }
  0x82   : > { %6281 = vst [vmem:[#allocation11_spill] sm:$0xff] %v3342_v46 }
  0x83   : > { %1012 = vperm.xlu0 %2917, %v3311_v38   ;;  %2907 = vset.pattern.permute.xlu1 %v3099_v35 }
  0x84   : > { %761 = vperm.xlu1 %2907, %v3269_v22   ;;  %2914 = vset.pattern.permute.xlu2 %v3101_v37 }
  0x85   : > { %859 = vperm.xlu2 %2914, %v3253_v14  }
  0x89   : > { %v3352_v53 = vpop.permute.xlu2 %659 }
  0x8b   : > { %2926 = vset.pattern.permute.xlu0 %v3103_v40  ;;  %v3115_v40 = vmov 22  }
  0x8c   : > { %1062 = vperm.xlu0 %2926, %v3311_v38   ;;  %2908 = vset.pattern.permute.xlu1 %v3100_v36 }
  0x8d   : > { %787 = vperm.xlu1 %2908, %v3249_v7   ;;  %2918 = vset.pattern.permute.xlu2 %v3095_v1  ;;  %v2211_v1 = vrot.slane %v2210_v60, 1 }
  0x8e   : > { %972 = vperm.xlu2 %2918, %v3311_v38  }
  0x8f   : > { %v2212_v6 = vadd.f32 %v2211_v1, %v2210_v60 }
  0x91   : > { %v3361_v57 = vpop.permute.xlu1 %685  ;;  %v3369_v63 = vpop.permute.xlu2 %663  ;;  %v3381_v12 = vmul.f32 %v2212_v6, %v3265_v19 }
  0x92   : > { %6282 = vst [vmem:[#allocation12_spill] sm:$0xff] %v3361_v57 }
  0x93   : > { %6283 = vst [vmem:[#allocation13_spill] sm:$0xff] %v3369_v63  ;;  %v2214_v20 = vmul.f32 %v3381_v12, %v3263_v18 }
  0x94   : > { %2931 = vset.pattern.permute.xlu0 %v3104_v41  ;;  %6286 = vst [vmem:[#allocation16_spill] sm:$0xff] %v3381_v12 }
  0x95   : > { %1112 = vperm.xlu0 %2931, %v3311_v38   ;;  %799 = vperm.xlu1 %2908, %v3278_v27   ;;  %v2218_v29 = vsel %vm579_vm0, %v2214_v20, 0.0  ;;  %v3124_v20 = vmov 28  }
  0x96   : > { %2920 = vset.pattern.permute.xlu2 %v3099_v35 }
  0x97   : > { %992 = vperm.xlu2 %2920, %v3311_v38  }
  0x9a   : > { %v3378_v11 = vpop.permute.xlu2 %689 }
  0x9b   : > { %6285 = vst [vmem:[#allocation15_spill] sm:$0xff] %v3378_v11 }
  0x9d   : > { %2936 = vset.pattern.permute.xlu0 %v3105_v42  ;;  %2912 = vset.pattern.permute.xlu1 %v3102_v39 }
  0x9e   : > { %1162 = vperm.xlu0 %2936, %v3311_v38   ;;  %825 = vperm.xlu1 %2912, %v3253_v14  }
  0x9f   : > { %2922 = vset.pattern.permute.xlu2 %v3101_v37 }
  0xa0   : > { %1022 = vperm.xlu2 %2922, %v3311_v38  }
  0xa3   : > { %v3399_v33 = vpop.permute.xlu2 %719 }
  0xa4   : > { %6290 = vst [vmem:[#allocation20_spill] sm:$0xff] %v3399_v33 }
  0xa5   : > { %v601_v10 = vpop.xlane.xlu0 %600 }
  0xa6   : > { %2941 = vset.pattern.permute.xlu0 %v3106_v44  ;;  %2913 = vset.pattern.permute.xlu1 %v3101_v37  ;;  %v3114_v37 = vmov 10   ;;  %v3116_v44 = vmov 13  }
  0xa7   : > { %1212 = vperm.xlu0 %2941, %v3311_v38   ;;  %855 = vperm.xlu1 %2913, %v3249_v7  }
  0xa8   : > { %2924 = vset.pattern.permute.xlu2 %v3107_v48 }
  0xa9   : > { %1042 = vperm.xlu2 %2924, %v3311_v38  }
  0xab   : > { %v3408_v41 = vpop.permute.xlu2 %727 }
  0xaf   : > { %863 = vperm.xlu1 %2913, %v3269_v22   ;;  %2944 = vset.pattern.permute.xlu0 %v6021_v24 }
  0xb1   : > { %2927 = vset.pattern.permute.xlu2 %v3108_v54  ;;  %v612_v54 = vmul.f32 %v3364_v59, %v3421_v50 }
  0xb2   : > { %1072 = vperm.xlu2 %2927, %v3311_v38  }
  0xb3   : > { %v616_v56 = vadd.f32 %v612_v54, %v601_v10  ;;  %v2216_v54 = vmul.f32 %v3381_v12, %v3283_v28 }
  0xb4   : > { %v3415_v47 = vpop.permute.xlu2 %757 }
  0xb5   : > { %6292 = vst [vmem:[#allocation22_spill] sm:$0xff] %v3415_v47 }
  0xb7   : > { %2919 = vset.pattern.permute.xlu1 %v3098_v32  ;;  %v604_v32 = vpop.xlane.xlu0 %603 }
  0xb8   : > { %982 = vperm.xlu1 %2919, %v3311_v38   ;;  %v3401_v35 = vadd.f32 %v613_v31, %v604_v32  ;;  %v1333_v31 = vsel %vm579_vm0, %v1327_v21, 0.0 }
  0xba   : > { %2929 = vset.pattern.permute.xlu2 %v3109_v0  ;;  %v3121_v0 = vmov 20  }
  0xbb   : > { %1092 = vperm.xlu2 %2929, %v3311_v38  }
  0xbc   : > { %v607_v3 = vpop.xlane.xlu1 %606  ;;  %v3429_v55 = vpop.permute.xlu2 %765 }
  0xbd   : > { %v3372_v4 = vadd.f32 %v614_v62, %v607_v3  ;;  %6295 = vst [vmem:[#allocation25_spill] sm:$0xff] %v3429_v55 }
  0xbf   : > { %6284 = vst [vmem:[#allocation14_spill] sm:$0xff] %v3372_v4 }
  0xc0   : > { %2921 = vset.pattern.permute.xlu1 %v3100_v36  ;;  %v1328_v36 = vmul.f32 %v3395_v30, %v3283_v28  ;;  %v3411_v42 = vpop.permute.xlu0 %697 }
  0xc1   : > { %1002 = vperm.xlu1 %2921, %v3311_v38   ;;  %6291 = vst [vmem:[#allocation21_spill] sm:$0xff] %v3411_v42 }
  0xc2   : > { %v1336_v39 = vsel %vm579_vm0, %v1328_v36, 0.0 }
  0xc3   : > { %2932 = vset.pattern.permute.xlu2 %v3110_v15 }
  0xc4   : > { %v610_v16 = vpop.xlane.xlu1 %609  ;;  %1122 = vperm.xlu2 %2932, %v3311_v38  }
  0xc5   : > { %v3384_v17 = vadd.f32 %v615_v9, %v610_v16  ;;  %v3435_v61 = vpop.permute.xlu2 %795  ;;  %v1326_v9 = vmul.f32 %v3395_v30, %v3263_v18 }
  0xc7   : > { %6287 = vst [vmem:[#allocation17_spill] sm:$0xff] %v3384_v17  ;;  %v1330_v15 = vsel %vm579_vm0, %v1326_v9, 0.0 }
  0xc9   : > { %2923 = vset.pattern.permute.xlu1 %v3112_v25  ;;  %v3417_v48 = vpop.permute.xlu0 %753  ;;  %v2812_v25 = vld [vmem:[%s6278_s5 + $0x10] sm:$0xff] }
  0xca   : > { %1032 = vperm.xlu1 %2923, %v3311_v38   ;;  %6293 = vst [vmem:[#allocation23_spill] sm:$0xff] %v3417_v48  ;;  %v1762_v32 = vsel %vm579_vm0, %v2812_v25, 0.0  ;;  %v2816_v25 = vld [vmem:[%s6010_s3 + $0x30] sm:$0xff] }
  0xcb   : > { %v1763_v36 = vrot.slane %v1762_v32, 4 }
  0xcc   : > { %2934 = vset.pattern.permute.xlu2 %v3113_v34 }
  0xcd   : > { %1142 = vperm.xlu2 %2934, %v3311_v38  }
  0xce   : > { %v3442_v59 = vpop.permute.xlu2 %821 }
  0xcf   : > { %6299 = vst [vmem:[#allocation29_spill] sm:$0xff] %v3442_v59 }
  0xd1   : > { %2219 = vadd.xlane.f32.xlu0 %v2218_v29 }
  0xd2   : > { %2925 = vset.pattern.permute.xlu1 %v3114_v37  ;;  %v3431_v60 = vpop.permute.xlu0 %791  ;;  %v2215_v37 = vmul.f32 %v3381_v12, %v3272_v23 }
  0xd3   : > { %1052 = vperm.xlu1 %2925, %v3311_v38   ;;  %6296 = vst [vmem:[#allocation26_spill] sm:$0xff] %v3431_v60 }
  0xd5   : > { %2937 = vset.pattern.permute.xlu2 %v3115_v40  ;;  %v1764_v40 = vadd.f32 %v1763_v36, %v1762_v32  ;;  %v2818_v32 = vld [vmem:[%s6011_s4 + $0x30] sm:$0xff]  ;;  %v2199_v36 = vstv %s3494_s13 }
  0xd6   : > { %1172 = vperm.xlu2 %2937, %v3311_v38   ;;  %v3449_v5 = vpop.permute.xlu2 %833 }
  0xd7   : > { %6302 = vst [vmem:[#allocation32_spill] sm:$0xff] %v3449_v5 }
  0xd9   : > { %1337 = vadd.xlane.f32.xlu0 %v1336_v39 }
  0xdb   : > { %2928 = vset.pattern.permute.xlu1 %v3116_v44  ;;  %v2221_v44 = vsel %vm579_vm0, %v2215_v37, 0.0 }
  0xdc   : > { %1082 = vperm.xlu1 %2928, %v3311_v38   ;;  %v3424_v52 = vpop.permute.xlu1 %693 }
  0xde   : > { %2939 = vset.pattern.permute.xlu2 %v3117_v45 }
  0xdf   : > { %1192 = vperm.xlu2 %2939, %v3311_v38   ;;  %v3458_v13 = vpop.permute.xlu2 %859 }
  0xe0   : > { %6303 = vst [vmem:[#allocation33_spill] sm:$0xff] %v3458_v13 }
  0xe4   : > { %2930 = vset.pattern.permute.xlu1 %v3118_v49  ;;  %v1765_v49 = vrot.slane %v1764_v40, 2 }
  0xe5   : > { %1102 = vperm.xlu1 %2930, %v3311_v38   ;;  %v3437_v62 = vpop.permute.xlu1 %723 }
  0xe6   : > { %6297 = vst [vmem:[#allocation27_spill] sm:$0xff] %v3437_v62 }
  0xe7   : > { %2942 = vset.pattern.permute.xlu2 %v3119_v51 }
  0xe8   : > { %1222 = vperm.xlu2 %2942, %v3311_v38   ;;  %v3473_v34 = vpop.permute.xlu2 %972 }
  0xe9   : > { %6306 = vst [vmem:[#allocation36_spill] sm:$0xff] %v3473_v34  ;;  %v2808_v34 = vld [vmem:[%s6010_s3 + $0x20] sm:$0xff] }
  0xed   : > { %632 = vperm.xlu0 %2944, %v3269_v22   ;;  %2933 = vset.pattern.permute.xlu1 %v3120_v58  ;;  %v3440_v22 = vpop.permute.xlu0 %867  ;;  %v3444_v1 = vpop.permute.xlu1 %731  ;;  %v1766_v58 = vadd.f32 %v1765_v49, %v1764_v40  ;;  %v2817_v40 = vld [vmem:[%s6010_s3 + $0x38] sm:$0xff]  ;;  %v566_v49 = vld [vmem:[%s6010_s3] sm:$0xff] }
  0xee   : > { %1132 = vperm.xlu1 %2933, %v3311_v38   ;;  %6298 = vst [vmem:[#allocation28_spill] sm:$0xff] %v3440_v22 }
  0xef   : > { %6300 = vst [vmem:[#allocation30_spill] sm:$0xff] %v3444_v1 }
  0xf0   : > { %2946 = vset.pattern.permute.xlu2 %v6021_v24 }
  0xf1   : > { %v3483_v51 = vpop.permute.xlu2 %992 }
  0xf2   : > { %6309 = vst [vmem:[#allocation39_spill] sm:$0xff] %v3483_v51  ;;  %v1311_v51 = vstv %s3504_s18 }
  0xf5   : > { %918 = vperm.xlu0 %2944, %v616_v56   ;;  %v3447_v3 = vpop.permute.xlu0 %962 }
  0xf6   : > { %2935 = vset.pattern.permute.xlu1 %v3121_v0  ;;  %6301 = vst [vmem:[#allocation31_spill] sm:$0xff] %v3447_v3  ;;  %v3451_v6 = vpop.permute.xlu1 %761  ;;  %v2224_v0 = vsel %vm579_vm0, %v2216_v54, 0.0  ;;  %v567_v54 = vld [vmem:[%s6010_s3 + $0x8] sm:$0xff] }
  0xf7   : > { %1152 = vperm.xlu1 %2935, %v3311_v38   ;;  %v2809_v3 = vld [vmem:[%s6010_s3 + $0x28] sm:$0xff] }
  0xfa   : > { %v3498_v9 = vpop.permute.xlu2 %1022 }
  0xfb   : > { %6312 = vst [vmem:[#allocation42_spill] sm:$0xff] %v3498_v9 }
  0xfd   : > { %v3456_v10 = vpop.permute.xlu0 %829 }
  0xff   : > { %2938 = vset.pattern.permute.xlu1 %v3122_v2  ;;  %v3461_v16 = vpop.permute.xlu1 %787 }
 0x100   : > { %1182 = vperm.xlu1 %2938, %v3311_v38   ;;  %6304 = vst [vmem:[#allocation34_spill] sm:$0xff] %v3461_v16 }
 0x105   : > { %v3469_v29 = vpop.permute.xlu0 %1012 }
 0x106   : > { %6305 = vst [vmem:[#allocation35_spill] sm:$0xff] %v3469_v29 }
 0x107   : > { %v3478_v39 = vpop.permute.xlu1 %799 }
 0x108   : > { %2940 = vset.pattern.permute.xlu1 %v3123_v8  ;;  %6307 = vst [vmem:[#allocation37_spill] sm:$0xff] %v3478_v39  ;;  %v1767_v8 = vrot.slane %v1766_v58, 1 }
 0x109   : > { %1202 = vperm.xlu1 %2940, %v3311_v38  }
 0x10d   : > { %v3481_v45 = vpop.permute.xlu0 %1062 }
 0x10e   : > { %6308 = vst [vmem:[#allocation38_spill] sm:$0xff] %v3481_v45  ;;  %v1308_v45 = vstv %s3502_s17 }
 0x110   : > { %v3487_v56 = vpop.permute.xlu1 %825 }
 0x111   : > { %2943 = vset.pattern.permute.xlu1 %v3124_v20  ;;  %1331 = vadd.xlane.f32.xlu2 %v1330_v15  ;;  %6310 = vst [vmem:[#allocation40_spill] sm:$0xff] %v3487_v56  ;;  %v1768_v15 = vadd.f32 %v1767_v8, %v1766_v58  ;;  %v568_v8 = vld [vmem:[%s6011_s4] sm:$0xff] }
 0x112   : > { %1232 = vperm.xlu1 %2943, %v3311_v38  }
 0x113   : > { %v3513_v21 = vmul.f32 %v1768_v15, %v3265_v19  ;;  %v2819_v19 = vld [vmem:[%s6011_s4 + $0x38] sm:$0xff]  ;;  %v569_v15 = vld [vmem:[%s6011_s4 + $0x8] sm:$0xff] }
 0x114   : > { %v2201_v29 = vmul.f32 %v2819_v19, %v2199_v36  ;;  %v1755_v19 = vstv %s3510_s23  ;;  %s3756_s23 = scalar_lea.vmem %s6014_s7, %s3243_s20  ;;  %s3875_s20 = sld [smem:[#allocation6 + $0x3]] }
 0x115   : > { %v3490_v2 = vpop.permute.xlu0 %1112  ;;  %6314 = vst [vmem:[#allocation44_spill] sm:$0xff] %v3513_v21  ;;  %v1770_v58 = vmul.f32 %v3513_v21, %v3263_v18  ;;  %v2801_v18 = vld [vmem:[%s6010_s3 + $0x18] sm:$0xff] }
 0x116   : > { %6311 = vst [vmem:[#allocation41_spill] sm:$0xff] %v3490_v2  ;;  %v2800_v2 = vld [vmem:[%s6010_s3 + $0x10] sm:$0xff] }
 0x117   : > { %v1774_v30 = vsel %vm579_vm0, %v1770_v58, 0.0 }
 0x119   : > { %1334 = vadd.xlane.f32.xlu2 %v1333_v31  ;;  %v3506_v20 = vpop.permute.xlu1 %855  ;;  %v2196_v31 = vstv %s3492_s30 }
 0x11a   : > { %2945 = vset.pattern.permute.xlu1 %v6021_v24  ;;  %6313 = vst [vmem:[#allocation43_spill] sm:$0xff] %v3506_v20  ;;  %v573_v24 = vstv %s3500_s16  ;;  %v2198_v9 = vmul.f32 %v2817_v40, %v2196_v31  ;;  %v1752_v40 = vstv %s3508_s19 }
 0x11b   : > { %v574_v39 = vmul.f32 %v573_v24, %v568_v8  ;;  %v575_v26 = vmul.f32 %v573_v24, %v569_v15  ;;  %v1310_v8 = vmul.f32 %v2801_v18, %v1308_v45  ;;  %v1753_v20 = vmul.f32 %v2808_v34, %v1752_v40 }
 0x11c   : > { %v1754_v12 = vmul.f32 %v2809_v3, %v1752_v40  ;;  %v3582_v13 = vadd.f32 %v2201_v29, %v2198_v9 }
 0x11d   : > { %v3523_v37 = vpop.permute.xlu0 %1162 }
 0x11e   : > { %6315 = vst [vmem:[#allocation45_spill] sm:$0xff] %v3523_v37  ;;  %v3547_v37 = vpop.permute.xlu2 %1042  ;;  %v3606_v29 = vperm.slane %v3582_v13, 2  ;;  %v3643_v9 = vperm.slane %v3582_v13, 1 }
 0x11f   : > { %6316 = vst [vmem:[#allocation46_spill] sm:$0xff] %v3547_v37  ;;  %v2803_v37 = vld [vmem:[%s6011_s4 + $0x18] sm:$0xff] }
 0x120   : > { %v1313_v48 = vmul.f32 %v2803_v37, %v1311_v51  ;;  %6319 = vst [vmem:[#allocation49_spill] sm:$0xff] %v3582_v13 }
 0x121   : > { %2222 = vadd.xlane.f32.xlu2 %v2221_v44  ;;  %v2197_v44 = vmul.f32 %v2816_v25, %v2196_v31  ;;  %v570_v25 = vstv %s3496_s15  ;;  %v2810_v31 = vld [vmem:[%s6011_s4 + $0x20] sm:$0xff]  ;;  %v3577_v42 = vpop.permute.xlu1 %863  ;;  %6323 = vst [vmem:[#allocation53_spill] sm:$0xff] %v3606_v29 }
 0x122   : > { %v571_v22 = vmul.f32 %v570_v25, %v566_v49  ;;  %6317 = vst [vmem:[#allocation47_spill] sm:$0xff] %v3577_v42  ;;  %v572_v5 = vmul.f32 %v570_v25, %v567_v54  ;;  %v1309_v49 = vmul.f32 %v2800_v2, %v1308_v45  ;;  %v1756_v56 = vmul.f32 %v2810_v31, %v1755_v19 }
 0x123   : > { %v3597_v3 = vadd.f32 %v1313_v48, %v1310_v8  ;;  %6335 = vst [vmem:[#allocation65_spill] sm:$0xff] %v3643_v9 }
 0x124   : > { %v3584_v62 = vadd.f32 %v574_v39, %v571_v22  ;;  %v3590_v54 = vadd.f32 %v575_v26, %v572_v5  ;;  %v3599_v34 = vadd.f32 %v1756_v56, %v1753_v20 }
 0x125   : > { %v3586_v59 = vpop.permute.xlu0 %1212  ;;  %v3635_v56 = vperm.slane %v3597_v3, 1  ;;  %v3649_v37 = vperm.slane %v3597_v3, 2  ;;  %v3723_v11 = vperm.slane %v3597_v3, 3  ;;  %v3825_v38 = vperm.slane %v3597_v3, 5 }
 0x126   : > { %6320 = vst [vmem:[#allocation50_spill] sm:$0xff] %v3586_v59  ;;  %v3603_v22 = vpop.permute.xlu2 %1072  ;;  %v3612_v26 = vperm.slane %v3590_v54, 1  ;;  %v3623_v5 = vperm.slane %v3599_v34, 1  ;;  %v3646_v20 = vperm.slane %v3584_v62, 3  ;;  %v3652_v58 = vperm.slane %v3599_v34, 2 }
 0x127   : > { %6322 = vst [vmem:[#allocation52_spill] sm:$0xff] %v3603_v22  ;;  %v3702_v59 = vperm.slane %v3582_v13, 3  ;;  %v3734_v63 = vperm.slane %v3590_v54, 5  ;;  %v3739_v57 = vperm.slane %v3584_v62, 4  ;;  %v3819_v43 = vperm.slane %v3590_v54, 6 }
 0x128   : > { %6325 = vst [vmem:[#allocation55_spill] sm:$0xff] %v3612_v26  ;;  %v3663_v25 = vmul.f32 %v3612_v26, %v3352_v53  ;;  %v3672_v31 = vmul.f32 %v3623_v5, %v3352_v53  ;;  %v3706_v22 = vmul.f32 %v3646_v20, %v3408_v41  ;;  %v3897_v17 = vmul.f32 %v3825_v38, %v3435_v61 }
 0x129   : > { %2225 = vadd.xlane.f32.xlu2 %v2224_v0  ;;  %v2200_v0 = vmul.f32 %v2818_v32, %v2199_v36  ;;  %v2802_v32 = vld [vmem:[%s6011_s4 + $0x10] sm:$0xff]  ;;  %v2811_v36 = vld [vmem:[%s6011_s4 + $0x28] sm:$0xff]  ;;  %6328 = vst [vmem:[#allocation58_spill] sm:$0xff] %v3623_v5  ;;  %v3762_v5 = vperm.slane %v3597_v3, 4  ;;  %v3784_v26 = vmul.f32 %v3702_v59, %v3408_v41 }
 0x12a   : > { %v1312_v60 = vmul.f32 %v2802_v32, %v1311_v51  ;;  %v1757_v16 = vmul.f32 %v2811_v36, %v1755_v19  ;;  %v3632_v51 = vperm.slane %v3590_v54, 2  ;;  %6332 = vst [vmem:[#allocation62_spill] sm:$0xff] %v3635_v56  ;;  %v3640_v2 = vpop.permute.xlu1 %982  ;;  %v1772_v32 = vmul.f32 %v3513_v21, %v3283_v28 }
 0x12b   : > { %v3580_v1 = vadd.f32 %v2200_v0, %v2197_v44  ;;  %v1771_v44 = vmul.f32 %v3513_v21, %v3272_v23  ;;  %v3609_v23 = vperm.slane %v3584_v62, 1  ;;  %6334 = vst [vmem:[#allocation64_spill] sm:$0xff] %v3640_v2  ;;  %v3655_v0 = vperm.slane %v3590_v54, 3 }
 0x12c   : > { %v3592_v24 = vadd.f32 %v1312_v60, %v1309_v49  ;;  %v3615_v60 = vperm.slane %v3584_v62, 2  ;;  %6331 = vst [vmem:[#allocation61_spill] sm:$0xff] %v3632_v51  ;;  %v3683_v19 = vperm.slane %v3599_v34, 3  ;;  %v3690_v28 = vmul.f32 %v3635_v56, %v3352_v53 }
 0x12d   : > { %6318 = vst [vmem:[#allocation48_spill] sm:$0xff] %v3580_v1  ;;  %v3595_v45 = vperm.slane %v3580_v1, 2  ;;  %v1777_v48 = vsel %vm579_vm0, %v1771_v44, 0.0  ;;  %v3629_v39 = vperm.slane %v3580_v1, 1  ;;  %v3659_v15 = vmul.f32 %v3609_v23, %v3352_v53 }
 0x12e   : > { %6324 = vst [vmem:[#allocation54_spill] sm:$0xff] %v3609_v23  ;;  %v3710_v2 = vmul.f32 %v3643_v9, %v3352_v53  ;;  %v3713_v55 = vperm.slane %v3580_v1, 4  ;;  %v3717_v47 = vmul.f32 %v3655_v0, %v3408_v41  ;;  %v3720_v33 = vperm.slane %v3592_v24, 3  ;;  %v549_v9 = vld [vmem:[%s3756_s23] sm:$0xff] }
 0x12f   : > { %6321 = vst [vmem:[#allocation51_spill] sm:$0xff] %v3595_v45  ;;  %v3694_v8 = vmul.f32 %v3629_v39, %v3352_v53  ;;  %v3731_v21 = vperm.slane %v3584_v62, 5  ;;  %v3765_v56 = vperm.slane %v3599_v34, 4  ;;  %v3829_v4 = vmul.f32 %v3615_v60, %v3424_v52 }
 0x130   : > { %6326 = vst [vmem:[#allocation56_spill] sm:$0xff] %v3615_v60  ;;  %v3851_v60 = vmul.f32 %v3649_v37, %v3424_v52 }
 0x131   : > { %6330 = vst [vmem:[#allocation60_spill] sm:$0xff] %v3629_v39 }
 0x132   : > { %6336 = vst [vmem:[#allocation66_spill] sm:$0xff] %v3646_v20  ;;  %v1780_v20 = vsel %vm579_vm0, %v1772_v32, 0.0 }
 0x133   : > { %6337 = vst [vmem:[#allocation67_spill] sm:$0xff] %v3649_v37  ;;  %v3786_v23 = vpop.permute.xlu1 %1002 }
 0x134   : > { %6338 = vst [vmem:[#allocation68_spill] sm:$0xff] %v3652_v58 }
 0x135   : > { %6339 = vst [vmem:[#allocation69_spill] sm:$0xff] %v3655_v0  ;;  %v3736_v0 = vpop.permute.xlu2 %1092 }
 0x136   : > { %6341 = vst [vmem:[#allocation71_spill] sm:$0xff] %v3683_v19 }
 0x137   : > { %6345 = vst [vmem:[#allocation75_spill] sm:$0xff] %v3702_v59  ;;  %v3810_v59 = vperm.slane %v3599_v34, 5 }
 0x138   : > { %6346 = vst [vmem:[#allocation76_spill] sm:$0xff] %v3713_v55 }
 0x139   : > { %6347 = vst [vmem:[#allocation77_spill] sm:$0xff] %v3720_v33 }
 0x13a   : > { %6348 = vst [vmem:[#allocation78_spill] sm:$0xff] %v3723_v11 }
 0x13b   : > { %6350 = vst [vmem:[#allocation80_spill] sm:$0xff] %v3731_v21 }
 0x13c   : > { %1775 = vadd.xlane.f32.xlu1 %v1774_v30  ;;  %v3601_v30 = vadd.f32 %v1757_v16, %v1754_v12  ;;  %v3620_v12 = vperm.slane %v3592_v24, 1  ;;  %6351 = vst [vmem:[#allocation81_spill] sm:$0xff] %v3734_v63 }
 0x13d   : > { %6352 = vst [vmem:[#allocation82_spill] sm:$0xff] %v3736_v0  ;;  %v3759_v0 = vperm.slane %v3592_v24, 4 }
 0x13e   : > { %6327 = vst [vmem:[#allocation57_spill] sm:$0xff] %v3620_v12  ;;  %v3626_v16 = vperm.slane %v3601_v30, 1  ;;  %v3666_v18 = vperm.slane %v3601_v30, 2  ;;  %v3680_v40 = vmul.f32 %v3620_v12, %v3352_v53  ;;  %v3686_v49 = vperm.slane %v3601_v30, 3 }
 0x13f   : > { %6353 = vst [vmem:[#allocation83_spill] sm:$0xff] %v3739_v57  ;;  %v3776_v12 = vmul.f32 %v3723_v11, %v3408_v41  ;;  %v3796_v11 = vmul.f32 %v3731_v21, %v3435_v61  ;;  %v3813_v39 = vperm.slane %v3601_v30, 5  ;;  %v3816_v21 = vperm.slane %v3584_v62, 6 }
 0x140   : > { %6329 = vst [vmem:[#allocation59_spill] sm:$0xff] %v3626_v16  ;;  %v3676_v36 = vmul.f32 %v3626_v16, %v3352_v53  ;;  %v3728_v53 = vperm.slane %v3582_v13, 4  ;;  %v3742_v16 = vperm.slane %v3590_v54, 4  ;;  %v3750_v32 = vmul.f32 %v3686_v49, %v3408_v41 }
 0x141   : > { %622 = vperm.xlu2 %2946, %v3249_v7   ;;  %v3638_v7 = vperm.slane %v3592_v24, 2  ;;  %6340 = vst [vmem:[#allocation70_spill] sm:$0xff] %v3666_v18  ;;  %v3873_v37 = vmul.f32 %v3813_v39, %v3435_v61 }
 0x142   : > { %6342 = vst [vmem:[#allocation72_spill] sm:$0xff] %v3686_v49  ;;  %v3772_v49 = vmul.f32 %v3720_v33, %v3408_v41  ;;  %v3792_v33 = vperm.slane %v3582_v13, 5 }
 0x143   : > { %6333 = vst [vmem:[#allocation63_spill] sm:$0xff] %v3638_v7 }
 0x144   : > { %1778 = vadd.xlane.f32.xlu1 %v1777_v48  ;;  %v3696_v44 = vpop.xlane.xlu0 %2219  ;;  %v3699_v48 = vperm.slane %v3580_v1, 3  ;;  %6349 = vst [vmem:[#allocation79_spill] sm:$0xff] %v3728_v53  ;;  %v3905_v50 = vmul.f32 %v3792_v33, %v3435_v61 }
 0x145   : > { %6343 = vst [vmem:[#allocation73_spill] sm:$0xff] %v3696_v44  ;;  %v3833_v44 = vmul.f32 %v3632_v51, %v3424_v52  ;;  %v3855_v51 = vmul.f32 %v3595_v45, %v3424_v52  ;;  %v3887_v45 = vperm.slane %v3601_v30, 6 }
 0x146   : > { %6344 = vst [vmem:[#allocation74_spill] sm:$0xff] %v3699_v48  ;;  %v3780_v46 = vmul.f32 %v3699_v48, %v3408_v41  ;;  %v3800_v48 = vmul.f32 %v3734_v63, %v3435_v61  ;;  %v3822_v63 = vperm.slane %v3592_v24, 5 }
 0x147   : > { %6354 = vst [vmem:[#allocation84_spill] sm:$0xff] %v3742_v16 }
 0x148   : > { %6355 = vst [vmem:[#allocation85_spill] sm:$0xff] %v3759_v0 }
 0x149   : > { %627 = vperm.xlu2 %2946, %v3253_v14   ;;  %v3746_v14 = vmul.f32 %v3683_v19, %v3408_v41  ;;  %6356 = vst [vmem:[#allocation86_spill] sm:$0xff] %v3762_v5  ;;  %v3768_v19 = vperm.slane %v3601_v30, 4  ;;  %v3804_v41 = vperm.slane %v3580_v1, 6 }
 0x14a   : > { %6357 = vst [vmem:[#allocation87_spill] sm:$0xff] %v3765_v56 }
 0x14b   : > { %6358 = vst [vmem:[#allocation88_spill] sm:$0xff] %v3768_v19 }
 0x14c   : > { %1781 = vadd.xlane.f32.xlu1 %v1780_v20  ;;  %6359 = vst [vmem:[#allocation89_spill] sm:$0xff] %v3780_v46  ;;  %v3789_v20 = vperm.slane %v3580_v1, 5  ;;  %v3847_v46 = vmul.f32 %v3638_v7, %v3424_v52  ;;  %v3881_v7 = vperm.slane %v3590_v54, 7 }
 0x14d   : > { %6360 = vst [vmem:[#allocation90_spill] sm:$0xff] %v3784_v26  ;;  %v3843_v26 = vpop.xlane.xlu0 %1337 }
 0x14e   : > { %6361 = vst [vmem:[#allocation91_spill] sm:$0xff] %v3786_v23  ;;  %v3807_v23 = vperm.slane %v3582_v13, 6 }
 0x14f   : > { %6362 = vst [vmem:[#allocation92_spill] sm:$0xff] %v3789_v20 }
 0x150   : > { %6363 = vst [vmem:[#allocation93_spill] sm:$0xff] %v3792_v33  ;;  %v3932_v33 = vmul.f32 %v3759_v0, %v3451_v6  ;;  %v3952_v0 = vmul.f32 %v3728_v53, %v3451_v6 }
 0x151   : > { %6364 = vst [vmem:[#allocation94_spill] sm:$0xff] %v3804_v41  ;;  %v3841_v41 = vmul.f32 %v3666_v18, %v3424_v52  ;;  %890 = vperm.xlu2 %2946, %v549_v9   ;;  %v3862_v9 = vperm.slane %v3592_v24, 6  ;;  %v3869_v18 = vmul.f32 %v3810_v59, %v3435_v61 }
 0x152   : > { %6365 = vst [vmem:[#allocation95_spill] sm:$0xff] %v3807_v23  ;;  %v3837_v23 = vmul.f32 %v3652_v58, %v3424_v52  ;;  %v3859_v58 = vmul.f32 %v3606_v29, %v3424_v52  ;;  %v3878_v52 = vperm.slane %v3584_v62, 7  ;;  %v3884_v29 = vperm.slane %v3599_v34, 6 }
 0x153   : > { %6366 = vst [vmem:[#allocation96_spill] sm:$0xff] %v3810_v59  ;;  %v3889_v59 = vpop.permute.xlu2 %1122 }
 0x154   : > { %6367 = vst [vmem:[#allocation97_spill] sm:$0xff] %v3813_v39  ;;  %v3893_v39 = vmul.f32 %v3822_v63, %v3435_v61 }
 0x155   : > { %6368 = vst [vmem:[#allocation98_spill] sm:$0xff] %v3816_v21 }
 0x156   : > { %6369 = vst [vmem:[#allocation99_spill] sm:$0xff] %v3819_v43 }
 0x157   : > { %6370 = vst [vmem:[#allocation100_spill] sm:$0xff] %v3822_v63  ;;  %v3916_v63 = vperm.slane %v3592_v24, 7 }
 0x158   : > { %6371 = vst [vmem:[#allocation101_spill] sm:$0xff] %v3825_v38  ;;  %v3919_v38 = vperm.slane %v3597_v3, 7 }
 0x159   : > { %6372 = vst [vmem:[#allocation102_spill] sm:$0xff] %v3843_v26  ;;  %v3865_v26 = vperm.slane %v3597_v3, 6 }
 0x15a   : > { %6373 = vst [vmem:[#allocation103_spill] sm:$0xff] %v3859_v58  ;;  %v3901_v58 = vmul.f32 %v3789_v20, %v3435_v61  ;;  %v551_v20 = vld [vmem:[%s3756_s23 + $0x10] sm:$0xff]  ;;  %v3928_v61 = vmul.f32 %v3768_v19, %v3451_v6  ;;  %v3948_v19 = vmul.f32 %v3713_v55, %v3451_v6  ;;  %v3968_v55 = vmul.f32 %v3878_v52, %v3577_v42 }
 0x15b   : > { %6374 = vst [vmem:[#allocation104_spill] sm:$0xff] %v3862_v9  ;;  %900 = vperm.xlu2 %2946, %v551_v20   ;;  %v3990_v20 = vmul.f32 %v3916_v63, %v3577_v42  ;;  %v3994_v53 = vmul.f32 %v3919_v38, %v3577_v42 }
 0x15c   : > { %6375 = vst [vmem:[#allocation105_spill] sm:$0xff] %v3865_v26 }
 0x15d   : > { %6376 = vst [vmem:[#allocation106_spill] sm:$0xff] %v3873_v37  ;;  %v3909_v37 = vmul.f32 %v3739_v57, %v3451_v6  ;;  %v3938_v57 = vpop.permute.xlu1 %1032 }
 0x15e   : > { %6377 = vst [vmem:[#allocation107_spill] sm:$0xff] %v3878_v52 }
 0x15f   : > { %6378 = vst [vmem:[#allocation108_spill] sm:$0xff] %v3881_v7 }
 0x160   : > { %6379 = vst [vmem:[#allocation109_spill] sm:$0xff] %v3884_v29 }
 0x161   : > { %6380 = vst [vmem:[#allocation110_spill] sm:$0xff] %v3887_v45 }
 0x162   : > { %6381 = vst [vmem:[#allocation111_spill] sm:$0xff] %v3889_v59  ;;  %v3913_v59 = vmul.f32 %v3742_v16, %v3451_v6  ;;  %v3936_v16 = vmul.f32 %v3762_v5, %v3451_v6  ;;  %v3955_v5 = vperm.slane %v3584_v62, 0  ;;  %v3975_v62 = vperm.slane %v3592_v24, 0 }
 0x163   : > { %6382 = vst [vmem:[#allocation112_spill] sm:$0xff] %v3893_v39  ;;  %v3964_v39 = vperm.slane %v3601_v30, 0  ;;  %v3997_v24 = vstv %s3875_s20  ;;  %923 = vperm.xlu2 %2946, %v3401_v35  }
 0x164   : > { %6383 = vst [vmem:[#allocation113_spill] sm:$0xff] %v3897_v17  ;;  %v3961_v17 = vperm.slane %v3599_v34, 0 }
 0x165   : > { %6384 = vst [vmem:[#allocation114_spill] sm:$0xff] %v3901_v58  ;;  %v3924_v58 = vmul.f32 %v3765_v56, %v3451_v6  ;;  %v3944_v56 = vperm.slane %v3601_v30, 7  ;;  %v3972_v6 = vmul.f32 %v3881_v7, %v3577_v42  ;;  %v4000_v7 = vperm.slane %v3580_v1, 0  ;;  %637 = vperm.xlu1 %2945, %v3278_v27  }
 0x166   : > { %6385 = vst [vmem:[#allocation115_spill] sm:$0xff] %v3905_v50  ;;  %v3941_v50 = vperm.slane %v3599_v34, 7  ;;  %v1901_v1 = vmul.f32 %v3884_v29, %v3456_v10 }
 0x167   : > { %6386 = vst [vmem:[#allocation116_spill] sm:$0xff] %v3916_v63  ;;  %v3986_v30 = vmul.f32 %v3944_v56, %v3577_v42 }
 0x168   : > { %6387 = vst [vmem:[#allocation117_spill] sm:$0xff] %v3919_v38  ;;  %v3982_v34 = vmul.f32 %v3941_v50, %v3577_v42  ;;  %v843_v42 = vmul.f32 %v3819_v43, %v3456_v10 }
 0x169   : > { %6388 = vst [vmem:[#allocation118_spill] sm:$0xff] %v3938_v57  ;;  %v3958_v57 = vperm.slane %v3590_v54, 0  ;;  %v3978_v54 = vperm.slane %v3597_v3, 0  ;;  %v633_v3 = vpop.permute.xlu0 %632 }
 0x16a   : > { %6389 = vst [vmem:[#allocation119_spill] sm:$0xff] %v3941_v50  ;;  %v4003_v50 = vperm.slane %v3582_v13, 0  ;;  %v646_v52 = vmul.f32 %v3955_v5, %v633_v3  ;;  %v1802_v38 = vmul.f32 %v3964_v39, %v633_v3  ;;  %v1357_v13 = vmul.f32 %v3975_v62, %v633_v3 }
 0x16b   : > { %6390 = vst [vmem:[#allocation120_spill] sm:$0xff] %v3944_v56  ;;  %v842_v56 = vmul.f32 %v3816_v21, %v3456_v10  ;;  %v647_v63 = vmul.f32 %v3958_v57, %v633_v3  ;;  %v2245_v29 = vmul.f32 %v4000_v7, %v633_v3 }
 0x16c   : > { %6391 = vst [vmem:[#allocation121_spill] sm:$0xff] %v3948_v19  ;;  %v1358_v19 = vmul.f32 %v3978_v54, %v633_v3  ;;  %v1375_v21 = vadd.f32 %v3680_v40, %v1357_v13 }
 0x16d   : > { %6392 = vst [vmem:[#allocation122_spill] sm:$0xff] %v3952_v0  ;;  %v1801_v0 = vmul.f32 %v3961_v17, %v633_v3 }
 0x16e   : > { %6393 = vst [vmem:[#allocation123_spill] sm:$0xff] %v3955_v5  ;;  %v680_v5 = vadd.f32 %v3659_v15, %v646_v52  ;;  %v1376_v43 = vadd.f32 %v3690_v28, %v1358_v19  ;;  %v6406_v19 = vld [vmem:[#allocation24_spill] sm:$0xff]  ;;  %v6412_v52 = vld [vmem:[#allocation89_spill] sm:$0xff] }
 0x16f   : > { %6394 = vst [vmem:[#allocation124_spill] sm:$0xff] %v3958_v57  ;;  %v681_v57 = vadd.f32 %v3663_v25, %v647_v63  ;;  %v4031_v25 = vpop.permute.xlu1 %1052  ;;  %v2231_v27 = vmul.f32 %v3997_v24, %v6406_v19 }
 0x170   : > { %6395 = vst [vmem:[#allocation125_spill] sm:$0xff] %v3961_v17  ;;  %v1819_v17 = vadd.f32 %v3672_v31, %v1801_v0  ;;  %v1394_v13 = vadd.f32 %v3851_v60, %v1376_v43  ;;  %v2263_v0 = vadd.f32 %v3694_v8, %v2245_v29  ;;  %v1457_v43 = vmul.f32 %v3862_v9, %v3456_v10  ;;  %v6409_v8 = vld [vmem:[#allocation103_spill] sm:$0xff] }
 0x171   : > { %6396 = vst [vmem:[#allocation126_spill] sm:$0xff] %v3964_v39  ;;  %v1820_v39 = vadd.f32 %v3676_v36, %v1802_v38  ;;  %v1393_v38 = vadd.f32 %v3847_v46, %v1375_v21 }
 0x172   : > { %6397 = vst [vmem:[#allocation127_spill] sm:$0xff] %v3975_v62  ;;  %v2246_v62 = vmul.f32 %v4003_v50, %v633_v3  ;;  %v1837_v15 = vadd.f32 %v3837_v23, %v1819_v17  ;;  %v1412_v46 = vadd.f32 %v3776_v12, %v1394_v13  ;;  %v1458_v12 = vmul.f32 %v3865_v26, %v3456_v10  ;;  %v550_v3 = vld [vmem:[%s3756_s23 + $0x8] sm:$0xff] }
 0x173   : > { %6398 = vst [vmem:[#allocation128_spill] sm:$0xff] %v3978_v54  ;;  %v714_v54 = vadd.f32 %v3829_v4, %v680_v5  ;;  %v1838_v63 = vadd.f32 %v3841_v41, %v1820_v39  ;;  %v1902_v5 = vmul.f32 %v3887_v45, %v3456_v10  ;;  %v1411_v35 = vadd.f32 %v3772_v49, %v1393_v38 }
 0x174   : > { %6399 = vst [vmem:[#allocation129_spill] sm:$0xff] %v3994_v53  ;;  %v4017_v53 = vpop.permute.xlu2 %1142  ;;  %v2264_v31 = vadd.f32 %v3710_v2, %v2246_v62  ;;  %v1855_v17 = vadd.f32 %v3746_v14, %v1837_v15  ;;  %v1430_v39 = vadd.f32 %v3936_v16, %v1412_v46  ;;  %v2281_v2 = vadd.f32 %v3855_v51, %v2263_v0  ;;  %v6408_v16 = vld [vmem:[#allocation113_spill] sm:$0xff]  ;;  %v6413_v62 = vld [vmem:[#allocation90_spill] sm:$0xff] }
 0x175   : > { %6400 = vst [vmem:[#allocation130_spill] sm:$0xff] %v3997_v24  ;;  %v748_v4 = vadd.f32 %v3706_v22, %v714_v54  ;;  %v1856_v23 = vadd.f32 %v3750_v32, %v1838_v63  ;;  %v1429_v60 = vadd.f32 %v3932_v33, %v1411_v35  ;;  %v6407_v33 = vld [vmem:[#allocation112_spill] sm:$0xff]  ;;  %v6411_v32 = vld [vmem:[#allocation17_spill] sm:$0xff]  ;;  %895 = vperm.xlu1 %2945, %v550_v3  }
 0x176   : > { %6401 = vst [vmem:[#allocation131_spill] sm:$0xff] %v4000_v7  ;;  %v1448_v28 = vadd.f32 %v6408_v16, %v1430_v39  ;;  %933 = vperm.xlu2 %2946, %v6411_v32   ;;  %v6428_v35 = vld [vmem:[#allocation73_spill] sm:$0xff]  ;;  %v6446_v32 = vld [vmem:[#allocation60_spill] sm:$0xff] }
 0x177   : > { %6402 = vst [vmem:[#allocation132_spill] sm:$0xff] %v4003_v50  ;;  %v782_v21 = vadd.f32 %v3909_v37, %v748_v4  ;;  %v1874_v29 = vadd.f32 %v3928_v61, %v1856_v23  ;;  %v1447_v49 = vadd.f32 %v6407_v33, %v1429_v60  ;;  %v2299_v61 = vadd.f32 %v6412_v52, %v2281_v2  ;;  %v6423_v4 = vld [vmem:[#allocation122_spill] sm:$0xff]  ;;  %v6427_v23 = vld [vmem:[#allocation95_spill] sm:$0xff]  ;;  %v6429_v46 = vld [vmem:[#allocation49_spill] sm:$0xff] }
 0x178   : > { %6403 = vst [vmem:[#allocation133_spill] sm:$0xff] %v4017_v53  ;;  %v715_v53 = vadd.f32 %v3833_v44, %v681_v57  ;;  %v2282_v44 = vadd.f32 %v6409_v8, %v2264_v31  ;;  %v1466_v41 = vadd.f32 %v1458_v12, %v1448_v28  ;;  %v6422_v31 = vld [vmem:[#allocation121_spill] sm:$0xff]  ;;  %v6433_v12 = vld [vmem:[#allocation47_spill] sm:$0xff]  ;;  %v6439_v33 = vld [vmem:[#allocation14_spill] sm:$0xff] }
 0x179   : > { %6404 = vst [vmem:[#allocation134_spill] sm:$0xff] %v4031_v25  ;;  %v816_v36 = vadd.f32 %v3796_v11, %v782_v21  ;;  %v6431_v21 = vld [vmem:[#allocation114_spill] sm:$0xff] }
 0x17a   : > { %v749_v57 = vadd.f32 %v3717_v47, %v715_v53  ;;  %v1873_v47 = vadd.f32 %v3924_v58, %v1855_v17  ;;  %v6405_v58 = vld [vmem:[#allocation106_spill] sm:$0xff]  ;;  %v2300_v54 = vadd.f32 %v6413_v62, %v2282_v44 }
 0x17b   : > { %v1892_v40 = vadd.f32 %v6405_v58, %v1874_v29  ;;  %v850_v51 = vadd.f32 %v842_v56, %v816_v36  ;;  %v6420_v13 = vld [vmem:[#allocation129_spill] sm:$0xff]  ;;  %v552_v58 = vld [vmem:[%s3756_s23 + $0x18] sm:$0xff] }
 0x17c   : > { %v783_v22 = vadd.f32 %v3913_v59, %v749_v57  ;;  %v1891_v59 = vadd.f32 %v3869_v18, %v1873_v47  ;;  %v4067_v53 = vpop.permute.xlu2 %1172  ;;  %v1465_v18 = vadd.f32 %v1457_v43, %v1447_v49  ;;  %v4091_v0 = vadd.f32 %v6420_v13, %v1466_v41  ;;  %v6432_v47 = vld [vmem:[#allocation115_spill] sm:$0xff]  ;;  %v6447_v41 = vld [vmem:[#allocation65_spill] sm:$0xff] }
 0x17d   : > { %6410 = vst [vmem:[#allocation106_spill] sm:$0xff] %v4067_v53  ;;  %v4074_v15 = vadd.f32 %v3968_v55, %v850_v51  ;;  %v2317_v55 = vadd.f32 %v6422_v31, %v2299_v61  ;;  %v2318_v57 = vadd.f32 %v6423_v4, %v2300_v54  ;;  %v4104_v43 = vperm.slane %v6429_v46, 7  ;;  %905 = vperm.xlu1 %2945, %v552_v58   ;;  %v6442_v51 = vld [vmem:[#allocation9_spill] sm:$0xff]  ;;  %v6448_v61 = vld [vmem:[#allocation54_spill] sm:$0xff]  ;;  %v6449_v54 = vld [vmem:[#allocation55_spill] sm:$0xff] }
 0x17e   : > { %v817_v37 = vadd.f32 %v3800_v48, %v783_v22  ;;  %v1909_v14 = vadd.f32 %v1901_v1, %v1891_v59  ;;  %v1910_v48 = vadd.f32 %v1902_v5, %v1892_v40  ;;  %v4085_v1 = vpop.permute.xlu1 %1082  ;;  %v4088_v38 = vadd.f32 %v3990_v20, %v1465_v18  ;;  %6421 = vst [vmem:[#allocation90_spill] sm:$0xff] %v4091_v0  ;;  %v6450_v13 = vld [vmem:[#allocation11_spill] sm:$0xff]  ;;  %v6451_v4 = vld [vmem:[#allocation57_spill] sm:$0xff] }
 0x17f   : > { %6414 = vst [vmem:[#allocation24_spill] sm:$0xff] %v4074_v15  ;;  %v2346_v5 = vmul.f32 %v6427_v23, %v3456_v10  ;;  %v2235_v20 = vadd.f32 %v2231_v27, %v6428_v35  ;;  %v2335_v22 = vadd.f32 %v6431_v21, %v2317_v55  ;;  %v2336_v29 = vadd.f32 %v6432_v47, %v2318_v57  ;;  %v6457_v21 = vld [vmem:[#allocation12_spill] sm:$0xff]  ;;  %v6462_v58 = vld [vmem:[#allocation13_spill] sm:$0xff] }
 0x180   : > { %v851_v11 = vadd.f32 %v843_v42, %v817_v37  ;;  %v4080_v56 = vadd.f32 %v3982_v34, %v1909_v14  ;;  %v4083_v42 = vadd.f32 %v3986_v30, %v1910_v48  ;;  %6418 = vst [vmem:[#allocation17_spill] sm:$0xff] %v4085_v1  ;;  %v6426_v34 = vld [vmem:[#allocation94_spill] sm:$0xff]  ;;  %v2364_v36 = vmul.f32 %v4104_v43, %v6433_v12 }
 0x181   : > { %6419 = vst [vmem:[#allocation89_spill] sm:$0xff] %v4088_v38  ;;  %v2345_v30 = vmul.f32 %v6426_v34, %v3456_v10  ;;  %v2354_v39 = vadd.f32 %v2346_v5, %v2336_v29  ;;  %2385 = vperm.xlu2 %2946, %v2235_v20   ;;  %v4124_v49 = vstv %s2799_s26  ;;  %v6445_v48 = vld [vmem:[#allocation10_spill] sm:$0xff]  ;;  %v4153_v31 = vmul.f32 %v6448_v61, %v6450_v13  ;;  %v6455_v20 = vld [vmem:[#allocation59_spill] sm:$0xff]  ;;  %v6459_v29 = vld [vmem:[#allocation53_spill] sm:$0xff] }
 0x182   : > { %v4077_v63 = vadd.f32 %v3972_v6, %v851_v11  ;;  %6416 = vst [vmem:[#allocation113_spill] sm:$0xff] %v4080_v56  ;;  %v6424_v6 = vld [vmem:[#allocation48_spill] sm:$0xff]  ;;  %v1343_v28 = vmul.f32 %v4124_v49, %v6406_v19  ;;  %v4137_v18 = vmul.f32 %v6446_v32, %v6445_v48  ;;  %v4141_v52 = vmul.f32 %v6447_v41, %v6445_v48  ;;  %v6453_v5 = vld [vmem:[#allocation58_spill] sm:$0xff] }
 0x183   : > { %6417 = vst [vmem:[#allocation103_spill] sm:$0xff] %v4083_v42  ;;  %v4096_v17 = vperm.slane %v6424_v6, 7  ;;  %v2353_v60 = vadd.f32 %v2345_v30, %v2335_v22  ;;  %v4114_v37 = vadd.f32 %v2364_v36, %v2354_v39  ;;  %v4145_v62 = vmul.f32 %v6448_v61, %v6445_v48  ;;  %v6452_v6 = vld [vmem:[#allocation62_spill] sm:$0xff]  ;;  %v6458_v22 = vld [vmem:[#allocation51_spill] sm:$0xff]  ;;  %v6460_v39 = vld [vmem:[#allocation56_spill] sm:$0xff] }
 0x184   : > { %6415 = vst [vmem:[#allocation112_spill] sm:$0xff] %v4077_v63  ;;  %v4116_v59 = vpop.permute.xlu2 %1192  ;;  %v4149_v3 = vmul.f32 %v6449_v54, %v6445_v48  ;;  %v4157_v55 = vmul.f32 %v6449_v54, %v6450_v13  ;;  %v4161_v57 = vmul.f32 %v6451_v4, %v6445_v48  ;;  %v4165_v30 = vmul.f32 %v6452_v6, %v6445_v48  ;;  %v6502_v42 = vld [vmem:[#allocation71_spill] sm:$0xff]  ;;  %v6507_v63 = vld [vmem:[#allocation29_spill] sm:$0xff] }
 0x185   : > { %6425 = vst [vmem:[#allocation129_spill] sm:$0xff] %v4096_v17  ;;  %v2363_v2 = vmul.f32 %v4096_v17, %v6433_v12  ;;  %928 = vperm.xlu1 %2945, %v6439_v33   ;;  %v4169_v35 = vmul.f32 %v6453_v5, %v6450_v13  ;;  %v4173_v46 = vmul.f32 %v6455_v20, %v6450_v13 }
 0x186   : > { %6430 = vst [vmem:[#allocation121_spill] sm:$0xff] %v4104_v43  ;;  %v4119_v40 = vpop.permute.xlu1 %1102  ;;  %v4177_v47 = vmul.f32 %v6458_v22, %v6457_v21  ;;  %v4185_v12 = vmul.f32 %v6460_v39, %v6457_v21  ;;  %v4193_v33 = vmul.f32 %v6448_v61, %v6462_v58  ;;  %v4229_v1 = vmul.f32 %v6447_v41, %v6450_v13 }
 0x187   : > { %v4112_v10 = vadd.f32 %v2363_v2, %v2353_v60  ;;  %6435 = vst [vmem:[#allocation48_spill] sm:$0xff] %v4114_v37  ;;  %v4181_v60 = vmul.f32 %v6459_v29, %v6457_v21  ;;  %v6461_v2 = vld [vmem:[#allocation61_spill] sm:$0xff]  ;;  %v4237_v25 = vmul.f32 %v6452_v6, %v6450_v13  ;;  %v4252_v37 = vmul.f32 %v6455_v20, %v6462_v58 }
 0x188   : > { %6436 = vst [vmem:[#allocation73_spill] sm:$0xff] %v4116_v59  ;;  %v4189_v36 = vmul.f32 %v6461_v2, %v6457_v21  ;;  %v6467_v59 = vld [vmem:[#allocation68_spill] sm:$0xff]  ;;  %v4357_v15 = vmul.f32 %v6426_v34, %v6507_v63 }
 0x189   : > { %6434 = vst [vmem:[#allocation122_spill] sm:$0xff] %v4112_v10  ;;  %v4209_v53 = vmul.f32 %v6467_v59, %v6457_v21  ;;  %v4256_v10 = vmul.f32 %v6446_v32, %v6462_v58 }
 0x18a   : > { %6437 = vst [vmem:[#allocation49_spill] sm:$0xff] %v4119_v40  ;;  %v4225_v40 = vmul.f32 %v6446_v32, %v6450_v13  ;;  %v6484_v32 = vld [vmem:[#allocation20_spill] sm:$0xff] }
 0x18b   : > { %6440 = vst [vmem:[#allocation115_spill] sm:$0xff] %v4124_v49  ;;  %v6475_v49 = vld [vmem:[#allocation44_spill] sm:$0xff] }
 0x18c   : > { %v4121_v27 = vpop.permute.xlu2 %1222  ;;  %6454 = vst [vmem:[#allocation10_spill] sm:$0xff] %v4169_v35 }
 0x18d   : > { %6438 = vst [vmem:[#allocation114_spill] sm:$0xff] %v4121_v27  ;;  %954 = vperm.xlu1 %2945, %v6442_v51   ;;  %v6466_v51 = vld [vmem:[#allocation67_spill] sm:$0xff] }
 0x18e   : > { %v4126_v16 = vpop.permute.xlu1 %1132  ;;  %6456 = vst [vmem:[#allocation60_spill] sm:$0xff] %v4173_v46  ;;  %v4205_v27 = vmul.f32 %v6466_v51, %v6457_v21 }
 0x18f   : > { %6441 = vst [vmem:[#allocation47_spill] sm:$0xff] %v4126_v16  ;;  %v4221_v16 = vmul.f32 %v6455_v20, %v6445_v48  ;;  %v4274_v20 = vmul.f32 %v6452_v6, %v6462_v58 }
 0x190   : > { %6463 = vst [vmem:[#allocation65_spill] sm:$0xff] %v4193_v33  ;;  %v4248_v33 = vmul.f32 %v6453_v5, %v6462_v58 }
 0x191   : > { %6469 = vst [vmem:[#allocation55_spill] sm:$0xff] %v4225_v40 }
 0x192   : > { %6470 = vst [vmem:[#allocation11_spill] sm:$0xff] %v4229_v1 }
 0x193   : > { %6472 = vst [vmem:[#allocation62_spill] sm:$0xff] %v4237_v25 }
 0x194   : > { %v1332_v8 = vpop.xlane.xlu2 %1331  ;;  %6476 = vst [vmem:[#allocation12_spill] sm:$0xff] %v4248_v33  ;;  %v6486_v33 = vld [vmem:[#allocation75_spill] sm:$0xff] }
 0x195   : > { %v1347_v44 = vadd.f32 %v1343_v28, %v1332_v8  ;;  %v4197_v28 = vmul.f32 %v6449_v54, %v6462_v58  ;;  %v6465_v8 = vld [vmem:[#allocation63_spill] sm:$0xff]  ;;  %v4217_v54 = vmul.f32 %v6453_v5, %v6445_v48  ;;  %v4242_v48 = vld [vmem:[%s3259_s28 + $0x18] sm:$0xff]  ;;  %6477 = vst [vmem:[#allocation13_spill] sm:$0xff] %v4252_v37  ;;  %v4270_v5 = vmul.f32 %v6451_v4, %v6462_v58  ;;  %s4337_s28 = sld [smem:[#allocation6 + $0x2]] }
 0x196   : > { %v4131_v11 = vpop.permute.xlu1 %1152  ;;  %6474 = vst [vmem:[#allocation59_spill] sm:$0xff] %v4242_v48 }
 0x197   : > { %1497 = vperm.xlu0 %2944, %v1347_v44   ;;  %6443 = vst [vmem:[#allocation14_spill] sm:$0xff] %v4131_v11  ;;  %v4201_v44 = vmul.f32 %v6465_v8, %v6457_v21  ;;  %v6468_v11 = vld [vmem:[#allocation70_spill] sm:$0xff] }
 0x198   : > { %6464 = vst [vmem:[#allocation54_spill] sm:$0xff] %v4197_v28  ;;  %v4213_v61 = vmul.f32 %v6468_v11, %v6457_v21  ;;  %v4233_v21 = vmul.f32 %v6451_v4, %v6450_v13  ;;  %v1773_v28 = vmul.f32 %v4242_v48, %v6475_v49  ;;  %v4266_v49 = vmul.f32 %v6447_v41, %v6462_v58  ;;  %v6489_v58 = vld [vmem:[#allocation77_spill] sm:$0xff] }
 0x199   : > { %6478 = vst [vmem:[#allocation44_spill] sm:$0xff] %v4256_v10  ;;  %v6485_v10 = vld [vmem:[#allocation74_spill] sm:$0xff] }
 0x19a   : > { %6471 = vst [vmem:[#allocation57_spill] sm:$0xff] %v4233_v21  ;;  %v4278_v37 = vmul.f32 %v6485_v10, %v6484_v32  ;;  %v1783_v38 = vsel %vm579_vm0, %v1773_v28, 0.0  ;;  %v6492_v21 = vld [vmem:[#allocation78_spill] sm:$0xff]  ;;  %v6496_v10 = vld [vmem:[#allocation83_spill] sm:$0xff]  ;;  %v6500_v28 = vld [vmem:[#allocation25_spill] sm:$0xff] }
 0x19b   : > { %6482 = vst [vmem:[#allocation136_spill] sm:$0xff] %v4270_v5  ;;  %v6488_v5 = vld [vmem:[#allocation69_spill] sm:$0xff]  ;;  %v4311_v1 = vmul.f32 %v6492_v21, %v6484_v32  ;;  %v4331_v21 = vmul.f32 %v6496_v10, %v6500_v28 }
 0x19c   : > { %v4133_v14 = vpop.xlane.xlu2 %1334  ;;  %6483 = vst [vmem:[#allocation137_spill] sm:$0xff] %v4274_v20  ;;  %v4294_v6 = vmul.f32 %v6488_v5, %v6484_v32  ;;  %v4298_v20 = vmul.f32 %v6489_v58, %v6484_v32 }
 0x19d   : > { %6444 = vst [vmem:[#allocation9_spill] sm:$0xff] %v4133_v14 }
 0x19e   : > { %v4239_v14 = vpop.permute.xlu1 %1182  ;;  %6501 = vst [vmem:[#allocation141_spill] sm:$0xff] %v4331_v21 }
 0x19f   : > { %6473 = vst [vmem:[#allocation58_spill] sm:$0xff] %v4239_v14  ;;  %v6480_v14 = vld [vmem:[#allocation15_spill] sm:$0xff] }
 0x1a0   : > { %v4262_v0 = vmul.f32 %v6460_v39, %v6480_v14  ;;  %6481 = vst [vmem:[#allocation15_spill] sm:$0xff] %v4266_v49  ;;  %v4282_v39 = vmul.f32 %v6486_v33, %v6484_v32  ;;  %v4286_v41 = vmul.f32 %v6461_v2, %v6480_v14  ;;  %v6487_v49 = vld [vmem:[#allocation66_spill] sm:$0xff]  ;;  %v4302_v25 = vmul.f32 %v6467_v59, %v6480_v14 }
 0x1a1   : > { %v4290_v4 = vmul.f32 %v6487_v49, %v6484_v32  ;;  %v4306_v2 = vmul.f32 %v6468_v11, %v6480_v14  ;;  %v4315_v33 = vmul.f32 %v6458_v22, %v6480_v14  ;;  %v4319_v58 = vmul.f32 %v6459_v29, %v6480_v14  ;;  %v6495_v59 = vld [vmem:[#allocation22_spill] sm:$0xff]  ;;  %v6498_v11 = vld [vmem:[#allocation84_spill] sm:$0xff] }
 0x1a2   : > { %6490 = vst [vmem:[#allocation20_spill] sm:$0xff] %v4302_v25  ;;  %v4327_v40 = vmul.f32 %v6498_v11, %v6495_v59  ;;  %v4335_v22 = vmul.f32 %v6502_v42, %v6484_v32  ;;  %v4341_v29 = vmul.f32 %v6498_v11, %v6500_v28  ;;  %v4349_v56 = vmul.f32 %v6465_v8, %v6480_v14  ;;  %v6510_v8 = vld [vmem:[#allocation88_spill] sm:$0xff] }
 0x1a3   : > { %6491 = vst [vmem:[#allocation138_spill] sm:$0xff] %v4306_v2  ;;  %v4353_v21 = vmul.f32 %v6466_v51, %v6480_v14  ;;  %v6512_v14 = vld [vmem:[#allocation98_spill] sm:$0xff] }
 0x1a4   : > { %v4258_v13 = vpop.xlane.xlu2 %2222  ;;  %6493 = vst [vmem:[#allocation139_spill] sm:$0xff] %v4315_v33  ;;  %v4373_v51 = vmul.f32 %v6512_v14, %v6507_v63 }
 0x1a5   : > { %6479 = vst [vmem:[#allocation135_spill] sm:$0xff] %v4258_v13  ;;  %v4323_v13 = vmul.f32 %v6496_v10, %v6495_v59 }
 0x1a6   : > { %6494 = vst [vmem:[#allocation140_spill] sm:$0xff] %v4319_v58  ;;  %v6504_v58 = vld [vmem:[#allocation72_spill] sm:$0xff] }
 0x1a7   : > { %6497 = vst [vmem:[#allocation83_spill] sm:$0xff] %v4323_v13  ;;  %v4345_v33 = vmul.f32 %v6504_v58, %v6484_v32  ;;  %v6508_v32 = vld [vmem:[#allocation87_spill] sm:$0xff]  ;;  %v6545_v13 = vld [vmem:[#allocation16_spill] sm:$0xff] }
 0x1a8   : > { %6499 = vst [vmem:[#allocation84_spill] sm:$0xff] %v4327_v40  ;;  %v4365_v28 = vmul.f32 %v6508_v32, %v6495_v59  ;;  %v6543_v32 = vld [vmem:[#allocation96_spill] sm:$0xff] }
 0x1a9   : > { %6503 = vst [vmem:[#allocation142_spill] sm:$0xff] %v4341_v29  ;;  %v4361_v29 = vmul.f32 %v6427_v23, %v6507_v63  ;;  %v4381_v23 = vmul.f32 %v3862_v9, %v6507_v63 }
 0x1aa   : > { %6505 = vst [vmem:[#allocation143_spill] sm:$0xff] %v4349_v56  ;;  %1784 = vadd.xlane.f32.xlu2 %v1783_v38  ;;  %v4369_v56 = vmul.f32 %v6510_v8, %v6495_v59  ;;  %v6514_v38 = vld [vmem:[#allocation99_spill] sm:$0xff]  ;;  %v6525_v8 = vld [vmem:[#allocation33_spill] sm:$0xff] }
 0x1ab   : > { %6506 = vst [vmem:[#allocation144_spill] sm:$0xff] %v4353_v21  ;;  %v4377_v34 = vmul.f32 %v6514_v38, %v6507_v63  ;;  %v4385_v21 = vmul.f32 %v3865_v26, %v6507_v63  ;;  %v6519_v59 = vld [vmem:[#allocation27_spill] sm:$0xff]  ;;  %v4405_v26 = vpop.permute.xlu1 %1202 }
 0x1ac   : > { %6509 = vst [vmem:[#allocation29_spill] sm:$0xff] %v4365_v28  ;;  %v4387_v28 = vpop.xlane.xlu2 %2225  ;;  %v4395_v2 = vmul.f32 %v6488_v5, %v6519_v59  ;;  %v4399_v25 = vmul.f32 %v6502_v42, %v6519_v59  ;;  %v4403_v9 = vmul.f32 %v6504_v58, %v6519_v59  ;;  %v6530_v5 = vld [vmem:[#allocation109_spill] sm:$0xff]  ;;  %v4421_v42 = vmul.f32 %v3887_v45, %v6507_v63  ;;  %v6533_v58 = vld [vmem:[#allocation34_spill] sm:$0xff]  ;;  %v6540_v45 = vld [vmem:[#allocation100_spill] sm:$0xff] }
 0x1ad   : > { %6511 = vst [vmem:[#allocation145_spill] sm:$0xff] %v4369_v56  ;;  %v4391_v56 = vmul.f32 %v6487_v49, %v6519_v59  ;;  %v6528_v49 = vld [vmem:[#allocation108_spill] sm:$0xff]  ;;  %v4417_v35 = vmul.f32 %v6530_v5, %v6507_v63  ;;  %v4453_v40 = vmul.f32 %v6543_v32, %v6533_v58 }
 0x1ae   : > { %6513 = vst [vmem:[#allocation146_spill] sm:$0xff] %v4373_v51  ;;  %v4413_v24 = vmul.f32 %v6528_v49, %v6525_v8  ;;  %v6534_v59 = vld [vmem:[#allocation92_spill] sm:$0xff]  ;;  %v6572_v51 = vld [vmem:[#allocation126_spill] sm:$0xff] }
 0x1af   : > { %6515 = vst [vmem:[#allocation147_spill] sm:$0xff] %v4377_v34 }
 0x1b0   : > { %6516 = vst [vmem:[#allocation148_spill] sm:$0xff] %v4381_v23 }
 0x1b1   : > { %6517 = vst [vmem:[#allocation149_spill] sm:$0xff] %v4385_v21  ;;  %v2217_v21 = vmul.f32 %v4242_v48, %v6545_v13  ;;  %v6553_v48 = vld [vmem:[#allocation116_spill] sm:$0xff] }
 0x1b2   : > { %6518 = vst [vmem:[#allocation150_spill] sm:$0xff] %v4387_v28  ;;  %v6526_v28 = vld [vmem:[#allocation107_spill] sm:$0xff] }
 0x1b3   : > { %6520 = vst [vmem:[#allocation151_spill] sm:$0xff] %v4391_v56  ;;  %v4409_v46 = vmul.f32 %v6526_v28, %v6525_v8 }
 0x1b4   : > { %6521 = vst [vmem:[#allocation152_spill] sm:$0xff] %v4395_v2  ;;  %v6546_v2 = vld [vmem:[#allocation43_spill] sm:$0xff] }
 0x1b5   : > { %6522 = vst [vmem:[#allocation153_spill] sm:$0xff] %v4399_v25  ;;  %v4459_v56 = vmul.f32 %v4096_v17, %v6546_v2  ;;  %v4474_v32 = vmul.f32 %v6526_v28, %v6546_v2  ;;  %v4478_v13 = vmul.f32 %v6528_v49, %v6546_v2  ;;  %v4482_v17 = vmul.f32 %v6553_v48, %v6546_v2  ;;  %v6558_v28 = vld [vmem:[#allocation117_spill] sm:$0xff] }
 0x1b6   : > { %6523 = vst [vmem:[#allocation154_spill] sm:$0xff] %v4403_v9  ;;  %v6535_v9 = vld [vmem:[#allocation93_spill] sm:$0xff] }
 0x1b7   : > { %6524 = vst [vmem:[#allocation155_spill] sm:$0xff] %v4405_v26  ;;  %v4425_v26 = vmul.f32 %v6534_v59, %v6533_v58  ;;  %v4429_v25 = vmul.f32 %v6535_v9, %v6533_v58  ;;  %v4445_v59 = vmul.f32 %v6540_v45, %v6533_v58 }
 0x1b8   : > { %6527 = vst [vmem:[#allocation156_spill] sm:$0xff] %v4409_v46  ;;  %v6536_v46 = vld [vmem:[#allocation80_spill] sm:$0xff] }
 0x1b9   : > { %6529 = vst [vmem:[#allocation157_spill] sm:$0xff] %v4413_v24  ;;  %v4433_v8 = vmul.f32 %v6536_v46, %v6533_v58  ;;  %v6537_v24 = vld [vmem:[#allocation81_spill] sm:$0xff] }
 0x1ba   : > { %6531 = vst [vmem:[#allocation158_spill] sm:$0xff] %v4417_v35  ;;  %v4437_v5 = vmul.f32 %v6537_v24, %v6533_v58  ;;  %v6538_v35 = vld [vmem:[#allocation40_spill] sm:$0xff] }
 0x1bb   : > { %6532 = vst [vmem:[#allocation159_spill] sm:$0xff] %v4421_v42  ;;  %v4441_v63 = vmul.f32 %v6512_v14, %v6538_v35  ;;  %v6541_v42 = vld [vmem:[#allocation101_spill] sm:$0xff]  ;;  %v4463_v14 = vmul.f32 %v4104_v43, %v6546_v2  ;;  %v4467_v45 = vmul.f32 %v6514_v38, %v6538_v35  ;;  %v6555_v43 = vld [vmem:[#allocation23_spill] sm:$0xff] }
 0x1bc   : > { %v4449_v9 = vmul.f32 %v6541_v42, %v6533_v58  ;;  %6544 = vst [vmem:[#allocation162_spill] sm:$0xff] %v4453_v40  ;;  %v4470_v42 = vstv %s4337_s28  ;;  %v6556_v40 = vld [vmem:[#allocation76_spill] sm:$0xff]  ;;  %v6557_v35 = vld [vmem:[#allocation79_spill] sm:$0xff]  ;;  %v4492_v58 = vmul.f32 %v6558_v28, %v6546_v2  ;;  %v771_v49 = vmul.f32 %v6498_v11, %v6555_v43  ;;  %v6564_v2 = vld [vmem:[#allocation18_spill] sm:$0xff] }
 0x1bd   : > { %6539 = vst [vmem:[#allocation160_spill] sm:$0xff] %v4441_v63  ;;  %v2305_v63 = vmul.f32 %v6556_v40, %v6555_v43  ;;  %v2306_v38 = vmul.f32 %v6557_v35, %v6555_v43  ;;  %v6563_v35 = vld [vmem:[#allocation85_spill] sm:$0xff]  ;;  %v2227_v28 = vsel %vm579_vm0, %v2217_v21, 0.0  ;;  %v4511_v11 = vmul.f32 %v4470_v42, %v6564_v2 }
 0x1be   : > { %6542 = vst [vmem:[#allocation161_spill] sm:$0xff] %v4449_v9  ;;  %v6571_v21 = vld [vmem:[#allocation125_spill] sm:$0xff] }
 0x1bf   : > { %6547 = vst [vmem:[#allocation16_spill] sm:$0xff] %v4459_v56  ;;  %v6569_v56 = vld [vmem:[#allocation127_spill] sm:$0xff] }
 0x1c0   : > { %6548 = vst [vmem:[#allocation163_spill] sm:$0xff] %v4463_v14 }
 0x1c1   : > { %6549 = vst [vmem:[#allocation164_spill] sm:$0xff] %v4467_v45  ;;  %v770_v45 = vmul.f32 %v6496_v10, %v6555_v43  ;;  %v1787_v10 = vmul.f32 %v4470_v42, %v6406_v19  ;;  %v6570_v19 = vld [vmem:[#allocation128_spill] sm:$0xff]  ;;  %2228 = vadd.xlane.f32.xlu0 %v2227_v28 }
 0x1c2   : > { %6550 = vst [vmem:[#allocation165_spill] sm:$0xff] %v4470_v42  ;;  %v4523_v42 = vpop.permute.xlu1 %1232 }
 0x1c3   : > { %6551 = vst [vmem:[#allocation166_spill] sm:$0xff] %v4474_v32  ;;  %v623_v32 = vpop.permute.xlu2 %622 }
 0x1c4   : > { %6552 = vst [vmem:[#allocation167_spill] sm:$0xff] %v4478_v13  ;;  %v6560_v13 = vld [vmem:[#allocation26_spill] sm:$0xff]  ;;  %v1353_v23 = vmul.f32 %v6569_v56, %v623_v32  ;;  %v1354_v9 = vmul.f32 %v6570_v19, %v623_v32  ;;  %v1797_v34 = vmul.f32 %v6571_v21, %v623_v32  ;;  %v1798_v2 = vmul.f32 %v6572_v51, %v623_v32 }
 0x1c5   : > { %6554 = vst [vmem:[#allocation168_spill] sm:$0xff] %v4482_v17  ;;  %v4498_v48 = vmul.f32 %v6536_v46, %v6560_v13  ;;  %v4502_v40 = vmul.f32 %v6537_v24, %v6560_v13  ;;  %v1417_v17 = vmul.f32 %v6563_v35, %v6555_v43  ;;  %v6566_v46 = vld [vmem:[#allocation86_spill] sm:$0xff]  ;;  %v2242_v24 = vmul.f32 %v4003_v50, %v623_v32  ;;  %v6567_v13 = vld [vmem:[#allocation123_spill] sm:$0xff]  ;;  %v6568_v35 = vld [vmem:[#allocation124_spill] sm:$0xff] }
 0x1c6   : > { %6559 = vst [vmem:[#allocation169_spill] sm:$0xff] %v4492_v58  ;;  %v2241_v58 = vmul.f32 %v4000_v7, %v623_v32  ;;  %v643_v14 = vmul.f32 %v6568_v35, %v623_v32  ;;  %v1372_v56 = vadd.f32 %v4165_v30, %v1354_v9  ;;  %v1815_v19 = vadd.f32 %v4217_v54, %v1797_v34 }
 0x1c7   : > { %6561 = vst [vmem:[#allocation170_spill] sm:$0xff] %v4498_v48  ;;  %v1418_v48 = vmul.f32 %v6566_v46, %v6555_v43  ;;  %v2260_v7 = vadd.f32 %v4141_v52, %v2242_v24  ;;  %v1816_v21 = vadd.f32 %v4221_v16, %v1798_v2 }
 0x1c8   : > { %6562 = vst [vmem:[#allocation171_spill] sm:$0xff] %v4502_v40  ;;  %v642_v40 = vmul.f32 %v6567_v13, %v623_v32  ;;  %v2259_v46 = vadd.f32 %v4137_v18, %v2241_v58  ;;  %v677_v43 = vadd.f32 %v4149_v3, %v643_v14  ;;  %v1390_v52 = vadd.f32 %v4205_v27, %v1372_v56  ;;  %v6579_v58 = vld [vmem:[#allocation163_spill] sm:$0xff] }
 0x1c9   : > { %6565 = vst [vmem:[#allocation18_spill] sm:$0xff] %v4511_v11  ;;  %v1371_v11 = vadd.f32 %v4161_v57, %v1353_v23  ;;  %v1833_v23 = vadd.f32 %v4209_v53, %v1815_v19  ;;  %v1834_v9 = vadd.f32 %v4213_v61, %v1816_v21  ;;  %v6584_v19 = vld [vmem:[#allocation149_spill] sm:$0xff] }
 0x1ca   : > { %6573 = vst [vmem:[#allocation123_spill] sm:$0xff] %v4523_v42  ;;  %v676_v50 = vadd.f32 %v4145_v62, %v642_v40  ;;  %v2277_v32 = vadd.f32 %v4177_v47, %v2259_v46  ;;  %v2278_v42 = vadd.f32 %v4181_v60, %v2260_v7  ;;  %v711_v24 = vadd.f32 %v4189_v36, %v677_v43 }
 0x1cb   : > { %v1389_v40 = vadd.f32 %v4201_v44, %v1371_v11  ;;  %v4545_v3 = vpop.permute.xlu2 %627  ;;  %v1408_v43 = vadd.f32 %v4311_v1, %v1390_v52  ;;  %v4550_v56 = vadd.f32 %v4335_v22, %v1833_v23  ;;  %v4553_v53 = vadd.f32 %v4345_v33, %v1834_v9  ;;  %v6587_v23 = vld [vmem:[#allocation84_spill] sm:$0xff] }
 0x1cc   : > { %v710_v18 = vadd.f32 %v4185_v12, %v676_v50  ;;  %v2295_v34 = vadd.f32 %v4278_v37, %v2277_v32  ;;  %v2296_v16 = vadd.f32 %v4282_v39, %v2278_v42  ;;  %v745_v7 = vadd.f32 %v4294_v6, %v711_v24  ;;  %v1776_v39 = vpop.xlane.xlu1 %1775  ;;  %v6578_v6 = vld [vmem:[#allocation16_spill] sm:$0xff] }
 0x1cd   : > { %v1407_v50 = vadd.f32 %v4298_v20, %v1389_v40  ;;  %v644_v42 = vmul.f32 %v6567_v13, %v4545_v3  ;;  %v645_v57 = vmul.f32 %v6568_v35, %v4545_v3  ;;  %v1426_v60 = vadd.f32 %v1418_v48, %v1408_v43  ;;  %v6576_v20 = vld [vmem:[#allocation161_spill] sm:$0xff]  ;;  %v6585_v2 = vld [vmem:[#allocation168_spill] sm:$0xff]  ;;  %v6586_v40 = vld [vmem:[#allocation83_spill] sm:$0xff] }
 0x1ce   : > { %v744_v62 = vadd.f32 %v4290_v4, %v710_v18  ;;  %v2313_v27 = vadd.f32 %v2305_v63, %v2295_v34  ;;  %v2314_v37 = vadd.f32 %v2306_v38, %v2296_v16  ;;  %v779_v46 = vadd.f32 %v771_v49, %v745_v7  ;;  %v6577_v4 = vld [vmem:[#allocation148_spill] sm:$0xff] }
 0x1cf   : > { %v1425_v47 = vadd.f32 %v1417_v17, %v1407_v50  ;;  %v678_v12 = vadd.f32 %v4153_v31, %v644_v42  ;;  %v679_v36 = vadd.f32 %v4157_v55, %v645_v57  ;;  %v1791_v33 = vadd.f32 %v1787_v10, %v1776_v39  ;;  %v6574_v31 = vld [vmem:[#allocation146_spill] sm:$0xff]  ;;  %v6575_v55 = vld [vmem:[#allocation147_spill] sm:$0xff] }
 0x1d0   : > { %v778_v30 = vadd.f32 %v770_v45, %v744_v62  ;;  %v2331_v1 = vadd.f32 %v4425_v26, %v2313_v27  ;;  %v2332_v22 = vadd.f32 %v4429_v25, %v2314_v37  ;;  %v813_v61 = vadd.f32 %v4437_v5, %v779_v46  ;;  %v6583_v10 = vld [vmem:[#allocation167_spill] sm:$0xff]  ;;  %v6588_v62 = vld [vmem:[#allocation169_spill] sm:$0xff]  ;;  %v6590_v27 = vld [vmem:[#allocation170_spill] sm:$0xff] }
 0x1d1   : > { %v1443_v54 = vadd.f32 %v4445_v59, %v1425_v47  ;;  %v712_v26 = vadd.f32 %v4262_v0, %v678_v12  ;;  %v713_v25 = vadd.f32 %v4286_v41, %v679_v36  ;;  %1941 = vperm.xlu1 %2945, %v1791_v33   ;;  %v6582_v41 = vld [vmem:[#allocation166_spill] sm:$0xff]  ;;  %v6591_v42 = vld [vmem:[#allocation171_spill] sm:$0xff]  ;;  %v1800_v47 = vmul.f32 %v6572_v51, %v4545_v3  ;;  %v6597_v33 = vld [vmem:[#allocation97_spill] sm:$0xff] }
 0x1d2   : > { %v812_v44 = vadd.f32 %v4433_v8, %v778_v30  ;;  %v2349_v45 = vadd.f32 %v4357_v15, %v2331_v1  ;;  %v2350_v17 = vadd.f32 %v4361_v29, %v2332_v22  ;;  %v847_v49 = vadd.f32 %v6575_v55, %v813_v61  ;;  %v6580_v15 = vld [vmem:[#allocation151_spill] sm:$0xff]  ;;  %v6581_v29 = vld [vmem:[#allocation152_spill] sm:$0xff]  ;;  %v6592_v30 = vld [vmem:[#allocation125_spill] sm:$0xff] }
 0x1d3   : > { %v1444_v8 = vadd.f32 %v6576_v20, %v1426_v60  ;;  %v1461_v5 = vadd.f32 %v6577_v4, %v1443_v54  ;;  %v746_v14 = vadd.f32 %v6580_v15, %v712_v26  ;;  %v747_v38 = vadd.f32 %v6581_v29, %v713_v25  ;;  %v4578_v0 = vpop.permute.xlu2 %890  ;;  %v6593_v60 = vld [vmem:[#allocation18_spill] sm:$0xff]  ;;  %v6594_v1 = vld [vmem:[#allocation23_spill] sm:$0xff]  ;;  %v6601_v25 = vld [vmem:[#allocation164_spill] sm:$0xff] }
 0x1d4   : > { %v846_v48 = vadd.f32 %v6574_v31, %v812_v44  ;;  %v2367_v59 = vadd.f32 %v6578_v6, %v2349_v45  ;;  %v2368_v28 = vadd.f32 %v6579_v58, %v2350_v17  ;;  %v881_v11 = vadd.f32 %v6583_v10, %v847_v49  ;;  %v1779_v43 = vpop.xlane.xlu1 %1778  ;;  %v6595_v22 = vld [vmem:[#allocation87_spill] sm:$0xff]  ;;  %v6596_v36 = vld [vmem:[#allocation34_spill] sm:$0xff]  ;;  %v6600_v17 = vld [vmem:[#allocation160_spill] sm:$0xff] }
 0x1d5   : > { %v1462_v21 = vadd.f32 %v6584_v19, %v1444_v8  ;;  %v1479_v32 = vadd.f32 %v6585_v2, %v1461_v5  ;;  %v780_v52 = vadd.f32 %v6586_v40, %v746_v14  ;;  %v781_v9 = vadd.f32 %v6587_v23, %v747_v38  ;;  %v6598_v61 = vld [vmem:[#allocation43_spill] sm:$0xff]  ;;  %v6603_v55 = vld [vmem:[#allocation10_spill] sm:$0xff]  ;;  %v6606_v5 = vld [vmem:[#allocation60_spill] sm:$0xff] }
 0x1d6   : > { %v880_v63 = vadd.f32 %v6582_v41, %v846_v48  ;;  %v4585_v18 = vadd.f32 %v2367_v59, %v4578_v0  ;;  %v4588_v24 = vadd.f32 %v2368_v28, %v4578_v0  ;;  %v4596_v16 = vadd.f32 %v4578_v0, %v881_v11  ;;  %v6599_v54 = vld [vmem:[#allocation119_spill] sm:$0xff]  ;;  %v4622_v20 = vld [vmem:[%s3359_s25 + $0x8] sm:$0xff]  ;;  %v6607_v59 = vld [vmem:[#allocation88_spill] sm:$0xff] }
 0x1d7   : > { %v1480_v7 = vadd.f32 %v6588_v62, %v1462_v21  ;;  %v4600_v50 = vadd.f32 %v1479_v32, %v4578_v0  ;;  %v814_v37 = vadd.f32 %v6590_v27, %v780_v52  ;;  %v815_v57 = vadd.f32 %v6591_v42, %v781_v9  ;;  %6604 = vst [vmem:[#allocation146_spill] sm:$0xff] %v4622_v20  ;;  %v6605_v8 = vld [vmem:[#allocation130_spill] sm:$0xff]  ;;  %v4631_v15 = vld [vmem:[%s3359_s25 + $0x10] sm:$0xff]  ;;  %v6608_v14 = vld [vmem:[#allocation165_spill] sm:$0xff] }
 0x1d8   : > { %v4593_v34 = vadd.f32 %v4578_v0, %v880_v63  ;;  %v1799_v46 = vmul.f32 %v6592_v30, %v4545_v3  ;;  %v1792_v39 = vadd.f32 %v6593_v60, %v1779_v43  ;;  %v1861_v12 = vmul.f32 %v6595_v22, %v6594_v1  ;;  %v6609_v38 = vld [vmem:[#allocation156_spill] sm:$0xff]  ;;  %v6610_v63 = vld [vmem:[#allocation157_spill] sm:$0xff]  ;;  %v6612_v2 = vld [vmem:[#allocation138_spill] sm:$0xff] }
 0x1d9   : > { %6589 = vst [vmem:[#allocation124_spill] sm:$0xff] %v4600_v50  ;;  %v1880_v44 = vmul.f32 %v6597_v33, %v6596_v36  ;;  %v1915_v45 = vmul.f32 %v6599_v54, %v6598_v61  ;;  %v848_v26 = vadd.f32 %v6600_v17, %v814_v37  ;;  %v849_v31 = vadd.f32 %v6601_v25, %v815_v57  ;;  %v6611_v11 = vld [vmem:[#allocation20_spill] sm:$0xff]  ;;  %v6614_v23 = vld [vmem:[#allocation131_spill] sm:$0xff]  ;;  %v6619_v37 = vld [vmem:[#allocation153_spill] sm:$0xff] }
 0x1da   : > { %v4618_v48 = vadd.f32 %v1480_v7, %v4578_v0  ;;  %v1817_v49 = vadd.f32 %v6603_v55, %v1799_v46  ;;  %v2232_v4 = vmul.f32 %v4622_v20, %v6605_v8  ;;  %1946 = vperm.xlu2 %2946, %v1792_v39   ;;  %v1818_v6 = vadd.f32 %v6606_v5, %v1800_v47  ;;  %v6615_v62 = vld [vmem:[#allocation24_spill] sm:$0xff]  ;;  %v6620_v57 = vld [vmem:[#allocation113_spill] sm:$0xff]  ;;  %v6623_v60 = vld [vmem:[#allocation103_spill] sm:$0xff] }
 0x1db   : > { %v1862_v58 = vmul.f32 %v6607_v59, %v6594_v1  ;;  %v1869_v28 = vadd.f32 %v1861_v12, %v4550_v56  ;;  %v1789_v29 = vmul.f32 %v4631_v15, %v6608_v14  ;;  %v4636_v41 = vadd.f32 %v6609_v38, %v848_v26  ;;  %v4642_v21 = vpop.permute.xlu2 %900  ;;  %v6613_v56 = vld [vmem:[#allocation162_spill] sm:$0xff]  ;;  %v6617_v43 = vld [vmem:[#allocation112_spill] sm:$0xff]  ;;  %v6626_v26 = vld [vmem:[#allocation29_spill] sm:$0xff] }
 0x1dc   : > { %6602 = vst [vmem:[#allocation126_spill] sm:$0xff] %v4618_v48  ;;  %v4639_v10 = vadd.f32 %v6610_v63, %v849_v31  ;;  %v1835_v19 = vadd.f32 %v6611_v11, %v1817_v49  ;;  %v1836_v32 = vadd.f32 %v6612_v2, %v1818_v6  ;;  %v2243_v9 = vmul.f32 %v6614_v23, %v4545_v3  ;;  %v6625_v12 = vld [vmem:[#allocation158_spill] sm:$0xff]  ;;  %v1782_v17 = vpop.xlane.xlu1 %1781  ;;  %v6628_v55 = vld [vmem:[#allocation76_spill] sm:$0xff]  ;;  %v6629_v5 = vld [vmem:[#allocation79_spill] sm:$0xff] }
 0x1dd   : > { %v1870_v40 = vadd.f32 %v1862_v58, %v4553_v53  ;;  %v1887_v52 = vadd.f32 %v6613_v56, %v1869_v28  ;;  %v4651_v7 = vadd.f32 %v4642_v21, %v6615_v62  ;;  %v4655_v27 = vadd.f32 %v4642_v21, %v6617_v43  ;;  %v6622_v53 = vld [vmem:[#allocation154_spill] sm:$0xff]  ;;  %v6630_v58 = vld [vmem:[#allocation55_spill] sm:$0xff]  ;;  %v6631_v63 = vld [vmem:[#allocation145_spill] sm:$0xff] }
 0x1de   : > { %v1853_v42 = vadd.f32 %v6619_v37, %v1835_v19  ;;  %v4660_v46 = vadd.f32 %v6620_v57, %v4642_v21  ;;  %v1854_v47 = vadd.f32 %v6622_v53, %v1836_v32  ;;  %v4665_v39 = vadd.f32 %v6623_v60, %v4642_v21  ;;  %v6627_v31 = vld [vmem:[#allocation22_spill] sm:$0xff]  ;;  %v6632_v19 = vld [vmem:[#allocation159_spill] sm:$0xff]  ;;  %v6634_v56 = vld [vmem:[#allocation32_spill] sm:$0xff] }
 0x1df   : > { %6616 = vst [vmem:[#allocation147_spill] sm:$0xff] %v4651_v7  ;;  %v1888_v1 = vadd.f32 %v1880_v44, %v1870_v40  ;;  %v1905_v36 = vadd.f32 %v6625_v12, %v1887_v52  ;;  %v4671_v49 = vmul.f32 %v6628_v55, %v6627_v31  ;;  %v4675_v6 = vmul.f32 %v6629_v5, %v6627_v31  ;;  %v6633_v32 = vld [vmem:[#allocation135_spill] sm:$0xff]  ;;  %v6635_v52 = vld [vmem:[#allocation98_spill] sm:$0xff] }
 0x1e0   : > { %6618 = vst [vmem:[#allocation161_spill] sm:$0xff] %v4655_v27  ;;  %v1871_v25 = vadd.f32 %v6626_v26, %v1853_v42  ;;  %v2261_v28 = vadd.f32 %v6630_v58, %v2243_v9  ;;  %v1793_v38 = vadd.f32 %v1789_v29, %v1782_v17  ;;  %v1872_v11 = vadd.f32 %v6631_v63, %v1854_v47  ;;  %v6637_v43 = vld [vmem:[#allocation99_spill] sm:$0xff]  ;;  %v6639_v42 = vld [vmem:[#allocation85_spill] sm:$0xff]  ;;  %v6640_v29 = vld [vmem:[#allocation86_spill] sm:$0xff] }
 0x1e1   : > { %6621 = vst [vmem:[#allocation148_spill] sm:$0xff] %v4660_v46  ;;  %v1906_v44 = vadd.f32 %v6632_v19, %v1888_v1  ;;  %v1923_v2 = vadd.f32 %v1915_v45, %v1905_v36  ;;  %v2236_v40 = vadd.f32 %v2232_v4, %v6633_v32  ;;  %v4683_v62 = vmul.f32 %v6635_v52, %v6634_v56  ;;  %v6641_v45 = vld [vmem:[#allocation25_spill] sm:$0xff]  ;;  %v6645_v60 = vld [vmem:[#allocation27_spill] sm:$0xff]  ;;  %v6646_v1 = vld [vmem:[#allocation74_spill] sm:$0xff] }
 0x1e2   : > { %6624 = vst [vmem:[#allocation16_spill] sm:$0xff] %v4665_v39  ;;  %v4687_v37 = vmul.f32 %v6637_v43, %v6634_v56  ;;  %v4691_v57 = vmul.f32 %v6639_v42, %v6627_v31  ;;  %1951 = vperm.xlu2 %2946, %v1793_v38   ;;  %v4695_v9 = vmul.f32 %v6640_v29, %v6627_v31  ;;  %v6651_v26 = vld [vmem:[#allocation30_spill] sm:$0xff]  ;;  %v6653_v58 = vld [vmem:[#allocation75_spill] sm:$0xff]  ;;  %v6656_v52 = vld [vmem:[#allocation69_spill] sm:$0xff] }
 0x1e3   : > { %6636 = vst [vmem:[#allocation163_spill] sm:$0xff] %v4683_v62  ;;  %v4699_v4 = vmul.f32 %v6595_v22, %v6641_v45  ;;  %v4703_v53 = vmul.f32 %v6607_v59, %v6641_v45  ;;  %v4707_v47 = vmul.f32 %v6628_v55, %v6641_v45  ;;  %v2289_v12 = vmul.f32 %v6646_v1, %v6645_v60  ;;  %v4723_v59 = vpop.permute.xlu2 %923  ;;  %v6652_v31 = vld [vmem:[#allocation66_spill] sm:$0xff]  ;;  %v6660_v46 = vld [vmem:[#allocation71_spill] sm:$0xff]  ;;  %v6676_v62 = vld [vmem:[#allocation57_spill] sm:$0xff] }
 0x1e4   : > { %6638 = vst [vmem:[#allocation151_spill] sm:$0xff] %v4687_v37  ;;  %v4713_v36 = vmul.f32 %v6629_v5, %v6641_v45  ;;  %v4717_v17 = vmul.f32 %v6639_v42, %v6641_v45  ;;  %v4721_v22 = vmul.f32 %v6640_v29, %v6641_v45  ;;  %v4727_v55 = vmul.f32 %v6652_v31, %v6651_v26  ;;  %v6654_v5 = vld [vmem:[#allocation77_spill] sm:$0xff]  ;;  %v6655_v19 = vld [vmem:[#allocation78_spill] sm:$0xff]  ;;  %v6658_v29 = vld [vmem:[#allocation96_spill] sm:$0xff] }
 0x1e5   : > { %6642 = vst [vmem:[#allocation152_spill] sm:$0xff] %v4699_v4  ;;  %v2290_v38 = vmul.f32 %v6653_v58, %v6645_v60  ;;  %v1401_v63 = vmul.f32 %v6654_v5, %v6645_v60  ;;  %v1402_v32 = vmul.f32 %v6655_v19, %v6645_v60  ;;  %2390 = vperm.xlu0 %2944, %v2236_v40   ;;  %v6657_v42 = vld [vmem:[#allocation26_spill] sm:$0xff]  ;;  %v6659_v31 = vld [vmem:[#allocation132_spill] sm:$0xff]  ;;  %v6662_v60 = vld [vmem:[#allocation127_spill] sm:$0xff] }
 0x1e6   : > { %6643 = vst [vmem:[#allocation166_spill] sm:$0xff] %v4703_v53  ;;  %v4737_v43 = vmul.f32 %v6656_v52, %v6651_v26  ;;  %v1881_v45 = vmul.f32 %v6658_v29, %v6657_v42  ;;  %v2244_v39 = vmul.f32 %v6659_v31, %v4545_v3  ;;  %v4745_v14 = vmul.f32 %v6660_v46, %v6651_v26  ;;  %v6668_v46 = vld [vmem:[#allocation120_spill] sm:$0xff]  ;;  %v6670_v7 = vld [vmem:[#allocation110_spill] sm:$0xff] }
 0x1e7   : > { %6644 = vst [vmem:[#allocation167_spill] sm:$0xff] %v4707_v47  ;;  %v1355_v40 = vmul.f32 %v6662_v60, %v4545_v3  ;;  %v4757_v48 = vmul.f32 %v6646_v1, %v6651_v26  ;;  %v6667_v47 = vld [vmem:[#allocation109_spill] sm:$0xff]  ;;  %v1916_v4 = vmul.f32 %v6668_v46, %v6598_v61  ;;  %v6673_v61 = vld [vmem:[#allocation11_spill] sm:$0xff] }
 0x1e8   : > { %6647 = vst [vmem:[#allocation149_spill] sm:$0xff] %v4713_v36  ;;  %v1889_v50 = vadd.f32 %v1881_v45, %v1871_v25  ;;  %v6666_v36 = vld [vmem:[#allocation40_spill] sm:$0xff]  ;;  %v2262_v20 = vadd.f32 %v6673_v61, %v2244_v39 }
 0x1e9   : > { %6648 = vst [vmem:[#allocation168_spill] sm:$0xff] %v4717_v17  ;;  %v6663_v17 = vld [vmem:[#allocation72_spill] sm:$0xff]  ;;  %v1899_v53 = vmul.f32 %v6667_v47, %v6666_v36  ;;  %v1924_v45 = vadd.f32 %v1916_v4, %v1906_v44 }
 0x1ea   : > { %6649 = vst [vmem:[#allocation83_spill] sm:$0xff] %v4721_v22  ;;  %v1882_v22 = vmul.f32 %v6597_v33, %v6657_v42  ;;  %v4753_v52 = vmul.f32 %v6663_v17, %v6651_v26  ;;  %v1900_v17 = vmul.f32 %v6670_v7, %v6666_v36 }
 0x1eb   : > { %6650 = vst [vmem:[#allocation84_spill] sm:$0xff] %v4723_v59  ;;  %v1907_v1 = vadd.f32 %v1899_v53, %v1889_v50  ;;  %v1373_v59 = vadd.f32 %v6676_v62, %v1355_v40  ;;  %v6678_v50 = vld [vmem:[#allocation140_spill] sm:$0xff]  ;;  %v4791_v39 = vpop.permute.xlu2 %933  ;;  %v6681_v53 = vld [vmem:[#allocation62_spill] sm:$0xff] }
 0x1ec   : > { %6661 = vst [vmem:[#allocation169_spill] sm:$0xff] %v4745_v14  ;;  %v4765_v14 = vmul.f32 %v6653_v58, %v6651_v26  ;;  %v1890_v27 = vadd.f32 %v1882_v22, %v1872_v11  ;;  %v6674_v58 = vld [vmem:[#allocation139_spill] sm:$0xff]  ;;  %v6675_v11 = vld [vmem:[#allocation128_spill] sm:$0xff]  ;;  %v2280_v44 = vadd.f32 %v6678_v50, %v2262_v20  ;;  %v6683_v40 = vld [vmem:[#allocation90_spill] sm:$0xff] }
 0x1ed   : > { %6664 = vst [vmem:[#allocation170_spill] sm:$0xff] %v4753_v52  ;;  %v6671_v52 = vld [vmem:[#allocation33_spill] sm:$0xff]  ;;  %v1356_v22 = vmul.f32 %v6675_v11, %v4545_v3  ;;  %v6685_v20 = vld [vmem:[#allocation122_spill] sm:$0xff] }
 0x1ee   : > { %6665 = vst [vmem:[#allocation171_spill] sm:$0xff] %v4757_v48  ;;  %v1917_v8 = vmul.f32 %v6599_v54, %v6671_v52  ;;  %v1918_v25 = vmul.f32 %v6668_v46, %v6671_v52  ;;  %v4774_v48 = vadd.f32 %v1923_v2, %v4578_v0  ;;  %v1908_v37 = vadd.f32 %v1900_v17, %v1890_v27  ;;  %v6679_v2 = vld [vmem:[#allocation89_spill] sm:$0xff]  ;;  %v6682_v17 = vld [vmem:[#allocation143_spill] sm:$0xff]  ;;  %v6692_v50 = vld [vmem:[#allocation94_spill] sm:$0xff] }
 0x1ef   : > { %6669 = vst [vmem:[#allocation125_spill] sm:$0xff] %v4765_v14  ;;  %v2279_v14 = vadd.f32 %v6674_v58, %v2261_v28  ;;  %v4784_v54 = vadd.f32 %v1924_v45, %v4578_v0  ;;  %v4789_v4 = vadd.f32 %v6679_v2, %v4642_v21  ;;  %v1374_v3 = vadd.f32 %v6681_v53, %v1356_v22  ;;  %v6687_v45 = vld [vmem:[#allocation48_spill] sm:$0xff]  ;;  %v6691_v58 = vld [vmem:[#allocation93_spill] sm:$0xff] }
 0x1f0   : > { %6672 = vst [vmem:[#allocation18_spill] sm:$0xff] %v4774_v48  ;;  %v4781_v33 = vadd.f32 %v1917_v8, %v1907_v1  ;;  %v4793_v27 = vadd.f32 %v1918_v25, %v1908_v37  ;;  %v1391_v62 = vadd.f32 %v6682_v17, %v1373_v59  ;;  %v2298_v8 = vadd.f32 %v2290_v38, %v2280_v44  ;;  %v6689_v37 = vld [vmem:[#allocation92_spill] sm:$0xff] }
 0x1f1   : > { %6677 = vst [vmem:[#allocation23_spill] sm:$0xff] %v4784_v54  ;;  %v2297_v28 = vadd.f32 %v2289_v12, %v2279_v14  ;;  %v4799_v0 = vadd.f32 %v6683_v40, %v4642_v21  ;;  %v4803_v1 = vadd.f32 %v6685_v20, %v4642_v21  ;;  %v4807_v61 = vadd.f32 %v6687_v45, %v4642_v21  ;;  %v6690_v25 = vld [vmem:[#allocation144_spill] sm:$0xff]  ;;  %v6702_v54 = vld [vmem:[#allocation59_spill] sm:$0xff] }
 0x1f2   : > { %6680 = vst [vmem:[#allocation87_spill] sm:$0xff] %v4789_v4  ;;  %v2325_v14 = vmul.f32 %v6689_v37, %v6657_v42  ;;  %v1392_v59 = vadd.f32 %v6690_v25, %v1374_v3  ;;  %v1409_v38 = vadd.f32 %v1401_v63, %v1391_v62  ;;  %v2326_v22 = vmul.f32 %v6691_v58, %v6657_v42  ;;  %v6693_v17 = vld [vmem:[#allocation100_spill] sm:$0xff]  ;;  %v6694_v63 = vld [vmem:[#allocation95_spill] sm:$0xff]  ;;  %v6695_v62 = vld [vmem:[#allocation129_spill] sm:$0xff] }
 0x1f3   : > { %6684 = vst [vmem:[#allocation34_spill] sm:$0xff] %v4799_v0  ;;  %v2315_v12 = vadd.f32 %v4671_v49, %v2297_v28  ;;  %v2343_v44 = vmul.f32 %v6692_v50, %v6666_v36  ;;  %v2316_v2 = vadd.f32 %v4675_v6, %v2298_v8  ;;  %v4820_v21 = vmul.f32 %v6654_v5, %v6651_v26  ;;  %v6696_v6 = vld [vmem:[#allocation104_spill] sm:$0xff]  ;;  %v6697_v5 = vld [vmem:[#allocation101_spill] sm:$0xff] }
 0x1f4   : > { %6686 = vst [vmem:[#allocation43_spill] sm:$0xff] %v4803_v1  ;;  %v1437_v40 = vmul.f32 %v6693_v17, %v6657_v42  ;;  %v1410_v49 = vadd.f32 %v1402_v32, %v1392_v59  ;;  %v1427_v28 = vadd.f32 %v4691_v57, %v1409_v38  ;;  %v2344_v3 = vmul.f32 %v6694_v63, %v6666_v36  ;;  %v6698_v32 = vld [vmem:[#allocation121_spill] sm:$0xff]  ;;  %v6701_v1 = vld [vmem:[#allocation19_spill] sm:$0xff] }
 0x1f5   : > { %6688 = vst [vmem:[#allocation160_spill] sm:$0xff] %v4807_v61  ;;  %v2333_v53 = vadd.f32 %v2325_v14, %v2315_v12  ;;  %v2361_v20 = vmul.f32 %v6695_v62, %v6671_v52  ;;  %v2334_v45 = vadd.f32 %v2326_v22, %v2316_v2  ;;  %v1455_v8 = vmul.f32 %v6696_v6, %v6666_v36  ;;  %v6699_v38 = vld [vmem:[#allocation105_spill] sm:$0xff]  ;;  %v6700_v61 = vld [vmem:[#allocation116_spill] sm:$0xff]  ;;  %v2386_v2 = vpop.permute.xlu2 %2385 }
 0x1f6   : > { %v1438_v14 = vmul.f32 %v6697_v5, %v6657_v42  ;;  %v1428_v12 = vadd.f32 %v4695_v9, %v1410_v49  ;;  %v1445_v0 = vadd.f32 %v1437_v40, %v1427_v28  ;;  %v2362_v57 = vmul.f32 %v6698_v32, %v6671_v52  ;;  %v919_v28 = vpop.permute.xlu0 %918 }
 0x1f7   : > { %v2351_v25 = vadd.f32 %v2343_v44, %v2333_v53  ;;  %v2352_v59 = vadd.f32 %v2344_v3, %v2334_v45  ;;  %v1456_v4 = vmul.f32 %v6699_v38, %v6666_v36  ;;  %v1473_v22 = vmul.f32 %v6700_v61, %v6671_v52  ;;  %v6703_v3 = vld [vmem:[#allocation117_spill] sm:$0xff]  ;;  %v6705_v45 = vld [vmem:[#allocation56_spill] sm:$0xff] }
 0x1f8   : > { %v1329_v44 = vmul.f32 %v6702_v54, %v6701_v1  ;;  %v1446_v42 = vadd.f32 %v1438_v14, %v1428_v12  ;;  %v1463_v48 = vadd.f32 %v1455_v8, %v1445_v0  ;;  %v4845_v9 = vadd.f32 %v2386_v2, %v4585_v18  ;;  %v638_v0 = vpop.permute.xlu1 %637 }
 0x1f9   : > { %v4842_v53 = vadd.f32 %v2361_v20, %v2351_v25  ;;  %v4848_v40 = vadd.f32 %v2386_v2, %v4588_v24  ;;  %v4850_v49 = vadd.f32 %v2362_v57, %v2352_v59  ;;  %v4854_v36 = vmul.f32 %v6655_v19, %v6651_v26  ;;  %v6704_v24 = vld [vmem:[#allocation21_spill] sm:$0xff] }
 0x1fa   : > { %v1474_v54 = vmul.f32 %v6703_v3, %v6671_v52  ;;  %v1464_v1 = vadd.f32 %v1456_v4, %v1446_v42  ;;  %v4858_v20 = vadd.f32 %v1473_v22, %v1463_v48  ;;  %v4862_v18 = vmul.f32 %v6667_v47, %v6634_v56  ;;  %v6706_v25 = vld [vmem:[#allocation61_spill] sm:$0xff]  ;;  %v6708_v42 = vld [vmem:[#allocation54_spill] sm:$0xff] }
 0x1fb   : > { %v708_v8 = vmul.f32 %v6705_v45, %v6704_v24  ;;  %v709_v14 = vmul.f32 %v6706_v25, %v6704_v24  ;;  %v936_v26 = vadd.f32 %v919_v28, %v4593_v34  ;;  %v937_v19 = vadd.f32 %v919_v28, %v4596_v16  ;;  %v6707_v2 = vld [vmem:[#allocation65_spill] sm:$0xff]  ;;  %v6709_v28 = vld [vmem:[#allocation12_spill] sm:$0xff] }
 0x1fc   : > { %v1339_v52 = vsel %vm579_vm0, %v1329_v44, 0.0  ;;  %v648_v48 = vmul.f32 %v6567_v13, %v638_v0  ;;  %v649_v4 = vmul.f32 %v6568_v35, %v638_v0  ;;  %v4873_v12 = vadd.f32 %v1474_v54, %v1464_v1  ;;  %v6710_v54 = vld [vmem:[#allocation13_spill] sm:$0xff] }
 0x1fd   : > { %v1803_v47 = vmul.f32 %v6592_v30, %v638_v0  ;;  %v1804_v57 = vmul.f32 %v6572_v51, %v638_v0  ;;  %v2247_v59 = vmul.f32 %v6614_v23, %v638_v0  ;;  %v2248_v22 = vmul.f32 %v6659_v31, %v638_v0  ;;  %v6711_v30 = vld [vmem:[#allocation44_spill] sm:$0xff]  ;;  %v6712_v23 = vld [vmem:[#allocation15_spill] sm:$0xff]  ;;  %1340 = vadd.xlane.f32.xlu1 %v1339_v52 }
 0x1fe   : > { %v682_v34 = vadd.f32 %v6707_v2, %v648_v48  ;;  %v683_v16 = vadd.f32 %v6708_v42, %v649_v4  ;;  %v1359_v44 = vmul.f32 %v6662_v60, %v638_v0  ;;  %v1360_v13 = vmul.f32 %v6675_v11, %v638_v0  ;;  %v6713_v48 = vld [vmem:[#allocation136_spill] sm:$0xff]  ;;  %v6714_v60 = vld [vmem:[#allocation137_spill] sm:$0xff] }
 0x1ff   : > { %v4884_v35 = vadd.f32 %v6709_v28, %v1803_v47  ;;  %v4887_v1 = vadd.f32 %v6710_v54, %v1804_v57  ;;  %v4890_v51 = vadd.f32 %v6711_v30, %v2247_v59  ;;  %v4893_v45 = vadd.f32 %v6712_v23, %v2248_v22  ;;  %v6718_v22 = vld [vmem:[#allocation80_spill] sm:$0xff] }
 0x200   : > { %v716_v31 = vadd.f32 %v708_v8, %v682_v34  ;;  %v717_v25 = vadd.f32 %v709_v14, %v683_v16  ;;  %v4896_v4 = vadd.f32 %v6713_v48, %v1359_v44  ;;  %v4899_v11 = vadd.f32 %v6714_v60, %v1360_v13  ;;  %v4923_v59 = vpop.permute.xlu1 %895  ;;  %v6722_v16 = vld [vmem:[#allocation115_spill] sm:$0xff]  ;;  %v6723_v13 = vld [vmem:[#allocation97_spill] sm:$0xff]  ;;  %v6724_v30 = vld [vmem:[#allocation84_spill] sm:$0xff] }
 0x201   : > { %v4903_v0 = vmul.f32 %v6670_v7, %v6634_v56  ;;  %v4907_v47 = vmul.f32 %v6692_v50, %v6634_v56  ;;  %v4911_v57 = vmul.f32 %v6694_v63, %v6634_v56  ;;  %v4915_v8 = vmul.f32 %v6696_v6, %v6634_v56  ;;  %v6717_v50 = vld [vmem:[#allocation37_spill] sm:$0xff]  ;;  %v6727_v60 = vld [vmem:[#allocation108_spill] sm:$0xff] }
 0x202   : > { %v750_v14 = vadd.f32 %v4727_v55, %v716_v31  ;;  %v751_v52 = vadd.f32 %v4737_v43, %v717_v25  ;;  %2954 = vtanh.f32 %v936_v26  ;;  %v4921_v7 = vmul.f32 %v6699_v38, %v6634_v56  ;;  %v6719_v63 = vld [vmem:[#allocation81_spill] sm:$0xff]  ;;  %v6721_v26 = vld [vmem:[#allocation142_spill] sm:$0xff]  ;;  %v6725_v31 = vld [vmem:[#allocation28_spill] sm:$0xff] }
 0x203   : > { %6715 = vst [vmem:[#allocation164_spill] sm:$0xff] %v4915_v8  ;;  %v810_v2 = vmul.f32 %v6718_v22, %v6717_v50  ;;  %v811_v34 = vmul.f32 %v6719_v63, %v6717_v50  ;;  %2956 = vtanh.f32 %v937_v19  ;;  %v4931_v6 = vmul.f32 %v6658_v29, %v6717_v50  ;;  %v6720_v55 = vld [vmem:[#allocation141_spill] sm:$0xff]  ;;  %v6726_v25 = vld [vmem:[#allocation107_spill] sm:$0xff] }
 0x204   : > { %6716 = vst [vmem:[#allocation10_spill] sm:$0xff] %v4921_v7  ;;  %v784_v43 = vadd.f32 %v6720_v55, %v750_v14  ;;  %v785_v42 = vadd.f32 %v6721_v26, %v751_v52  ;;  %v910_v56 = vadd.f32 %v4923_v59, %v4636_v41  ;;  %v911_v38 = vadd.f32 %v4923_v59, %v4639_v10  ;;  %v6730_v22 = vld [vmem:[#allocation163_spill] sm:$0xff]  ;;  %v6732_v55 = vld [vmem:[#allocation68_spill] sm:$0xff]  ;;  %v6733_v26 = vld [vmem:[#allocation70_spill] sm:$0xff] }
 0x205   : > { %v1345_v44 = vmul.f32 %v4631_v15, %v6722_v16  ;;  %v4943_v19 = vmul.f32 %v6723_v13, %v6717_v50  ;;  %v4947_v29 = vmul.f32 %v6689_v37, %v6717_v50  ;;  %v4951_v28 = vmul.f32 %v6691_v58, %v6717_v50  ;;  %v6731_v63 = vld [vmem:[#allocation151_spill] sm:$0xff]  ;;  %v6741_v7 = vld [vmem:[#allocation130_spill] sm:$0xff] }
 0x206   : > { %v818_v54 = vadd.f32 %v810_v2, %v784_v43  ;;  %v819_v41 = vadd.f32 %v811_v34, %v785_v42  ;;  %v4954_v23 = vadd.f32 %v6724_v30, %v910_v56  ;;  %v4957_v10 = vadd.f32 %v6724_v30, %v911_v38  ;;  %v6736_v13 = vld [vmem:[#allocation63_spill] sm:$0xff] }
 0x207   : > { %v878_v48 = vmul.f32 %v6726_v25, %v6725_v31  ;;  %v879_v14 = vmul.f32 %v6727_v60, %v6725_v31  ;;  %v4965_v37 = vmul.f32 %v6693_v17, %v6717_v50  ;;  %v4969_v58 = vmul.f32 %v6697_v5, %v6717_v50  ;;  %v6734_v17 = vld [vmem:[#allocation51_spill] sm:$0xff]  ;;  %v6735_v5 = vld [vmem:[#allocation53_spill] sm:$0xff]  ;;  %v6738_v25 = vld [vmem:[#allocation102_spill] sm:$0xff] }
 0x208   : > { %v4971_v52 = vpop.eup %2954  ;;  %v852_v2 = vadd.f32 %v6730_v22, %v818_v54  ;;  %v853_v34 = vadd.f32 %v6731_v63, %v819_v41  ;;  %v1831_v43 = vmul.f32 %v6732_v55, %v6704_v24  ;;  %v1832_v42 = vmul.f32 %v6733_v26, %v6704_v24  ;;  %v6737_v54 = vld [vmem:[#allocation67_spill] sm:$0xff]  ;;  %v5004_v8 = vpop.permute.xlu1 %905 }
 0x209   : > { %6728 = vst [vmem:[#allocation60_spill] sm:$0xff] %v4965_v37  ;;  %v4979_v56 = vpop.eup %2956  ;;  %v2275_v38 = vmul.f32 %v6734_v17, %v6704_v24  ;;  %v2276_v50 = vmul.f32 %v6735_v5, %v6704_v24  ;;  %v4987_v30 = vmul.f32 %v6736_v13, %v6704_v24  ;;  %v4991_v41 = vmul.f32 %v6737_v54, %v6704_v24  ;;  %v6739_v55 = vld [vmem:[#allocation119_spill] sm:$0xff]  ;;  %v6740_v17 = vld [vmem:[#allocation146_spill] sm:$0xff] }
 0x20a   : > { %6729 = vst [vmem:[#allocation88_spill] sm:$0xff] %v4969_v58  ;;  %v4994_v60 = vadd.f32 %v1345_v44, %v6738_v25  ;;  %v886_v22 = vadd.f32 %v878_v48, %v852_v2  ;;  %v887_v63 = vadd.f32 %v879_v14, %v853_v34  ;;  %v4998_v26 = vmul.f32 %v6739_v55, %v6725_v31  ;;  %v6753_v58 = vld [vmem:[#allocation36_spill] sm:$0xff] }
 0x20b   : > { %v1344_v5 = vmul.f32 %v6740_v17, %v6722_v16  ;;  %v2233_v13 = vmul.f32 %v4631_v15, %v6741_v7  ;;  %v965_v24 = vperm.slane %v4971_v52, 1  ;;  %v5009_v44 = vmul.f32 %v6668_v46, %v6725_v31 }
 0x20c   : > { %v914_v48 = vadd.f32 %v5004_v8, %v886_v22  ;;  %v915_v14 = vadd.f32 %v5004_v8, %v887_v63  ;;  %v975_v2 = vperm.slane %v4971_v52, 2  ;;  %v985_v34 = vperm.slane %v4971_v52, 3 }
 0x20d   : > { %v966_v54 = vperm.slane %v4979_v56, 1  ;;  %v976_v15 = vperm.slane %v4979_v56, 2  ;;  %v986_v25 = vperm.slane %v4979_v56, 3  ;;  %v5020_v55 = vadd.f32 %v4781_v33, %v4923_v59 }
 0x20e   : > { %v5023_v46 = vadd.f32 %v4791_v39, %v914_v48  ;;  %v5026_v22 = vadd.f32 %v4791_v39, %v915_v14  ;;  %v995_v63 = vperm.slane %v4971_v52, 4  ;;  %v5031_v17 = vadd.f32 %v4793_v27, %v4923_v59  ;;  %v6749_v14 = vld [vmem:[#allocation9_spill] sm:$0xff]  ;;  %v6750_v27 = vld [vmem:[#allocation150_spill] sm:$0xff] }
 0x20f   : > { %6742 = vst [vmem:[#allocation156_spill] sm:$0xff] %v5020_v55  ;;  %v5035_v16 = vmul.f32 %v6695_v62, %v6725_v31  ;;  %v5039_v33 = vmul.f32 %v6698_v32, %v6725_v31  ;;  %v5043_v48 = vmul.f32 %v6700_v61, %v6725_v31  ;;  %v5047_v39 = vmul.f32 %v6703_v3, %v6725_v31 }
 0x210   : > { %6743 = vst [vmem:[#allocation157_spill] sm:$0xff] %v5023_v46  ;;  %v1348_v55 = vadd.f32 %v1344_v5, %v6749_v14  ;;  %v957_v62 = vperm.slane %v4971_v52, 0  ;;  %v958_v7 = vperm.slane %v4979_v56, 0  ;;  %v5058_v61 = vmul.f32 %v975_v2, %v6753_v58 }
 0x211   : > { %6744 = vst [vmem:[#allocation20_spill] sm:$0xff] %v5026_v22  ;;  %v6752_v22 = vld [vmem:[#allocation31_spill] sm:$0xff]  ;;  %v5064_v3 = vmul.f32 %v976_v15, %v6753_v58  ;;  %v996_v5 = vperm.slane %v4979_v56, 4  ;;  %2958 = vtanh.f32 %v4845_v9  ;;  %v1005_v2 = vperm.slane %v4971_v52, 5  ;;  %v6757_v58 = vld [vmem:[#allocation161_spill] sm:$0xff] }
 0x212   : > { %6745 = vst [vmem:[#allocation138_spill] sm:$0xff] %v5031_v17  ;;  %v5051_v17 = vadd.f32 %v2233_v13, %v6750_v27  ;;  %v967_v32 = vmul.f32 %v965_v24, %v6752_v22  ;;  %v968_v46 = vmul.f32 %v966_v54, %v6752_v22  ;;  %v6755_v13 = vld [vmem:[#allocation39_spill] sm:$0xff]  ;;  %v929_v24 = vpop.permute.xlu1 %928  ;;  %v1006_v54 = vperm.slane %v4979_v56, 5 }
 0x213   : > { %6746 = vst [vmem:[#allocation162_spill] sm:$0xff] %v5039_v33  ;;  %v5071_v14 = vmul.f32 %v995_v63, %v6755_v13  ;;  %v6756_v27 = vld [vmem:[#allocation147_spill] sm:$0xff]  ;;  %v1839_v63 = vadd.f32 %v1831_v43, %v4884_v35  ;;  %2960 = vtanh.f32 %v4848_v40  ;;  %v1840_v9 = vadd.f32 %v1832_v42, %v4887_v1 }
 0x214   : > { %6747 = vst [vmem:[#allocation131_spill] sm:$0xff] %v5043_v48  ;;  %v6754_v48 = vld [vmem:[#allocation64_spill] sm:$0xff]  ;;  %v5078_v15 = vadd.f32 %v929_v24, %v6756_v27  ;;  %v5090_v33 = vmul.f32 %v996_v5, %v6755_v13  ;;  %v1025_v27 = vperm.slane %v4971_v52, 7  ;;  %v6758_v35 = vld [vmem:[#allocation91_spill] sm:$0xff]  ;;  %v5106_v1 = vadd.f32 %v4850_v49, %v4923_v59  ;;  %v6764_v49 = vld [vmem:[#allocation170_spill] sm:$0xff] }
 0x215   : > { %6748 = vst [vmem:[#allocation24_spill] sm:$0xff] %v5047_v39  ;;  %v5061_v37 = vmul.f32 %v985_v34, %v6754_v48  ;;  %v5067_v31 = vmul.f32 %v986_v25, %v6754_v48  ;;  %v1015_v34 = vperm.slane %v4971_v52, 6  ;;  %v5081_v25 = vadd.f32 %v929_v24, %v6757_v58 }
 0x216   : > { %6751 = vst [vmem:[#allocation112_spill] sm:$0xff] %v5051_v17  ;;  %v1016_v48 = vperm.slane %v4979_v56, 6  ;;  %v2283_v39 = vadd.f32 %v2275_v38, %v4890_v51  ;;  %v2284_v17 = vadd.f32 %v2276_v50, %v4893_v45  ;;  %v1026_v58 = vperm.slane %v4979_v56, 7  ;;  %v6761_v45 = vld [vmem:[#allocation35_spill] sm:$0xff]  ;;  %v6763_v56 = vld [vmem:[#allocation169_spill] sm:$0xff]  ;;  %1502 = vperm.xlu1 %2945, %v1348_v55  }
 0x217   : > { %v5096_v24 = vadd.f32 %v4842_v53, %v4923_v59  ;;  %v5099_v43 = vmul.f32 %v1005_v2, %v6758_v35  ;;  %v5102_v40 = vmul.f32 %v1006_v54, %v6758_v35  ;;  %6759 = vst [vmem:[#allocation153_spill] sm:$0xff] %v5106_v1  ;;  %v5110_v51 = vadd.f32 %v4858_v20, %v4923_v59  ;;  %v5123_v50 = vpop.eup %2958  ;;  %v6765_v2 = vld [vmem:[#allocation171_spill] sm:$0xff]  ;;  %v6766_v54 = vld [vmem:[#allocation125_spill] sm:$0xff] }
 0x218   : > { %v5113_v52 = vmul.f32 %v1015_v34, %v6761_v45  ;;  %v5116_v53 = vmul.f32 %v1016_v48, %v6761_v45  ;;  %v5120_v42 = vadd.f32 %v4873_v12, %v4923_v59  ;;  %v1857_v38 = vadd.f32 %v6763_v56, %v1839_v63  ;;  %v6767_v48 = vld [vmem:[#allocation42_spill] sm:$0xff]  ;;  %v6768_v59 = vld [vmem:[#allocation152_spill] sm:$0xff] }
 0x219   : > { %6760 = vst [vmem:[#allocation113_spill] sm:$0xff] %v5110_v51  ;;  %v1858_v5 = vadd.f32 %v6764_v49, %v1840_v9  ;;  %v2301_v20 = vadd.f32 %v6765_v2, %v2283_v39  ;;  %v2302_v51 = vadd.f32 %v6766_v54, %v2284_v17  ;;  %v1395_v34 = vadd.f32 %v4987_v30, %v4896_v4  ;;  %v5138_v55 = vpop.eup %2960  ;;  %v6770_v39 = vld [vmem:[#allocation166_spill] sm:$0xff]  ;;  %v6771_v17 = vld [vmem:[#allocation167_spill] sm:$0xff]  ;;  %v6772_v2 = vld [vmem:[#allocation149_spill] sm:$0xff]  ;;  %v1498_v54 = vpop.permute.xlu0 %1497 }
 0x21a   : > { %6762 = vst [vmem:[#allocation154_spill] sm:$0xff] %v5120_v42  ;;  %2962 = vtanh.f32 %v4954_v23  ;;  %v5132_v1 = vmul.f32 %v1025_v27, %v6767_v48  ;;  %v5135_v12 = vmul.f32 %v1026_v58, %v6767_v48  ;;  %v1875_v63 = vadd.f32 %v6768_v59, %v1857_v38  ;;  %v5140_v9 = vpop.permute.xlu1 %954  ;;  %v6816_v42 = vld [vmem:[#allocation106_spill] sm:$0xff] }
 0x21b   : > { %6769 = vst [vmem:[#allocation103_spill] sm:$0xff] %v5140_v9  ;;  %v1876_v56 = vadd.f32 %v6770_v39, %v1858_v5  ;;  %v2319_v49 = vadd.f32 %v6771_v17, %v2301_v20  ;;  %v2320_v4 = vadd.f32 %v6772_v2, %v2302_v51  ;;  %v1413_v23 = vadd.f32 %v4820_v21, %v1395_v34  ;;  %v6775_v17 = vld [vmem:[#allocation126_spill] sm:$0xff] }
 0x21c   : > { %v959_v30 = vmul.f32 %v957_v62, %v5140_v9  ;;  %v960_v27 = vmul.f32 %v958_v7, %v5140_v9  ;;  %v2419_v58 = vperm.slane %v5123_v50, 0  ;;  %v2423_v38 = vperm.slane %v5123_v50, 1  ;;  %v6773_v7 = vld [vmem:[#allocation124_spill] sm:$0xff] }
 0x21d   : > { %2964 = vtanh.f32 %v4957_v10  ;;  %v1893_v59 = vadd.f32 %v4931_v6, %v1875_v63  ;;  %v1894_v5 = vadd.f32 %v4943_v19, %v1876_v56  ;;  %v2337_v20 = vadd.f32 %v4947_v29, %v2319_v49 }
 0x21e   : > { %v969_v51 = vadd.f32 %v967_v32, %v959_v30  ;;  %v970_v39 = vadd.f32 %v968_v46, %v960_v27  ;;  %v2420_v21 = vperm.slane %v5138_v55, 0  ;;  %v2424_v62 = vperm.slane %v5138_v55, 1  ;;  %1507 = vperm.xlu1 %2945, %v4994_v60  }
 0x21f   : > { %v5157_v34 = vadd.f32 %v1498_v54, %v6773_v7  ;;  %v5160_v2 = vadd.f32 %v1498_v54, %v6775_v17  ;;  %v1911_v10 = vadd.f32 %v4862_v18, %v1893_v59  ;;  %v1912_v6 = vadd.f32 %v4903_v0, %v1894_v5  ;;  %v6779_v5 = vld [vmem:[#allocation168_spill] sm:$0xff] }
 0x220   : > { %v5164_v63 = vpop.eup %2962  ;;  %v979_v19 = vadd.f32 %v5058_v61, %v969_v51  ;;  %v980_v29 = vadd.f32 %v5064_v3, %v970_v39  ;;  %v2429_v46 = vperm.slane %v5123_v50, 2  ;;  %v2430_v32 = vperm.slane %v5138_v55, 2 }
 0x221   : > { %6774 = vst [vmem:[#allocation158_spill] sm:$0xff] %v5157_v34  ;;  %v1929_v56 = vadd.f32 %v4998_v26, %v1911_v10  ;;  %v1930_v49 = vadd.f32 %v5009_v44, %v1912_v6  ;;  %v2338_v18 = vadd.f32 %v4951_v28, %v2320_v4  ;;  %v1396_v0 = vadd.f32 %v4991_v41, %v4899_v11  ;;  %v6784_v6 = vld [vmem:[#allocation118_spill] sm:$0xff] }
 0x222   : > { %6776 = vst [vmem:[#allocation29_spill] sm:$0xff] %v5160_v2  ;;  %v989_v30 = vadd.f32 %v5061_v37, %v979_v19  ;;  %v990_v61 = vadd.f32 %v5067_v31, %v980_v29  ;;  %v5179_v3 = vmul.f32 %v2423_v38, %v6752_v22  ;;  %v5182_v27 = vmul.f32 %v2424_v62, %v6752_v22  ;;  %v6785_v29 = vld [vmem:[#allocation112_spill] sm:$0xff] }
 0x223   : > { %v5184_v60 = vpop.eup %2964  ;;  %v1035_v26 = vperm.slane %v5164_v63, 0  ;;  %v5188_v44 = vadd.f32 %v1929_v56, %v5004_v8  ;;  %v5191_v28 = vadd.f32 %v1930_v49, %v5004_v8  ;;  %v2355_v11 = vadd.f32 %v4907_v47, %v2337_v20  ;;  %v6780_v20 = vld [vmem:[#allocation162_spill] sm:$0xff]  ;;  %v6787_v49 = vld [vmem:[#allocation88_spill] sm:$0xff] }
 0x224   : > { %v999_v37 = vadd.f32 %v5071_v14, %v989_v30  ;;  %v1000_v41 = vadd.f32 %v5090_v33, %v990_v61  ;;  %v1045_v31 = vperm.slane %v5164_v63, 1  ;;  %v1055_v4 = vperm.slane %v5164_v63, 2 }
 0x225   : > { %6777 = vst [vmem:[#allocation22_spill] sm:$0xff] %v5188_v44  ;;  %v2356_v38 = vadd.f32 %v4911_v57, %v2338_v18  ;;  %v2373_v54 = vadd.f32 %v5035_v16, %v2355_v11  ;;  %v1414_v59 = vadd.f32 %v4854_v36, %v1396_v0  ;;  %v1431_v51 = vadd.f32 %v6779_v5, %v1413_v23  ;;  %v6782_v57 = vld [vmem:[#allocation83_spill] sm:$0xff]  ;;  %v6783_v16 = vld [vmem:[#allocation60_spill] sm:$0xff]  ;;  %v6789_v11 = vld [vmem:[#allocation46_spill] sm:$0xff] }
 0x226   : > { %6778 = vst [vmem:[#allocation76_spill] sm:$0xff] %v5191_v28  ;;  %v1009_v39 = vadd.f32 %v5099_v43, %v999_v37  ;;  %v1010_v47 = vadd.f32 %v5102_v40, %v1000_v41  ;;  %v1036_v14 = vperm.slane %v5184_v60, 0  ;;  %v1065_v33 = vperm.slane %v5164_v63, 3  ;;  %2395 = vperm.xlu1 %2945, %v6785_v29   ;;  %v6788_v0 = vld [vmem:[#allocation164_spill] sm:$0xff]  ;;  %v6790_v41 = vld [vmem:[#allocation134_spill] sm:$0xff]  ;;  %v6792_v5 = vld [vmem:[#allocation131_spill] sm:$0xff] }
 0x227   : > { %v2374_v62 = vadd.f32 %v6780_v20, %v2356_v38  ;;  %v5208_v7 = vadd.f32 %v2373_v54, %v5004_v8  ;;  %v1432_v17 = vadd.f32 %v6782_v57, %v1414_v59  ;;  %v1449_v10 = vadd.f32 %v6783_v16, %v1431_v51  ;;  %v6791_v54 = vld [vmem:[#allocation10_spill] sm:$0xff]  ;;  %v6820_v28 = vld [vmem:[#allocation23_spill] sm:$0xff] }
 0x228   : > { %v1019_v36 = vadd.f32 %v5113_v52, %v1009_v39  ;;  %v1020_v23 = vadd.f32 %v5116_v53, %v1010_v47  ;;  %v1046_v43 = vperm.slane %v5184_v60, 1  ;;  %v1056_v40 = vperm.slane %v5184_v60, 2  ;;  %v6795_v16 = vld [vmem:[#allocation38_spill] sm:$0xff] }
 0x229   : > { %6781 = vst [vmem:[#allocation79_spill] sm:$0xff] %v5208_v7  ;;  %v1037_v19 = vmul.f32 %v1035_v26, %v6784_v6  ;;  %v5219_v56 = vadd.f32 %v2374_v62, %v5004_v8  ;;  %v1450_v18 = vadd.f32 %v6787_v49, %v1432_v17  ;;  %v1467_v30 = vadd.f32 %v6788_v0, %v1449_v10  ;;  %v6798_v0 = vld [vmem:[#allocation52_spill] sm:$0xff] }
 0x22a   : > { %v1029_v61 = vadd.f32 %v5132_v1, %v1019_v36  ;;  %v1030_v52 = vadd.f32 %v5135_v12, %v1020_v23  ;;  %v1038_v53 = vmul.f32 %v1036_v14, %v6784_v6  ;;  %v1047_v37 = vmul.f32 %v1045_v31, %v6789_v11  ;;  %v6793_v31 = vld [vmem:[#allocation24_spill] sm:$0xff]  ;;  %v6796_v23 = vld [vmem:[#allocation165_spill] sm:$0xff] }
 0x22b   : > { %6786 = vst [vmem:[#allocation55_spill] sm:$0xff] %v5219_v56  ;;  %v1057_v26 = vmul.f32 %v1055_v4, %v6790_v41  ;;  %v1066_v38 = vperm.slane %v5184_v60, 3  ;;  %v1468_v59 = vadd.f32 %v6791_v54, %v1450_v18  ;;  %v1485_v51 = vadd.f32 %v6792_v5, %v1467_v30  ;;  %v5241_v36 = vld [vmem:[%s3359_s25 + $0x18] sm:$0xff] }
 0x22c   : > { %v1039_v39 = vadd.f32 %v1037_v19, %v1029_v61  ;;  %v1040_v47 = vadd.f32 %v1038_v53, %v1030_v52  ;;  %v1048_v20 = vmul.f32 %v1046_v43, %v6789_v11  ;;  %v1058_v1 = vmul.f32 %v1056_v40, %v6790_v41 }
 0x22d   : > { %v1075_v12 = vperm.slane %v5164_v63, 4  ;;  %v1076_v14 = vperm.slane %v5184_v60, 4  ;;  %v1486_v62 = vadd.f32 %v6793_v31, %v1468_v59  ;;  %v5237_v4 = vadd.f32 %v1485_v51, %v5004_v8 }
 0x22e   : > { %v1049_v57 = vadd.f32 %v1047_v37, %v1039_v39  ;;  %v1050_v17 = vadd.f32 %v1048_v20, %v1040_v47  ;;  %v1067_v10 = vmul.f32 %v1065_v33, %v6795_v16  ;;  %v1790_v43 = vmul.f32 %v5241_v36, %v6796_v23  ;;  %v1785_v37 = vpop.xlane.xlu2 %1784 }
 0x22f   : > { %6794 = vst [vmem:[#allocation145_spill] sm:$0xff] %v5237_v4  ;;  %2966 = vtanh.f32 %v5078_v15  ;;  %v1068_v40 = vmul.f32 %v1066_v38, %v6795_v16  ;;  %v1085_v19 = vperm.slane %v5164_v63, 5  ;;  %v5249_v29 = vadd.f32 %v1486_v62, %v5004_v8  ;;  %v6799_v15 = vld [vmem:[#allocation36_spill] sm:$0xff] }
 0x230   : > { %2968 = vtanh.f32 %v5081_v25  ;;  %v1059_v49 = vadd.f32 %v1057_v26, %v1049_v57  ;;  %v1060_v18 = vadd.f32 %v1058_v1, %v1050_v17  ;;  %v1086_v33 = vperm.slane %v5184_v60, 5  ;;  %v6800_v26 = vld [vmem:[#allocation17_spill] sm:$0xff]  ;;  %v6807_v4 = vld [vmem:[#allocation20_spill] sm:$0xff] }
 0x231   : > { %6797 = vst [vmem:[#allocation159_spill] sm:$0xff] %v5249_v29  ;;  %v1077_v30 = vmul.f32 %v1075_v12, %v6798_v0  ;;  %v1078_v61 = vmul.f32 %v1076_v14, %v6798_v0  ;;  %v1095_v52 = vperm.slane %v5164_v63, 6  ;;  %v2431_v53 = vmul.f32 %v2429_v46, %v6799_v15  ;;  %v6801_v14 = vld [vmem:[#allocation82_spill] sm:$0xff] }
 0x232   : > { %v1069_v38 = vadd.f32 %v1067_v10, %v1059_v49  ;;  %v1070_v8 = vadd.f32 %v1068_v40, %v1060_v18  ;;  %v1096_v54 = vperm.slane %v5184_v60, 6  ;;  %v1794_v25 = vadd.f32 %v1790_v43, %v1785_v37 }
 0x233   : > { %v1087_v59 = vmul.f32 %v1085_v19, %v6800_v26  ;;  %v2435_v5 = vperm.slane %v5123_v50, 3  ;;  %v2436_v51 = vperm.slane %v5138_v55, 3  ;;  %v2441_v39 = vperm.slane %v5123_v50, 4  ;;  %v6802_v19 = vld [vmem:[#allocation64_spill] sm:$0xff] }
 0x234   : > { %v1079_v47 = vadd.f32 %v1077_v30, %v1069_v38  ;;  %v1080_v20 = vadd.f32 %v1078_v61, %v1070_v8  ;;  %v1088_v1 = vmul.f32 %v1086_v33, %v6800_v26  ;;  %v2421_v46 = vmul.f32 %v2419_v58, %v5140_v9  ;;  %1956 = vperm.xlu2 %2946, %v1794_v25   ;;  %v2229_v34 = vpop.xlane.xlu0 %2228 }
 0x235   : > { %v5268_v12 = vpop.eup %2966  ;;  %v1097_v31 = vmul.f32 %v1095_v52, %v6801_v14  ;;  %v2432_v62 = vmul.f32 %v2430_v32, %v6799_v15  ;;  %v2442_v57 = vperm.slane %v5138_v55, 4  ;;  %v2447_v17 = vperm.slane %v5123_v50, 5 }
 0x236   : > { %v5276_v10 = vpop.eup %2968  ;;  %v1089_v23 = vadd.f32 %v1087_v59, %v1079_v47  ;;  %v1090_v43 = vadd.f32 %v1088_v1, %v1080_v20  ;;  %v1098_v40 = vmul.f32 %v1096_v54, %v6801_v14  ;;  %v2422_v58 = vmul.f32 %v2420_v21, %v5140_v9  ;;  %v6803_v59 = vld [vmem:[#allocation49_spill] sm:$0xff] }
 0x237   : > { %v2437_v49 = vmul.f32 %v2435_v5, %v6802_v19  ;;  %v2438_v18 = vmul.f32 %v2436_v51, %v6802_v19  ;;  %v1105_v32 = vperm.slane %v5164_v63, 7  ;;  %v1106_v33 = vperm.slane %v5184_v60, 7 }
 0x238   : > { %v1099_v30 = vadd.f32 %v1097_v31, %v1089_v23  ;;  %v1100_v61 = vadd.f32 %v1098_v40, %v1090_v43  ;;  %v2427_v52 = vadd.f32 %v5179_v3, %v2421_v46  ;;  %v2443_v37 = vmul.f32 %v2441_v39, %v6755_v13  ;;  %v5305_v31 = vld [vmem:[%s3306_s14] sm:$0xff]  ;;  %s6835_s14 = sshll.u32 %s6881_s22, 3 }
 0x239   : > { %v2444_v38 = vmul.f32 %v2442_v57, %v6755_v13  ;;  %v1115_v8 = vperm.slane %v5268_v12, 0  ;;  %v1116_v21 = vperm.slane %v5276_v10, 0  ;;  %v2428_v54 = vadd.f32 %v5182_v27, %v2422_v58  ;;  %v6804_v23 = vld [vmem:[#allocation41_spill] sm:$0xff]  ;;  %s530_s29 = scalar_lea.vmem %s6016_s9, %s6835_s14  ;;  %s2796_s14 = sshll.u32 %s6881_s22, 2 }
 0x23a   : > { %v2448_v25 = vperm.slane %v5138_v55, 5  ;;  %v5294_v63 = vmul.f32 %v2447_v17, %v6758_v35  ;;  %v1125_v60 = vperm.slane %v5268_v12, 1  ;;  %v1107_v5 = vmul.f32 %v1105_v32, %v6803_v59  ;;  %v6805_v58 = vld [vmem:[#allocation157_spill] sm:$0xff]  ;;  %v6806_v32 = vld [vmem:[#allocation111_spill] sm:$0xff] }
 0x23b   : > { %v1108_v51 = vmul.f32 %v1106_v33, %v6803_v59  ;;  %v1126_v39 = vperm.slane %v5276_v10, 1  ;;  %v2433_v47 = vadd.f32 %v2431_v53, %v2427_v52  ;;  %v3125_v1 = vmov 30  }
 0x23c   : > { %2948 = vset.pattern.permute.xlu2 %v3125_v1  ;;  %v1135_v27 = vperm.slane %v5268_v12, 2  ;;  %v1136_v46 = vperm.slane %v5276_v10, 2  ;;  %v1109_v57 = vadd.f32 %v1107_v5, %v1099_v30  ;;  %v1117_v43 = vmul.f32 %v1115_v8, %v6804_v23 }
 0x23d   : > { %1252 = vperm.xlu2 %2948, %v5305_v31   ;;  %v1110_v17 = vadd.f32 %v1108_v51, %v1100_v61  ;;  %v1118_v40 = vmul.f32 %v1116_v21, %v6804_v23  ;;  %2970 = vtanh.f32 %v6805_v58  ;;  %v2434_v53 = vadd.f32 %v2432_v62, %v2428_v54  ;;  %v6808_v61 = vld [vmem:[#allocation47_spill] sm:$0xff] }
 0x23e   : > { %v1127_v33 = vmul.f32 %v1125_v60, %v6806_v32  ;;  %v1145_v52 = vperm.slane %v5268_v12, 3  ;;  %v1119_v1 = vadd.f32 %v1117_v43, %v1109_v57  ;;  %v1128_v3 = vmul.f32 %v1126_v39, %v6806_v32  ;;  %v6809_v57 = vld [vmem:[#allocation133_spill] sm:$0xff] }
 0x23f   : > { %v1120_v20 = vadd.f32 %v1118_v40, %v1110_v17  ;;  %v1146_v29 = vperm.slane %v5276_v10, 3  ;;  %2972 = vtanh.f32 %v6807_v4  ;;  %v2439_v30 = vadd.f32 %v2437_v49, %v2433_v47 }
 0x240   : > { %v1137_v8 = vmul.f32 %v1135_v27, %v6808_v61  ;;  %v1138_v21 = vmul.f32 %v1136_v46, %v6808_v61  ;;  %v1129_v5 = vadd.f32 %v1127_v33, %v1119_v1  ;;  %v1155_v62 = vperm.slane %v5268_v12, 4 }
 0x241   : > { %v1130_v51 = vadd.f32 %v1128_v3, %v1120_v20  ;;  %v1156_v54 = vperm.slane %v5276_v10, 4  ;;  %v2440_v60 = vadd.f32 %v2438_v18, %v2434_v53  ;;  %v1147_v17 = vmul.f32 %v1145_v52, %v6809_v57  ;;  %v6811_v18 = vld [vmem:[#allocation130_spill] sm:$0xff]  ;;  %v1947_v53 = vpop.permute.xlu2 %1946 }
 0x242   : > { %v1165_v39 = vperm.slane %v5268_v12, 5  ;;  %v1166_v43 = vperm.slane %v5276_v10, 5  ;;  %v1139_v40 = vadd.f32 %v1137_v8, %v1129_v5  ;;  %v1148_v49 = vmul.f32 %v1146_v29, %v6809_v57  ;;  %v6813_v8 = vld [vmem:[#allocation14_spill] sm:$0xff] }
 0x243   : > { %v1140_v4 = vadd.f32 %v1138_v21, %v1130_v51  ;;  %v1175_v47 = vperm.slane %v5268_v12, 6  ;;  %v5325_v27 = vpop.eup %2970  ;;  %v2445_v3 = vadd.f32 %v2443_v37, %v2439_v30  ;;  %v2450_v20 = vmul.f32 %v2448_v25, %v6758_v35  ;;  %v6815_v37 = vld [vmem:[#allocation45_spill] sm:$0xff] }
 0x244   : > { %6810 = vst [vmem:[#allocation135_spill] sm:$0xff] %v5325_v27  ;;  %v2459_v46 = vperm.slane %v5123_v50, 7  ;;  %v2234_v58 = vmul.f32 %v5241_v36, %v6811_v18  ;;  %v6812_v33 = vmov 0   ;;  %v1149_v52 = vadd.f32 %v1147_v17, %v1139_v40  ;;  %v6817_v40 = vld [vmem:[#allocation156_spill] sm:$0xff] }
 0x245   : > { %2950 = vset.pattern.permute.xlu2 %v6812_v33  ;;  %v1150_v1 = vadd.f32 %v1148_v49, %v1140_v4  ;;  %v1157_v21 = vmul.f32 %v1155_v62, %v6813_v8  ;;  %v1158_v29 = vmul.f32 %v1156_v54, %v6813_v8  ;;  %v5334_v5 = vpop.eup %2972  ;;  %v2446_v51 = vadd.f32 %v2444_v38, %v2440_v60  ;;  %v6818_v62 = vld [vmem:[#allocation138_spill] sm:$0xff]  ;;  %v1942_v54 = vpop.permute.xlu1 %1941 }
 0x246   : > { %6814 = vst [vmem:[#allocation32_spill] sm:$0xff] %v5334_v5  ;;  %v1167_v30 = vmul.f32 %v1165_v39, %v6815_v37  ;;  %v1168_v25 = vmul.f32 %v1166_v43, %v6815_v37  ;;  %v1176_v56 = vperm.slane %v5276_v10, 6  ;;  %v1177_v2 = vmul.f32 %v1175_v47, %v6816_v42  ;;  %v6819_v39 = vld [vmem:[#allocation18_spill] sm:$0xff] }
 0x247   : > { %v1159_v7 = vadd.f32 %v1157_v21, %v1149_v52  ;;  %v1160_v18 = vadd.f32 %v1158_v29, %v1150_v1  ;;  %v1185_v17 = vperm.slane %v5268_v12, 7  ;;  %v1961_v4 = vadd.f32 %v1947_v53, %v6817_v40 }
 0x248   : > { %v1962_v49 = vadd.f32 %v1947_v53, %v6818_v62  ;;  %v1186_v38 = vperm.slane %v5276_v10, 7  ;;  %v1195_v60 = vperm.slane %v5325_v27, 0  ;;  %v1959_v43 = vadd.f32 %v1942_v54, %v6819_v39  ;;  %v6822_v39 = vld [vmem:[#allocation58_spill] sm:$0xff] }
 0x249   : > { %v1960_v44 = vadd.f32 %v1942_v54, %v6820_v28  ;;  %v2238_v52 = vadd.f32 %v2234_v58, %v2229_v34  ;;  %v1169_v1 = vadd.f32 %v1167_v30, %v1159_v7  ;;  %v1170_v21 = vadd.f32 %v1168_v25, %v1160_v18  ;;  %v6823_v30 = vld [vmem:[#allocation73_spill] sm:$0xff] }
 0x24a   : > { %v1178_v47 = vmul.f32 %v1176_v56, %v6816_v42  ;;  %v1196_v12 = vperm.slane %v5334_v5, 0  ;;  %v1205_v29 = vperm.slane %v5325_v27, 1  ;;  %v2451_v53 = vadd.f32 %v5294_v63, %v2445_v3 }
 0x24b   : > { %v6821_v10 = vperm.slane %v5123_v50, 6  ;;  %2400 = vperm.xlu1 %2945, %v2238_v52   ;;  %v1179_v62 = vadd.f32 %v1177_v2, %v1169_v1  ;;  %v1187_v33 = vmul.f32 %v1185_v17, %v6822_v39  ;;  %2974 = vtanh.f32 %v1961_v4  ;;  %v6824_v50 = vld [vmem:[#allocation155_spill] sm:$0xff]  ;;  %v1952_v1 = vpop.permute.xlu2 %1951 }
 0x24c   : > { %v1180_v34 = vadd.f32 %v1178_v47, %v1170_v21  ;;  %v1188_v28 = vmul.f32 %v1186_v38, %v6822_v39  ;;  %v1206_v7 = vperm.slane %v5334_v5, 1  ;;  %v2452_v56 = vadd.f32 %v2450_v20, %v2446_v51 }
 0x24d   : > { %v2455_v40 = vmul.f32 %v6821_v10, %v6761_v45  ;;  %2976 = vtanh.f32 %v1962_v49  ;;  %v1189_v58 = vadd.f32 %v1187_v33, %v1179_v62  ;;  %v1197_v25 = vmul.f32 %v1195_v60, %v6823_v30  ;;  %v6826_v62 = vld [vmem:[#allocation50_spill] sm:$0xff] }
 0x24e   : > { %v1190_v63 = vadd.f32 %v1188_v28, %v1180_v34  ;;  %v1198_v3 = vmul.f32 %v1196_v12, %v6823_v30  ;;  %v1207_v18 = vmul.f32 %v1205_v29, %v6824_v50  ;;  %v1215_v2 = vperm.slane %v5325_v27, 2 }
 0x24f   : > { %v1199_v54 = vadd.f32 %v1197_v25, %v1189_v58  ;;  %v1216_v17 = vperm.slane %v5334_v5, 2  ;;  %v1225_v4 = vperm.slane %v5325_v27, 3  ;;  %v1226_v38 = vperm.slane %v5334_v5, 3  ;;  %v6827_v25 = vld [vmem:[#allocation114_spill] sm:$0xff] }
 0x250   : > { %v6825_v20 = vperm.slane %v5138_v55, 6  ;;  %v1200_v51 = vadd.f32 %v1198_v3, %v1190_v63  ;;  %v1208_v49 = vmul.f32 %v1206_v7, %v6824_v50  ;;  %v2460_v60 = vperm.slane %v5138_v55, 7  ;;  %v6828_v63 = vld [vmem:[#allocation148_spill] sm:$0xff] }
 0x251   : > { %v2461_v52 = vmul.f32 %v2459_v46, %v6767_v48  ;;  %v1209_v21 = vadd.f32 %v1207_v18, %v1199_v54  ;;  %v5370_v47 = vpop.eup %2974  ;;  %v2457_v12 = vadd.f32 %v2455_v40, %v2451_v53  ;;  %v1217_v34 = vmul.f32 %v1215_v2, %v6826_v62 }
 0x252   : > { %v2456_v33 = vmul.f32 %v6825_v20, %v6761_v45  ;;  %v1210_v10 = vadd.f32 %v1208_v49, %v1200_v51  ;;  %2978 = vtanh.f32 %v1959_v43  ;;  %v3126_v58 = vmov 31  }
 0x253   : > { %v5373_v28 = vpop.eup %2976  ;;  %2949 = vset.pattern.permute.xlu1 %v3126_v58  ;;  %v1218_v7 = vmul.f32 %v1216_v17, %v6826_v62  ;;  %v1227_v55 = vmul.f32 %v1225_v4, %v6827_v25  ;;  %v1228_v46 = vmul.f32 %v1226_v38, %v6827_v25  ;;  %v1963_v3 = vadd.f32 %v1952_v1, %v6828_v63 }
 0x254   : > { %v2458_v29 = vadd.f32 %v2456_v33, %v2452_v56  ;;  %2980 = vtanh.f32 %v1960_v44  ;;  %1262 = vperm.xlu1 %2949, %v5305_v31   ;;  %v1235_v53 = vperm.slane %v5325_v27, 4  ;;  %v1236_v40 = vperm.slane %v5334_v5, 4  ;;  %v6829_v56 = vld [vmem:[#allocation16_spill] sm:$0xff] }
 0x255   : > { %v1964_v18 = vadd.f32 %v1952_v1, %v6829_v56  ;;  %v1219_v43 = vadd.f32 %v1217_v34, %v1209_v21  ;;  %v1220_v2 = vadd.f32 %v1218_v7, %v1210_v10  ;;  %v2021_v54 = vperm.slane %v5370_v47, 0  ;;  %v6830_v21 = vld [vmem:[#allocation115_spill] sm:$0xff] }
 0x256   : > { %v2462_v17 = vmul.f32 %v2460_v60, %v6767_v48  ;;  %v2022_v4 = vperm.slane %v5373_v28, 0  ;;  %v2027_v38 = vperm.slane %v5370_v47, 1  ;;  %v2028_v44 = vperm.slane %v5373_v28, 1  ;;  %v6831_v34 = vld [vmem:[#allocation123_spill] sm:$0xff] }
 0x257   : > { %v1229_v20 = vadd.f32 %v1227_v55, %v1219_v43  ;;  %v1230_v33 = vadd.f32 %v1228_v46, %v1220_v2  ;;  %v2033_v51 = vperm.slane %v5370_v47, 2  ;;  %v2034_v49 = vperm.slane %v5373_v28, 2 }
 0x258   : > { %v5390_v58 = vadd.f32 %v2461_v52, %v2457_v12  ;;  %v5392_v1 = vadd.f32 %v2462_v17, %v2458_v29  ;;  %2982 = vtanh.f32 %v1963_v3  ;;  %v5396_v60 = vmul.f32 %v5241_v36, %v6830_v21  ;;  %v5398_v10 = vpop.eup %2978 }
 0x259   : > { %2984 = vtanh.f32 %v1964_v18  ;;  %v1237_v7 = vmul.f32 %v1235_v53, %v6831_v34  ;;  %v1238_v55 = vmul.f32 %v1236_v40, %v6831_v34  ;;  %v5403_v46 = vmul.f32 %v2021_v54, %v6784_v6 }
 0x25a   : > { %v5405_v63 = vpop.eup %2980  ;;  %v5408_v52 = vmul.f32 %v2022_v4, %v6784_v6  ;;  %v5411_v12 = vmul.f32 %v2027_v38, %v6789_v11  ;;  %v5414_v36 = vmul.f32 %v2028_v44, %v6789_v11  ;;  %v2039_v29 = vperm.slane %v5370_v47, 3 }
 0x25b   : > { %v5418_v3 = vmul.f32 %v2033_v51, %v6790_v41  ;;  %v5421_v53 = vmul.f32 %v2034_v49, %v6790_v41  ;;  %v2040_v40 = vperm.slane %v5373_v28, 3  ;;  %v2045_v56 = vperm.slane %v5370_v47, 4  ;;  %v2391_v49 = vpop.permute.xlu0 %2390 }
 0x25c   : > { %v5425_v18 = vadd.f32 %v1237_v7, %v1229_v20  ;;  %v5427_v43 = vadd.f32 %v1238_v55, %v1230_v33  ;;  %v2046_v2 = vperm.slane %v5373_v28, 4  ;;  %v2051_v54 = vperm.slane %v5370_v47, 5 }
 0x25d   : > { %v1975_v17 = vperm.slane %v5398_v10, 0  ;;  %v1976_v4 = vperm.slane %v5405_v63, 0  ;;  %v1979_v38 = vperm.slane %v5398_v10, 1  ;;  %v1980_v44 = vperm.slane %v5405_v63, 1 }
 0x25e   : > { %6832 = vst [vmem:[#allocation98_spill] sm:$0xff] %v5425_v18  ;;  %v5435_v51 = vpop.eup %2982  ;;  %v1985_v20 = vperm.slane %v5398_v10, 2  ;;  %v1986_v33 = vperm.slane %v5405_v63, 2  ;;  %v5440_v21 = vmul.f32 %v2039_v29, %v6795_v16  ;;  %v2052_v7 = vperm.slane %v5373_v28, 5 }
 0x25f   : > { %6833 = vst [vmem:[#allocation99_spill] sm:$0xff] %v5427_v43  ;;  %v5443_v55 = vpop.eup %2984  ;;  %v1977_v43 = vmul.f32 %v1975_v17, %v5140_v9  ;;  %v1978_v18 = vmul.f32 %v1976_v4, %v5140_v9  ;;  %v1981_v5 = vmul.f32 %v1979_v38, %v6752_v22  ;;  %v1991_v27 = vperm.slane %v5398_v10, 3  ;;  %v6834_v38 = vld [vmem:[#allocation153_spill] sm:$0xff] }
 0x260   : > { %v1982_v34 = vmul.f32 %v1980_v44, %v6752_v22  ;;  %v1992_v25 = vperm.slane %v5405_v63, 3  ;;  %v5452_v62 = vmul.f32 %v2040_v40, %v6795_v16  ;;  %v5455_v29 = vmul.f32 %v2045_v56, %v6798_v0 }
 0x261   : > { %v2405_v50 = vadd.f32 %v2391_v49, %v5096_v24  ;;  %v1983_v30 = vadd.f32 %v1981_v5, %v1977_v43  ;;  %v1987_v17 = vmul.f32 %v1985_v20, %v6799_v15  ;;  %v1997_v4 = vperm.slane %v5398_v10, 4 }
 0x262   : > { %v2406_v9 = vadd.f32 %v2391_v49, %v6834_v38  ;;  %v1984_v39 = vadd.f32 %v1982_v34, %v1978_v18  ;;  %v1988_v44 = vmul.f32 %v1986_v33, %v6799_v15  ;;  %v1998_v22 = vperm.slane %v5405_v63, 4 }
 0x263   : > { %v1989_v42 = vadd.f32 %v1987_v17, %v1983_v30  ;;  %v1993_v40 = vmul.f32 %v1991_v27, %v6802_v19  ;;  %v2003_v56 = vperm.slane %v5398_v10, 5  ;;  %v2057_v37 = vperm.slane %v5370_v47, 6 }
 0x264   : > { %v1990_v24 = vadd.f32 %v1988_v44, %v1984_v39  ;;  %v1994_v5 = vmul.f32 %v1992_v25, %v6802_v19  ;;  %v2004_v43 = vperm.slane %v5405_v63, 5  ;;  %v5469_v20 = vmul.f32 %v2046_v2, %v6798_v0 }
 0x265   : > { %2986 = vtanh.f32 %v2405_v50  ;;  %v1995_v34 = vadd.f32 %v1993_v40, %v1989_v42  ;;  %v1999_v18 = vmul.f32 %v1997_v4, %v6755_v13  ;;  %v2009_v30 = vperm.slane %v5398_v10, 6 }
 0x266   : > { %2988 = vtanh.f32 %v2406_v9  ;;  %v1996_v27 = vadd.f32 %v1994_v5, %v1990_v24  ;;  %v2000_v49 = vmul.f32 %v1998_v22, %v6755_v13  ;;  %v2010_v33 = vperm.slane %v5405_v63, 6 }
 0x267   : > { %v2001_v39 = vadd.f32 %v1999_v18, %v1995_v34  ;;  %v2005_v25 = vmul.f32 %v2003_v56, %v6758_v35  ;;  %v2015_v17 = vperm.slane %v5398_v10, 7  ;;  %v2058_v2 = vperm.slane %v5373_v28, 6 }
 0x268   : > { %v2002_v38 = vadd.f32 %v2000_v49, %v1996_v27  ;;  %v2006_v42 = vmul.f32 %v2004_v43, %v6758_v35  ;;  %v2016_v50 = vperm.slane %v5405_v63, 7  ;;  %v2063_v4 = vperm.slane %v5370_v47, 7 }
 0x269   : > { %v2007_v9 = vadd.f32 %v2005_v25, %v2001_v39  ;;  %v2011_v44 = vmul.f32 %v2009_v30, %v6761_v45  ;;  %v2064_v22 = vperm.slane %v5373_v28, 7  ;;  %v2069_v40 = vperm.slane %v5435_v51, 0 }
 0x26a   : > { %v2008_v24 = vadd.f32 %v2006_v42, %v2002_v38  ;;  %v2012_v56 = vmul.f32 %v2010_v33, %v6761_v45  ;;  %v2053_v10 = vmul.f32 %v2051_v54, %v6800_v26  ;;  %v2070_v5 = vperm.slane %v5443_v55, 0 }
 0x26b   : > { %v5487_v34 = vpop.eup %2986  ;;  %v2013_v43 = vadd.f32 %v2011_v44, %v2007_v9  ;;  %v2017_v63 = vmul.f32 %v2015_v17, %v6767_v48  ;;  %v2054_v47 = vmul.f32 %v2052_v7, %v6800_v26  ;;  %v5492_v18 = vmul.f32 %v2057_v37, %v6801_v14 }
 0x26c   : > { %v5494_v28 = vpop.eup %2988  ;;  %v2014_v30 = vadd.f32 %v2012_v56, %v2008_v24  ;;  %v2018_v27 = vmul.f32 %v2016_v50, %v6767_v48  ;;  %v5498_v49 = vmul.f32 %v2058_v2, %v6801_v14  ;;  %v5501_v33 = vmul.f32 %v2063_v4, %v6803_v59 }
 0x26d   : > { %v2019_v54 = vadd.f32 %v2017_v63, %v2013_v43  ;;  %v5504_v39 = vmul.f32 %v2064_v22, %v6803_v59  ;;  %v5507_v7 = vmul.f32 %v2069_v40, %v6804_v23  ;;  %v5510_v25 = vmul.f32 %v2070_v5, %v6804_v23 }
 0x26e   : > { %v2020_v37 = vadd.f32 %v2018_v27, %v2014_v30  ;;  %v2075_v17 = vperm.slane %v5435_v51, 1  ;;  %v2076_v38 = vperm.slane %v5443_v55, 1  ;;  %v2465_v42 = vperm.slane %v5487_v34, 0 }
 0x26f   : > { %v2025_v2 = vadd.f32 %v5403_v46, %v2019_v54  ;;  %v2466_v50 = vperm.slane %v5494_v28, 0  ;;  %v2471_v4 = vperm.slane %v5487_v34, 1  ;;  %v2081_v44 = vperm.slane %v5435_v51, 2 }
 0x270   : > { %v2026_v9 = vadd.f32 %v5408_v52, %v2020_v37  ;;  %v2472_v22 = vperm.slane %v5494_v28, 1  ;;  %v2477_v40 = vperm.slane %v5487_v34, 2  ;;  %v2467_v56 = vmul.f32 %v2465_v42, %v6784_v6  ;;  %v1341_v27 = vpop.xlane.xlu1 %1340 }
 0x271   : > { %v2031_v24 = vadd.f32 %v5411_v12, %v2025_v2  ;;  %v2468_v46 = vmul.f32 %v2466_v50, %v6784_v6  ;;  %v2478_v5 = vperm.slane %v5494_v28, 2  ;;  %v2473_v63 = vmul.f32 %v2471_v4, %v6789_v11 }
 0x272   : > { %v2032_v43 = vadd.f32 %v5414_v36, %v2026_v9  ;;  %v2474_v52 = vmul.f32 %v2472_v22, %v6789_v11  ;;  %v2479_v30 = vmul.f32 %v2477_v40, %v6790_v41  ;;  %v2469_v37 = vadd.f32 %v2467_v56, %v5390_v58 }
 0x273   : > { %v2037_v54 = vadd.f32 %v5418_v3, %v2031_v24  ;;  %v2470_v12 = vadd.f32 %v2468_v46, %v5392_v1  ;;  %v2483_v2 = vperm.slane %v5487_v34, 3  ;;  %v1350_v42 = vadd.f32 %v5396_v60, %v1341_v27 }
 0x274   : > { %v2038_v50 = vadd.f32 %v5421_v53, %v2032_v43  ;;  %v2484_v36 = vperm.slane %v5494_v28, 3  ;;  %v2489_v4 = vperm.slane %v5487_v34, 4  ;;  %v2475_v22 = vadd.f32 %v2473_v63, %v2469_v37 }
 0x275   : > { %v2043_v9 = vadd.f32 %v5440_v21, %v2037_v54  ;;  %v2476_v40 = vadd.f32 %v2474_v52, %v2470_v12  ;;  %v2480_v3 = vmul.f32 %v2478_v5, %v6790_v41  ;;  %1512 = vperm.xlu0 %2944, %v1350_v42   ;;  %v2485_v1 = vmul.f32 %v2483_v2, %v6795_v16 }
 0x276   : > { %v2044_v58 = vadd.f32 %v5452_v62, %v2038_v50  ;;  %v2486_v24 = vmul.f32 %v2484_v36, %v6795_v16  ;;  %v2490_v60 = vperm.slane %v5494_v28, 4  ;;  %v2481_v56 = vadd.f32 %v2479_v30, %v2475_v22 }
 0x277   : > { %v2049_v53 = vadd.f32 %v5455_v29, %v2043_v9  ;;  %v2482_v46 = vadd.f32 %v2480_v3, %v2476_v40  ;;  %v2495_v43 = vperm.slane %v5487_v34, 5  ;;  %v2491_v5 = vmul.f32 %v2489_v4, %v6798_v0 }
 0x278   : > { %v2050_v21 = vadd.f32 %v5469_v20, %v2044_v58  ;;  %v2496_v63 = vperm.slane %v5494_v28, 5  ;;  %v2501_v62 = vperm.slane %v5487_v34, 6  ;;  %v2487_v27 = vadd.f32 %v2485_v1, %v2481_v56 }
 0x279   : > { %v2055_v52 = vadd.f32 %v2053_v10, %v2049_v53  ;;  %v2488_v54 = vadd.f32 %v2486_v24, %v2482_v46  ;;  %v2492_v37 = vmul.f32 %v2490_v60, %v6798_v0  ;;  %v2497_v29 = vmul.f32 %v2495_v43, %v6800_v26 }
 0x27a   : > { %v2056_v12 = vadd.f32 %v2054_v47, %v2050_v21  ;;  %v2498_v30 = vmul.f32 %v2496_v63, %v6800_v26  ;;  %v2502_v2 = vperm.slane %v5494_v28, 6  ;;  %v2493_v42 = vadd.f32 %v2491_v5, %v2487_v27 }
 0x27b   : > { %v2061_v20 = vadd.f32 %v5492_v18, %v2055_v52  ;;  %v2494_v50 = vadd.f32 %v2492_v37, %v2488_v54  ;;  %v2507_v36 = vperm.slane %v5487_v34, 7  ;;  %v2082_v47 = vperm.slane %v5443_v55, 2 }
 0x27c   : > { %v2062_v10 = vadd.f32 %v5498_v49, %v2056_v12  ;;  %v2503_v4 = vmul.f32 %v2501_v62, %v6801_v14  ;;  %v2508_v9 = vperm.slane %v5494_v28, 7  ;;  %v2499_v18 = vadd.f32 %v2497_v29, %v2493_v42  ;;  %v554_v28 = vld [vmem:[%s530_s29] sm:$0xff]  ;;  %s544_s29 = scalar_lea.vmem %s6019_s12, %s2796_s14 }
 0x27d   : > { %v2067_v22 = vadd.f32 %v5501_v33, %v2061_v20  ;;  %v2500_v40 = vadd.f32 %v2498_v30, %v2494_v50  ;;  %v2504_v3 = vmul.f32 %v2502_v2, %v6801_v14  ;;  %v3127_v34 = vmov 29   ;;  %1273 = vperm.xlu2 %2950, %v554_v28   ;;  %v6839_v28 = vld [vmem:[#allocation58_spill] sm:$0xff] }
 0x27e   : > { %2947 = vset.pattern.permute.xlu0 %v3127_v34  ;;  %v2068_v58 = vadd.f32 %v5504_v39, %v2062_v10  ;;  %v2077_v49 = vmul.f32 %v2075_v17, %v6806_v32  ;;  %v2087_v1 = vperm.slane %v5435_v51, 3  ;;  %v2509_v24 = vmul.f32 %v2507_v36, %v6803_v59  ;;  %v6836_v36 = vld [vmem:[#allocation45_spill] sm:$0xff] }
 0x27f   : > { %1242 = vperm.xlu0 %2947, %v5305_v31   ;;  %v2073_v33 = vadd.f32 %v5507_v7, %v2067_v22  ;;  %v2505_v60 = vadd.f32 %v2503_v4, %v2499_v18  ;;  %v2506_v53 = vadd.f32 %v2504_v3, %v2500_v40  ;;  %v2510_v56 = vmul.f32 %v2508_v9, %v6803_v59  ;;  %v6838_v3 = vld [vmem:[#allocation106_spill] sm:$0xff] }
 0x280   : > { %v2074_v39 = vadd.f32 %v5510_v25, %v2068_v58  ;;  %v2078_v17 = vmul.f32 %v2076_v38, %v6806_v32  ;;  %v2088_v46 = vperm.slane %v5443_v55, 3  ;;  %v2093_v43 = vperm.slane %v5435_v51, 4 }
 0x281   : > { %v2079_v21 = vadd.f32 %v2077_v49, %v2073_v33  ;;  %v2083_v31 = vmul.f32 %v2081_v44, %v6808_v61  ;;  %v5585_v7 = vadd.f32 %v2509_v24, %v2505_v60  ;;  %v5587_v5 = vadd.f32 %v2510_v56, %v2506_v53 }
 0x282   : > { %v2080_v63 = vadd.f32 %v2078_v17, %v2074_v39  ;;  %v2084_v25 = vmul.f32 %v2082_v47, %v6808_v61  ;;  %v2094_v62 = vperm.slane %v5443_v55, 4  ;;  %v2089_v38 = vmul.f32 %v2087_v1, %v6809_v57 }
 0x283   : > { %v2085_v52 = vadd.f32 %v2083_v31, %v2079_v21  ;;  %v2099_v27 = vperm.slane %v5435_v51, 5  ;;  %v2090_v37 = vmul.f32 %v2088_v46, %v6809_v57  ;;  %v2100_v12 = vperm.slane %v5443_v55, 5 }
 0x284   : > { %v2086_v54 = vadd.f32 %v2084_v25, %v2080_v63  ;;  %v2095_v29 = vmul.f32 %v2093_v43, %v6813_v8  ;;  %v2105_v30 = vperm.slane %v5435_v51, 6  ;;  %v2096_v20 = vmul.f32 %v2094_v62, %v6813_v8  ;;  %v6841_v43 = vld [vmem:[#allocation76_spill] sm:$0xff]  ;;  %v6842_v62 = vld [vmem:[#allocation43_spill] sm:$0xff] }
 0x285   : > { %v2091_v44 = vadd.f32 %v2089_v38, %v2085_v52  ;;  %v2106_v42 = vperm.slane %v5443_v55, 6  ;;  %v2101_v10 = vmul.f32 %v2099_v27, %v6836_v36  ;;  %v2111_v47 = vperm.slane %v5435_v51, 7  ;;  %v6843_v38 = vld [vmem:[#allocation158_spill] sm:$0xff]  ;;  %v6844_v27 = vld [vmem:[#allocation160_spill] sm:$0xff] }
 0x286   : > { %v2092_v2 = vadd.f32 %v2090_v37, %v2086_v54  ;;  %v6837_v4 = vmov 0   ;;  %v2102_v22 = vmul.f32 %v2100_v12, %v6836_v36  ;;  %v2112_v18 = vperm.slane %v5443_v55, 7  ;;  %v6840_v55 = vld [vmem:[#allocation22_spill] sm:$0xff] }
 0x287   : > { %v2097_v50 = vadd.f32 %v2095_v29, %v2091_v44  ;;  %2951 = vset.pattern.permute.xlu0 %v6837_v4  ;;  %v2107_v34 = vmul.f32 %v2105_v30, %v6838_v3  ;;  %v2108_v49 = vmul.f32 %v2106_v42, %v6838_v3  ;;  %v2113_v33 = vmul.f32 %v2111_v47, %v6839_v28  ;;  %v6845_v30 = vld [vmem:[#allocation29_spill] sm:$0xff] }
 0x288   : > { %v2098_v9 = vadd.f32 %v2096_v20, %v2092_v2  ;;  %v5606_v1 = vpop.permute.xlu1 %1502  ;;  %v2114_v51 = vmul.f32 %v2112_v18, %v6839_v28  ;;  %v6846_v42 = vld [vmem:[#allocation73_spill] sm:$0xff]  ;;  %v6847_v18 = vld [vmem:[#allocation155_spill] sm:$0xff] }
 0x289   : > { %v2103_v40 = vadd.f32 %v2101_v10, %v2097_v50 }
 0x28a   : > { %v2104_v58 = vadd.f32 %v2102_v22, %v2098_v9 }
 0x28b   : > { %v2109_v24 = vadd.f32 %v2107_v34, %v2103_v40 }
 0x28c   : > { %v2110_v60 = vadd.f32 %v2108_v49, %v2104_v58  ;;  %v6848_v49 = vld [vmem:[#allocation50_spill] sm:$0xff] }
 0x28d   : > { %v2115_v53 = vadd.f32 %v2113_v33, %v2109_v24 }
 0x28e   : > { %v2116_v56 = vadd.f32 %v2114_v51, %v2110_v60  ;;  %v1957_v39 = vpop.permute.xlu2 %1956 }
 0x28f   : > { %v1965_v46 = vadd.f32 %v1957_v39, %v6840_v55  ;;  %v1966_v21 = vadd.f32 %v1957_v39, %v6841_v43 }
 0x290   : > { %v5610_v17 = vpop.permute.xlu1 %1507 }
 0x291   : > { %2990 = vtanh.f32 %v1965_v46 }
 0x292   : > { %2992 = vtanh.f32 %v1966_v21  ;;  %v6849_v21 = vld [vmem:[#allocation114_spill] sm:$0xff] }
 0x293   : > { %2994 = vtanh.f32 %v6843_v38 }
 0x294   : > { %2996 = vtanh.f32 %v6845_v30 }
 0x297   : > { %v5614_v63 = vpop.eup %2990 }
 0x298   : > { %v2396_v31 = vpop.permute.xlu1 %2395  ;;  %v5616_v25 = vpop.eup %2992  ;;  %v2117_v37 = vperm.slane %v5614_v63, 0  ;;  %v2123_v44 = vperm.slane %v5614_v63, 1  ;;  %v2129_v2 = vperm.slane %v5614_v63, 2  ;;  %v2135_v47 = vperm.slane %v5614_v63, 3 }
 0x299   : > { %v2407_v52 = vadd.f32 %v2396_v31, %v6842_v62  ;;  %v2408_v54 = vadd.f32 %v2396_v31, %v6844_v27  ;;  %v2118_v12 = vperm.slane %v5616_v25, 0  ;;  %v2124_v29 = vperm.slane %v5616_v25, 1  ;;  %v5634_v58 = vpop.eup %2994 }
 0x29a   : > { %v2130_v20 = vperm.slane %v5616_v25, 2  ;;  %v2119_v50 = vmul.f32 %v2117_v37, %v6846_v42  ;;  %v2136_v4 = vperm.slane %v5616_v25, 3  ;;  %v2125_v40 = vmul.f32 %v2123_v44, %v6847_v18  ;;  %v5640_v46 = vpop.eup %2996  ;;  %v6850_v37 = vld [vmem:[#allocation123_spill] sm:$0xff] }
 0x29b   : > { %2998 = vtanh.f32 %v2407_v52  ;;  %v2120_v10 = vmul.f32 %v2118_v12, %v6846_v42  ;;  %v2126_v34 = vmul.f32 %v2124_v29, %v6847_v18  ;;  %v2131_v24 = vmul.f32 %v2129_v2, %v6848_v49 }
 0x29c   : > { %3000 = vtanh.f32 %v2408_v54  ;;  %v2121_v9 = vadd.f32 %v2119_v50, %v2115_v53  ;;  %v2132_v33 = vmul.f32 %v2130_v20, %v6848_v49  ;;  %v2141_v39 = vperm.slane %v5614_v63, 4 }
 0x29d   : > { %v2122_v22 = vadd.f32 %v2120_v10, %v2116_v56  ;;  %v2142_v55 = vperm.slane %v5616_v25, 4  ;;  %v2137_v31 = vmul.f32 %v2135_v47, %v6849_v21  ;;  %v2138_v62 = vmul.f32 %v2136_v4, %v6849_v21 }
 0x29e   : > { %v2127_v60 = vadd.f32 %v2125_v40, %v2121_v9  ;;  %v1531_v38 = vperm.slane %v5634_v58, 0  ;;  %v2143_v12 = vmul.f32 %v2141_v39, %v6850_v37  ;;  %v1532_v29 = vperm.slane %v5640_v46, 0 }
 0x29f   : > { %v2128_v51 = vadd.f32 %v2126_v34, %v2122_v22  ;;  %v2144_v44 = vmul.f32 %v2142_v55, %v6850_v37  ;;  %v1535_v30 = vperm.slane %v5634_v58, 1  ;;  %v1536_v50 = vperm.slane %v5640_v46, 1  ;;  %v6853_v34 = vld [vmem:[#allocation103_spill] sm:$0xff] }
 0x2a0   : > { %v2133_v56 = vadd.f32 %v2131_v24, %v2127_v60  ;;  %v1533_v24 = vmul.f32 %v1531_v38, %v6853_v34  ;;  %v1534_v39 = vmul.f32 %v1532_v29, %v6853_v34  ;;  %v6854_v55 = vld [vmem:[#allocation31_spill] sm:$0xff] }
 0x2a1   : > { %v5642_v53 = vpop.eup %2998  ;;  %v2134_v43 = vadd.f32 %v2132_v33, %v2128_v51  ;;  %v1541_v33 = vperm.slane %v5634_v58, 2 }
 0x2a2   : > { %v5646_v52 = vpop.eup %3000  ;;  %v2139_v27 = vadd.f32 %v2137_v31, %v2133_v56  ;;  %v2513_v10 = vperm.slane %v5642_v53, 0  ;;  %v2519_v4 = vperm.slane %v5642_v53, 1  ;;  %v2525_v22 = vperm.slane %v5642_v53, 2 }
 0x2a3   : > { %v2140_v54 = vadd.f32 %v2138_v62, %v2134_v43  ;;  %v2514_v47 = vperm.slane %v5646_v52, 0  ;;  %v2520_v9 = vperm.slane %v5646_v52, 1  ;;  %v2526_v40 = vperm.slane %v5646_v52, 2 }
 0x2a4   : > { %v5653_v2 = vadd.f32 %v2143_v12, %v2139_v27  ;;  %v2515_v60 = vmul.f32 %v2513_v10, %v6804_v23  ;;  %v1537_v56 = vmul.f32 %v1535_v30, %v6854_v55  ;;  %v2531_v43 = vperm.slane %v5642_v53, 3 }
 0x2a5   : > { %v5655_v20 = vadd.f32 %v2144_v44, %v2140_v54  ;;  %v2516_v51 = vmul.f32 %v2514_v47, %v6804_v23  ;;  %v2532_v31 = vperm.slane %v5646_v52, 3  ;;  %v1538_v62 = vmul.f32 %v1536_v50, %v6854_v55 }
 0x2a6   : > { %6851 = vst [vmem:[#allocation85_spill] sm:$0xff] %v5653_v2  ;;  %v1542_v27 = vperm.slane %v5640_v46, 2  ;;  %v2517_v38 = vadd.f32 %v2515_v60, %v5585_v7  ;;  %v2521_v12 = vmul.f32 %v2519_v4, %v6806_v32  ;;  %v2522_v44 = vmul.f32 %v2520_v9, %v6806_v32 }
 0x2a7   : > { %6852 = vst [vmem:[#allocation86_spill] sm:$0xff] %v5655_v20  ;;  %v2518_v54 = vadd.f32 %v2516_v51, %v5587_v5  ;;  %v2527_v29 = vmul.f32 %v2525_v22, %v6808_v61  ;;  %v2528_v30 = vmul.f32 %v2526_v40, %v6808_v61  ;;  %v1543_v10 = vmul.f32 %v1541_v33, %v6799_v15 }
 0x2a8   : > { %v1547_v47 = vperm.slane %v5634_v58, 3  ;;  %v2523_v34 = vadd.f32 %v2521_v12, %v2517_v38  ;;  %v2537_v55 = vperm.slane %v5642_v53, 4  ;;  %v2538_v7 = vperm.slane %v5646_v52, 4 }
 0x2a9   : > { %v2524_v50 = vadd.f32 %v2522_v44, %v2518_v54  ;;  %v2543_v5 = vperm.slane %v5642_v53, 5  ;;  %v2544_v4 = vperm.slane %v5646_v52, 5  ;;  %v1539_v60 = vadd.f32 %v1537_v56, %v1533_v24 }
 0x2aa   : > { %v1540_v9 = vadd.f32 %v1538_v62, %v1534_v39  ;;  %v2529_v51 = vadd.f32 %v2527_v29, %v2523_v34  ;;  %v2533_v40 = vmul.f32 %v2531_v43, %v6809_v57  ;;  %v2534_v33 = vmul.f32 %v2532_v31, %v6809_v57 }
 0x2ab   : > { %v2530_v22 = vadd.f32 %v2528_v30, %v2524_v50  ;;  %v2549_v20 = vperm.slane %v5642_v53, 6  ;;  %v2550_v38 = vperm.slane %v5646_v52, 6  ;;  %v1544_v54 = vmul.f32 %v1542_v27, %v6799_v15 }
 0x2ac   : > { %v1548_v12 = vperm.slane %v5640_v46, 3  ;;  %v2535_v44 = vadd.f32 %v2533_v40, %v2529_v51  ;;  %v2539_v61 = vmul.f32 %v2537_v55, %v6813_v8  ;;  %v2540_v24 = vmul.f32 %v2538_v7, %v6813_v8  ;;  %v6855_v40 = vld [vmem:[#allocation113_spill] sm:$0xff] }
 0x2ad   : > { %v2536_v2 = vadd.f32 %v2534_v33, %v2530_v22  ;;  %v2545_v39 = vmul.f32 %v2543_v5, %v6836_v36  ;;  %v2546_v56 = vmul.f32 %v2544_v4, %v6836_v36  ;;  %v1545_v43 = vadd.f32 %v1543_v10, %v1539_v60 }
 0x2ae   : > { %v1546_v31 = vadd.f32 %v1544_v54, %v1540_v9  ;;  %v2541_v62 = vadd.f32 %v2539_v61, %v2535_v44  ;;  %v2555_v30 = vperm.slane %v5642_v53, 7  ;;  %v2556_v15 = vperm.slane %v5646_v52, 7 }
 0x2af   : > { %v2542_v29 = vadd.f32 %v2540_v24, %v2536_v2  ;;  %v1549_v27 = vmul.f32 %v1547_v47, %v6802_v19  ;;  %v1550_v34 = vmul.f32 %v1548_v12, %v6802_v19  ;;  %v1553_v50 = vperm.slane %v5634_v58, 4  ;;  %v6856_v12 = vld [vmem:[#allocation154_spill] sm:$0xff] }
 0x2b0   : > { %v1554_v55 = vperm.slane %v5640_v46, 4  ;;  %v2547_v7 = vadd.f32 %v2545_v39, %v2541_v62  ;;  %v2551_v4 = vmul.f32 %v2549_v20, %v6838_v3  ;;  %v2552_v10 = vmul.f32 %v2550_v38, %v6838_v3 }
 0x2b1   : > { %v2548_v5 = vadd.f32 %v2546_v56, %v2542_v29  ;;  %v1551_v61 = vadd.f32 %v1549_v27, %v1545_v43  ;;  %v1552_v2 = vadd.f32 %v1550_v34, %v1546_v31  ;;  %v2557_v52 = vmul.f32 %v2555_v30, %v6839_v28  ;;  %v6858_v30 = vld [vmem:[#allocation55_spill] sm:$0xff] }
 0x2b2   : > { %v2553_v60 = vadd.f32 %v2551_v4, %v2547_v7  ;;  %v2558_v47 = vmul.f32 %v2556_v15, %v6839_v28  ;;  %v1555_v19 = vmul.f32 %v1553_v50, %v6755_v13  ;;  %v1556_v9 = vmul.f32 %v1554_v55, %v6755_v13  ;;  %v6857_v13 = vld [vmem:[#allocation79_spill] sm:$0xff]  ;;  %v6860_v4 = vld [vmem:[#allocation34_spill] sm:$0xff] }
 0x2b3   : > { %v2554_v53 = vadd.f32 %v2552_v10, %v2548_v5  ;;  %v1559_v51 = vperm.slane %v5634_v58, 5  ;;  %v1560_v22 = vperm.slane %v5640_v46, 5  ;;  %v1517_v20 = vadd.f32 %v5606_v1, %v6855_v40  ;;  %v6859_v5 = vld [vmem:[#allocation87_spill] sm:$0xff] }
 0x2b4   : > { %v5712_v38 = vadd.f32 %v2557_v52, %v2553_v60  ;;  %v1518_v44 = vadd.f32 %v5606_v1, %v6856_v12  ;;  %v1557_v24 = vadd.f32 %v1555_v19, %v1551_v61  ;;  %v1558_v39 = vadd.f32 %v1556_v9, %v1552_v2  ;;  %v6862_v52 = vld [vmem:[#allocation32_spill] sm:$0xff] }
 0x2b5   : > { %v5714_v54 = vadd.f32 %v2558_v47, %v2554_v53  ;;  %v1565_v56 = vperm.slane %v5634_v58, 6  ;;  %v1561_v31 = vmul.f32 %v1559_v51, %v6758_v35  ;;  %v1562_v62 = vmul.f32 %v1560_v22, %v6758_v35  ;;  %v6861_v53 = vld [vmem:[#allocation135_spill] sm:$0xff] }
 0x2b6   : > { %v1566_v29 = vperm.slane %v5640_v46, 6  ;;  %3002 = vtanh.f32 %v1517_v20  ;;  %v1571_v1 = vperm.slane %v5634_v58, 7  ;;  %v1572_v7 = vperm.slane %v5640_v46, 7 }
 0x2b7   : > { %3004 = vtanh.f32 %v1518_v44  ;;  %v1563_v27 = vadd.f32 %v1561_v31, %v1557_v24  ;;  %v1564_v34 = vadd.f32 %v1562_v62, %v1558_v39  ;;  %v1567_v50 = vmul.f32 %v1565_v56, %v6761_v45 }
 0x2b8   : > { %v1568_v55 = vmul.f32 %v1566_v29, %v6761_v45  ;;  %v1519_v35 = vadd.f32 %v5610_v17, %v6859_v5  ;;  %v1520_v10 = vadd.f32 %v5610_v17, %v6860_v4  ;;  %v1255_v45 = vperm.slane %v6861_v53, 6  ;;  %v5742_v17 = vpop.permute.xlu2 %1252 }
 0x2b9   : > { %v1569_v61 = vadd.f32 %v1567_v50, %v1563_v27  ;;  %v1256_v46 = vperm.slane %v6862_v52, 6  ;;  %v1573_v9 = vmul.f32 %v1571_v1, %v6767_v48  ;;  %v1574_v51 = vmul.f32 %v1572_v7, %v6767_v48 }
 0x2ba   : > { %v1570_v2 = vadd.f32 %v1568_v55, %v1564_v34  ;;  %v2153_v40 = vperm.slane %v5614_v63, 6  ;;  %v2154_v20 = vperm.slane %v5616_v25, 6  ;;  %v5757_v31 = vmul.f32 %v1255_v45, %v5742_v17 }
 0x2bb   : > { %v1575_v44 = vadd.f32 %v1573_v9, %v1569_v61  ;;  %v5760_v62 = vmul.f32 %v1256_v46, %v5742_v17 }
 0x2bc   : > { %v5732_v60 = vpop.eup %3002  ;;  %v1576_v24 = vadd.f32 %v1574_v51, %v1570_v2  ;;  %v5768_v27 = vmul.f32 %v2154_v20, %v5742_v17 }
 0x2bd   : > { %v2401_v33 = vpop.permute.xlu1 %2400  ;;  %v5736_v19 = vpop.eup %3004  ;;  %v1583_v34 = vperm.slane %v5732_v60, 1  ;;  %v1589_v61 = vperm.slane %v5732_v60, 2 }
 0x2be   : > { %v2409_v43 = vadd.f32 %v2401_v33, %v6857_v13  ;;  %v2410_v15 = vadd.f32 %v2401_v33, %v6858_v30  ;;  %v1577_v13 = vperm.slane %v5732_v60, 0  ;;  %v1584_v1 = vperm.slane %v5736_v19, 1 }
 0x2bf   : > { %v1590_v2 = vperm.slane %v5736_v19, 2  ;;  %v1585_v47 = vmul.f32 %v1583_v34, %v6789_v11 }
 0x2c0   : > { %3006 = vtanh.f32 %v2409_v43  ;;  %v1578_v43 = vperm.slane %v5736_v19, 0  ;;  %v1579_v4 = vmul.f32 %v1577_v13, %v6784_v6  ;;  %v1586_v58 = vmul.f32 %v1584_v1, %v6789_v11 }
 0x2c1   : > { %3008 = vtanh.f32 %v2410_v15  ;;  %v5765_v15 = vmul.f32 %v2153_v40, %v5742_v17 }
 0x2c2   : > { %3010 = vtanh.f32 %v1519_v35  ;;  %v1581_v1 = vadd.f32 %v1579_v4, %v1575_v44  ;;  %v1608_v44 = vperm.slane %v5736_v19, 5 }
 0x2c3   : > { %3012 = vtanh.f32 %v1520_v10  ;;  %v1580_v10 = vmul.f32 %v1578_v43, %v6784_v6 }
 0x2c6   : > { %v5747_v33 = vpop.eup %3006 }
 0x2c7   : > { %v5750_v39 = vpop.eup %3008  ;;  %v2561_v50 = vperm.slane %v5747_v33, 0  ;;  %v2567_v7 = vperm.slane %v5747_v33, 1  ;;  %v2573_v51 = vperm.slane %v5747_v33, 2  ;;  %v2579_v6 = vperm.slane %v5747_v33, 3 }
 0x2c8   : > { %v2562_v55 = vperm.slane %v5750_v39, 0  ;;  %v2568_v5 = vperm.slane %v5750_v39, 1  ;;  %v5776_v35 = vpop.eup %3010  ;;  %v2574_v40 = vperm.slane %v5750_v39, 2  ;;  %v2580_v43 = vperm.slane %v5750_v39, 3 }
 0x2c9   : > { %v5782_v45 = vpop.eup %3012  ;;  %v2563_v46 = vmul.f32 %v2561_v50, %v6846_v42  ;;  %v2569_v20 = vmul.f32 %v2567_v7, %v6847_v18  ;;  %v2585_v50 = vperm.slane %v5747_v33, 4  ;;  %v1595_v7 = vperm.slane %v5732_v60, 3 }
 0x2ca   : > { %v2564_v9 = vmul.f32 %v2562_v55, %v6846_v42  ;;  %v2570_v13 = vmul.f32 %v2568_v5, %v6847_v18  ;;  %v2586_v55 = vperm.slane %v5750_v39, 4  ;;  %v1596_v5 = vperm.slane %v5736_v19, 3 }
 0x2cb   : > { %v2565_v56 = vadd.f32 %v2563_v46, %v5712_v38  ;;  %v2575_v12 = vmul.f32 %v2573_v51, %v6848_v49  ;;  %v2576_v38 = vmul.f32 %v2574_v40, %v6848_v49  ;;  %v2582_v46 = vmul.f32 %v2580_v43, %v6849_v21 }
 0x2cc   : > { %v2566_v48 = vadd.f32 %v2564_v9, %v5714_v54  ;;  %v2581_v54 = vmul.f32 %v2579_v6, %v6849_v21  ;;  %v2587_v9 = vmul.f32 %v2585_v50, %v6850_v37  ;;  %v2588_v34 = vmul.f32 %v2586_v55, %v6850_v37 }
 0x2cd   : > { %v2571_v30 = vadd.f32 %v2569_v20, %v2565_v56  ;;  %v1582_v18 = vadd.f32 %v1580_v10, %v1576_v24  ;;  %v1591_v42 = vmul.f32 %v1589_v61, %v6790_v41  ;;  %v1597_v56 = vmul.f32 %v1595_v7, %v6795_v16  ;;  %v5814_v24 = vpop.permute.xlu1 %1262 }
 0x2ce   : > { %v2572_v29 = vadd.f32 %v2570_v13, %v2566_v48  ;;  %v1592_v48 = vmul.f32 %v1590_v2, %v6790_v41  ;;  %v1598_v51 = vmul.f32 %v1596_v5, %v6795_v16  ;;  %v1587_v13 = vadd.f32 %v1585_v47, %v1581_v1 }
 0x2cf   : > { %v2577_v22 = vadd.f32 %v2575_v12, %v2571_v30  ;;  %v1588_v6 = vadd.f32 %v1586_v58, %v1582_v18  ;;  %v1601_v43 = vperm.slane %v5732_v60, 4  ;;  %v1602_v50 = vperm.slane %v5736_v19, 4 }
 0x2d0   : > { %v2578_v11 = vadd.f32 %v2576_v38, %v2572_v29  ;;  %v1607_v12 = vperm.slane %v5732_v60, 5  ;;  %v1593_v30 = vadd.f32 %v1591_v42, %v1587_v13  ;;  %v2592_v18 = vperm.slane %v5750_v39, 5 }
 0x2d1   : > { %v2583_v40 = vadd.f32 %v2581_v54, %v2577_v22  ;;  %v1594_v16 = vadd.f32 %v1592_v48, %v1588_v6  ;;  %v2591_v22 = vperm.slane %v5747_v33, 5  ;;  %v1603_v58 = vmul.f32 %v1601_v43, %v6798_v0 }
 0x2d2   : > { %v2584_v20 = vadd.f32 %v2582_v46, %v2578_v11  ;;  %v1604_v47 = vmul.f32 %v1602_v50, %v6798_v0  ;;  %v1599_v4 = vadd.f32 %v1597_v56, %v1593_v30  ;;  %v1613_v61 = vperm.slane %v5732_v60, 6 }
 0x2d3   : > { %v5816_v29 = vadd.f32 %v2587_v9, %v2583_v40  ;;  %v1600_v10 = vadd.f32 %v1598_v51, %v1594_v16  ;;  %v1614_v2 = vperm.slane %v5736_v19, 6  ;;  %v6863_v55 = vperm.slane %v6861_v53, 7 }
 0x2d4   : > { %v5818_v41 = vadd.f32 %v2588_v34, %v2584_v20  ;;  %v6864_v42 = vperm.slane %v6862_v52, 7  ;;  %v1619_v38 = vperm.slane %v5732_v60, 7  ;;  %v1620_v0 = vperm.slane %v5736_v19, 7 }
 0x2d5   : > { %v5829_v7 = vmul.f32 %v6863_v55, %v5814_v24  ;;  %v1605_v54 = vadd.f32 %v1603_v58, %v1599_v4  ;;  %v1606_v46 = vadd.f32 %v1604_v47, %v1600_v10  ;;  %v1609_v9 = vmul.f32 %v1607_v12, %v6800_v26 }
 0x2d6   : > { %v5834_v5 = vmul.f32 %v6864_v42, %v5814_v24  ;;  %v1610_v34 = vmul.f32 %v1608_v44, %v6800_v26  ;;  %v6865_v11 = vperm.slane %v5614_v63, 7  ;;  %v6866_v48 = vperm.slane %v5616_v25, 7 }
 0x2d7   : > { %v1625_v60 = vperm.slane %v5776_v35, 0  ;;  %v1626_v19 = vperm.slane %v5782_v45, 0  ;;  %v1611_v51 = vadd.f32 %v1609_v9, %v1605_v54  ;;  %v1615_v20 = vmul.f32 %v1613_v61, %v6801_v14 }
 0x2d8   : > { %v5843_v1 = vmul.f32 %v6865_v11, %v5814_v24  ;;  %v5848_v56 = vmul.f32 %v6866_v48, %v5814_v24  ;;  %v1612_v40 = vadd.f32 %v1610_v34, %v1606_v46  ;;  %v1616_v26 = vmul.f32 %v1614_v2, %v6801_v14 }
 0x2d9   : > { %v2597_v13 = vperm.slane %v5747_v33, 6  ;;  %v2598_v6 = vperm.slane %v5750_v39, 6  ;;  %v1621_v43 = vmul.f32 %v1619_v38, %v6803_v59  ;;  %v1622_v50 = vmul.f32 %v1620_v0, %v6803_v59 }
 0x2da   : > { %v1617_v12 = vadd.f32 %v1615_v20, %v1611_v51  ;;  %v1618_v44 = vadd.f32 %v1616_v26, %v1612_v40  ;;  %v1631_v30 = vperm.slane %v5776_v35, 1  ;;  %v1632_v16 = vperm.slane %v5782_v45, 1  ;;  %v6868_v40 = vld [vmem:[#allocation145_spill] sm:$0xff] }
 0x2db   : > { %v2603_v58 = vperm.slane %v5747_v33, 7  ;;  %v2604_v47 = vperm.slane %v5750_v39, 7  ;;  %v1627_v14 = vmul.f32 %v1625_v60, %v6804_v23  ;;  %v1637_v4 = vperm.slane %v5776_v35, 2  ;;  %v6867_v60 = vld [vmem:[#allocation47_spill] sm:$0xff] }
 0x2dc   : > { %v1623_v61 = vadd.f32 %v1621_v43, %v1617_v12  ;;  %v1624_v2 = vadd.f32 %v1622_v50, %v1618_v44  ;;  %v1628_v55 = vmul.f32 %v1626_v19, %v6804_v23  ;;  %v1638_v59 = vperm.slane %v5782_v45, 2  ;;  %v6869_v43 = vld [vmem:[#allocation159_spill] sm:$0xff] }
 0x2dd   : > { %v2599_v42 = vmul.f32 %v2597_v13, %v5742_v17  ;;  %v2600_v38 = vmul.f32 %v2598_v6, %v5742_v17  ;;  %v1643_v0 = vperm.slane %v5776_v35, 3  ;;  %v1644_v54 = vperm.slane %v5782_v45, 3 }
 0x2de   : > { %v1629_v46 = vadd.f32 %v1627_v14, %v1623_v61  ;;  %v1630_v9 = vadd.f32 %v1628_v55, %v1624_v2  ;;  %v1633_v34 = vmul.f32 %v1631_v30, %v6806_v32  ;;  %v1634_v11 = vmul.f32 %v1632_v16, %v6806_v32 }
 0x2df   : > { %v2605_v48 = vmul.f32 %v2603_v58, %v5814_v24  ;;  %v1639_v23 = vmul.f32 %v1637_v4, %v6867_v60  ;;  %v1649_v19 = vperm.slane %v5776_v35, 4  ;;  %v1650_v51 = vperm.slane %v5782_v45, 4 }
 0x2e0   : > { %v1635_v26 = vadd.f32 %v1633_v34, %v1629_v46  ;;  %v1636_v13 = vadd.f32 %v1634_v11, %v1630_v9  ;;  %v1640_v6 = vmul.f32 %v1638_v59, %v6867_v60  ;;  %v1645_v12 = vmul.f32 %v1643_v0, %v6809_v57 }
 0x2e1   : > { %v1655_v32 = vperm.slane %v5776_v35, 5  ;;  %v1656_v44 = vperm.slane %v5782_v45, 5  ;;  %v1646_v58 = vmul.f32 %v1644_v54, %v6809_v57  ;;  %v1661_v14 = vperm.slane %v5776_v35, 6 }
 0x2e2   : > { %v1641_v30 = vadd.f32 %v1639_v23, %v1635_v26  ;;  %v1642_v16 = vadd.f32 %v1640_v6, %v1636_v13  ;;  %v2606_v4 = vmul.f32 %v2604_v47, %v5814_v24  ;;  %v1651_v61 = vmul.f32 %v1649_v19, %v6813_v8  ;;  %v6876_v26 = vld [vmem:[#allocation85_spill] sm:$0xff] }
 0x2e3   : > { %v1652_v2 = vmul.f32 %v1650_v51, %v6813_v8  ;;  %v1667_v0 = vperm.slane %v5776_v35, 7  ;;  %v1657_v57 = vmul.f32 %v1655_v32, %v6836_v36  ;;  %v1658_v54 = vmul.f32 %v1656_v44, %v6836_v36  ;;  %v6874_v51 = vld [vmem:[#allocation98_spill] sm:$0xff] }
 0x2e4   : > { %v1647_v55 = vadd.f32 %v1645_v12, %v1641_v30  ;;  %v1648_v59 = vadd.f32 %v1646_v58, %v1642_v16  ;;  %v1668_v47 = vperm.slane %v5782_v45, 7  ;;  %v6870_v9 = vperm.slane %v6861_v53, 5  ;;  %v5929_v30 = vpop.permute.xlu2 %1273 }
 0x2e5   : > { %v6871_v34 = vperm.slane %v6862_v52, 5  ;;  %v6872_v35 = vperm.slane %v5614_v63, 5  ;;  %v1663_v23 = vmul.f32 %v1661_v14, %v6838_v3  ;;  %v6873_v19 = vperm.slane %v5616_v25, 5  ;;  %v6875_v63 = vld [vmem:[#allocation99_spill] sm:$0xff]  ;;  %v6877_v25 = vld [vmem:[#allocation86_spill] sm:$0xff] }
 0x2e6   : > { %v1669_v6 = vmul.f32 %v1667_v0, %v6839_v28  ;;  %v1653_v32 = vadd.f32 %v1651_v61, %v1647_v55 }
 0x2e7   : > { %v1513_v10 = vpop.permute.xlu0 %1512 }
 0x2e8   : > { %v1521_v20 = vadd.f32 %v1513_v10, %v6868_v40  ;;  %v1522_v50 = vadd.f32 %v1513_v10, %v6869_v43  ;;  %v1662_v10 = vperm.slane %v5782_v45, 6 }
 0x2ea   : > { %3014 = vtanh.f32 %v1521_v20  ;;  %v1664_v52 = vmul.f32 %v1662_v10, %v6838_v3  ;;  %v1659_v10 = vadd.f32 %v1657_v57, %v1653_v32 }
 0x2eb   : > { %3016 = vtanh.f32 %v1522_v50 }
 0x2f0   : > { %v5922_v39 = vpop.eup %3014 }
 0x2f1   : > { %v5889_v46 = vpop.permute.xlu0 %1242  ;;  %v5927_v44 = vpop.eup %3016 }
 0x2f2   : > { %v1247_v8 = vmul.f32 %v6870_v9, %v5889_v46  ;;  %v1248_v11 = vmul.f32 %v6871_v34, %v5889_v46  ;;  %v2149_v60 = vmul.f32 %v6872_v35, %v5889_v46  ;;  %v2150_v36 = vmul.f32 %v6873_v19, %v5889_v46  ;;  %v3026_v9 = vld [vmem:[%s6011_s4 + $0x28] sm:$0xff]  ;;  %v3027_v34 = vld [vmem:[%s6011_s4 + $0x30] sm:$0xff]  ;;  %v3028_v35 = vld [vmem:[%s6011_s4 + $0x38] sm:$0xff] }
 0x2f3   : > { %v2593_v45 = vmul.f32 %v2591_v22, %v5889_v46  ;;  %v2594_v53 = vmul.f32 %v2592_v18, %v5889_v46  ;;  %v1670_v22 = vmul.f32 %v1668_v47, %v6839_v28 }
 0x2f4   : > { %v1249_v40 = vadd.f32 %v1247_v8, %v6874_v51  ;;  %v1250_v20 = vadd.f32 %v1248_v11, %v6875_v63  ;;  %v2151_v13 = vadd.f32 %v2149_v60, %v6876_v26  ;;  %v2152_v43 = vadd.f32 %v2150_v36, %v6877_v25 }
 0x2f5   : > { %v2595_v50 = vadd.f32 %v2593_v45, %v5816_v29  ;;  %v2596_v33 = vadd.f32 %v2594_v53, %v5818_v41  ;;  %v1654_v41 = vadd.f32 %v1652_v2, %v1648_v59  ;;  %v3025_v59 = vld [vmem:[%s6011_s4 + $0x20] sm:$0xff]  ;;  %v1673_v53 = vperm.slane %v5922_v39, 0 }
 0x2f6   : > { %v1259_v3 = vadd.f32 %v5757_v31, %v1249_v40  ;;  %v1260_v18 = vadd.f32 %v5760_v62, %v1250_v20  ;;  %v2157_v12 = vadd.f32 %v5765_v15, %v2151_v13  ;;  %v2158_v16 = vadd.f32 %v5768_v27, %v2152_v43 }
 0x2f7   : > { %v2601_v29 = vadd.f32 %v2599_v42, %v2595_v50  ;;  %v2602_v58 = vadd.f32 %v2600_v38, %v2596_v33  ;;  %v1660_v55 = vadd.f32 %v1658_v54, %v1654_v41  ;;  %v1665_v42 = vadd.f32 %v1663_v23, %v1659_v10 }
 0x2f8   : > { %v1269_v28 = vadd.f32 %v5829_v7, %v1259_v3  ;;  %v1270_v14 = vadd.f32 %v5834_v5, %v1260_v18  ;;  %v2163_v31 = vadd.f32 %v5843_v1, %v2157_v12  ;;  %v2164_v62 = vadd.f32 %v5848_v56, %v2158_v16  ;;  %v3023_v56 = vld [vmem:[%s6011_s4] sm:$0xff] }
 0x2f9   : > { %v2607_v15 = vadd.f32 %v2605_v48, %v2601_v29  ;;  %v2608_v61 = vadd.f32 %v2606_v4, %v2602_v58  ;;  %v1666_v1 = vadd.f32 %v1664_v52, %v1660_v55  ;;  %v3024_v4 = vld [vmem:[%s6011_s4 + $0x8] sm:$0xff]  ;;  %v1671_v54 = vadd.f32 %v1669_v6, %v1665_v42  ;;  %v6878_v6 = vld [vmem:[#allocation73_spill] sm:$0xff]  ;;  %v6879_v42 = vld [vmem:[#allocation155_spill] sm:$0xff] }
 0x2fa   : > { %v1276_v0 = vadd.f32 %v5929_v30, %v1269_v28  ;;  %v1277_v47 = vadd.f32 %v5929_v30, %v1270_v14  ;;  %v2165_v27 = vadd.f32 %v2163_v31, %v5929_v30  ;;  %v2166_v38 = vadd.f32 %v2164_v62, %v5929_v30 }
 0x2fb   : > { %v2609_v7 = vadd.f32 %v2607_v15, %v5929_v30  ;;  %v2610_v5 = vadd.f32 %v2608_v61, %v5929_v30  ;;  %v1672_v23 = vadd.f32 %v1670_v22, %v1666_v1  ;;  %v1674_v63 = vperm.slane %v5927_v44, 0 }
 0x2fc   : > { %v1278_v48 = vsub.f32 %v1276_v0, %v3023_v56  ;;  %v1279_v2 = vsub.f32 %v1277_v47, %v3024_v4  ;;  %v2167_v57 = vsub.f32 %v2165_v27, %v3025_v59  ;;  %v2168_v8 = vsub.f32 %v2166_v38, %v3026_v9 }
 0x2fd   : > { %v2611_v11 = vsub.f32 %v2609_v7, %v3027_v34  ;;  %v2612_v60 = vsub.f32 %v2610_v5, %v3028_v35  ;;  %v1675_v25 = vmul.f32 %v1673_v53, %v6878_v6  ;;  %v1676_v22 = vmul.f32 %v1674_v63, %v6878_v6 }
 0x2fe   : > { %v1280_v19 = vmul.f32 %v1278_v48, %v1278_v48  ;;  %v1281_v36 = vmul.f32 %v1279_v2, %v1279_v2  ;;  %v2169_v45 = vmul.f32 %v2167_v57, %v2167_v57  ;;  %v2170_v52 = vmul.f32 %v2168_v8, %v2168_v8 }
 0x2ff   : > { %v2613_v51 = vmul.f32 %v2611_v11, %v2611_v11  ;;  %v2614_v40 = vmul.f32 %v2612_v60, %v2612_v60  ;;  %v1677_v32 = vadd.f32 %v1675_v25, %v1671_v54  ;;  %v1678_v41 = vadd.f32 %v1676_v22, %v1672_v23 }
 0x300   : > { %v1282_v20 = vrot.slane %v1280_v19, 4  ;;  %v1288_v26 = vrot.slane %v1281_v36, 4  ;;  %v2171_v13 = vrot.slane %v2169_v45, 4  ;;  %v2177_v43 = vrot.slane %v2170_v52, 4 }
 0x301   : > { %v2615_v50 = vrot.slane %v2613_v51, 4  ;;  %v2621_v33 = vrot.slane %v2614_v40, 4  ;;  %v1679_v10 = vperm.slane %v5922_v39, 1  ;;  %v1680_v55 = vperm.slane %v5927_v44, 1 }
 0x302   : > { %v1283_v3 = vadd.f32 %v1282_v20, %v1280_v19  ;;  %v1289_v18 = vadd.f32 %v1288_v26, %v1281_v36  ;;  %v2172_v12 = vadd.f32 %v2171_v13, %v2169_v45  ;;  %v2178_v16 = vadd.f32 %v2177_v43, %v2170_v52 }
 0x303   : > { %v2616_v29 = vadd.f32 %v2615_v50, %v2613_v51  ;;  %v2622_v58 = vadd.f32 %v2621_v33, %v2614_v40  ;;  %v1681_v38 = vmul.f32 %v1679_v10, %v6879_v42  ;;  %v1682_v56 = vmul.f32 %v1680_v55, %v6879_v42 }
 0x304   : > { %v1284_v28 = vrot.slane %v1283_v3, 2  ;;  %v1290_v14 = vrot.slane %v1289_v18, 2  ;;  %v2173_v31 = vrot.slane %v2172_v12, 2  ;;  %v2179_v62 = vrot.slane %v2178_v16, 2 }
 0x305   : > { %v2617_v15 = vrot.slane %v2616_v29, 2  ;;  %v2623_v61 = vrot.slane %v2622_v58, 2  ;;  %v1683_v59 = vadd.f32 %v1681_v38, %v1677_v32  ;;  %v1684_v8 = vadd.f32 %v1682_v56, %v1678_v41 }
 0x306   : > { %v1285_v0 = vadd.f32 %v1284_v28, %v1283_v3  ;;  %v1291_v47 = vadd.f32 %v1290_v14, %v1289_v18  ;;  %v2174_v27 = vadd.f32 %v2173_v31, %v2172_v12  ;;  %v2180_v7 = vadd.f32 %v2179_v62, %v2178_v16 }
 0x307   : > { %v2618_v5 = vadd.f32 %v2617_v15, %v2616_v29  ;;  %v2624_v1 = vadd.f32 %v2623_v61, %v2622_v58  ;;  %v1685_v60 = vperm.slane %v5922_v39, 2  ;;  %v1686_v45 = vperm.slane %v5927_v44, 2 }
 0x308   : > { %v1286_v48 = vrot.slane %v1285_v0, 1  ;;  %v1292_v4 = vrot.slane %v1291_v47, 1  ;;  %v2175_v2 = vrot.slane %v2174_v27, 1  ;;  %v2181_v57 = vrot.slane %v2180_v7, 1 }
 0x309   : > { %v2619_v54 = vrot.slane %v2618_v5, 1  ;;  %v2625_v9 = vrot.slane %v2624_v1, 1  ;;  %v1687_v52 = vmul.f32 %v1685_v60, %v6848_v49  ;;  %v1691_v51 = vperm.slane %v5922_v39, 3 }
 0x30a   : > { %v1287_v34 = vadd.f32 %v1286_v48, %v1285_v0  ;;  %v1293_v11 = vadd.f32 %v1292_v4, %v1291_v47  ;;  %v2176_v35 = vadd.f32 %v2175_v2, %v2174_v27  ;;  %v2182_v23 = vadd.f32 %v2181_v57, %v2180_v7 }
 0x30b   : > { %v2620_v19 = vadd.f32 %v2619_v54, %v2618_v5  ;;  %v2626_v36 = vadd.f32 %v2625_v9, %v2624_v1  ;;  %v1692_v40 = vperm.slane %v5927_v44, 3  ;;  %v1688_v26 = vmul.f32 %v1686_v45, %v6848_v49 }
 0x30c   : > { %v1294_v53 = vadd.f32 %v1293_v11, %v1287_v34  ;;  %v2183_v63 = vadd.f32 %v2182_v23, %v2176_v35  ;;  %v1697_v13 = vperm.slane %v5922_v39, 4  ;;  %v1703_v6 = vperm.slane %v5922_v39, 5 }
 0x30d   : > { %v2627_v20 = vadd.f32 %v2626_v36, %v2620_v19  ;;  %v1689_v25 = vadd.f32 %v1687_v52, %v1683_v59  ;;  %v1693_v43 = vmul.f32 %v1691_v51, %v6849_v21  ;;  %v1698_v50 = vperm.slane %v5927_v44, 4 }
 0x30e   : > { %1295 = vadd.xlane.f32.xlu1 %v1294_v53  ;;  %v1704_v33 = vperm.slane %v5927_v44, 5  ;;  %2184 = vadd.xlane.f32.xlu2 %v2183_v63  ;;  %v1690_v22 = vadd.f32 %v1688_v26, %v1684_v8  ;;  %v1694_v3 = vmul.f32 %v1692_v40, %v6849_v21  ;;  %v1699_v12 = vmul.f32 %v1697_v13, %v6850_v37 }
 0x30f   : > { %v1695_v18 = vadd.f32 %v1693_v43, %v1689_v25  ;;  %v1709_v49 = vperm.slane %v5922_v39, 6  ;;  %v1700_v16 = vmul.f32 %v1698_v50, %v6850_v37  ;;  %v1710_v29 = vperm.slane %v5927_v44, 6 }
 0x310   : > { %v1696_v32 = vadd.f32 %v1694_v3, %v1690_v22  ;;  %v1705_v58 = vmul.f32 %v1703_v6, %v5889_v46  ;;  %v1715_v28 = vperm.slane %v5922_v39, 7  ;;  %v1706_v14 = vmul.f32 %v1704_v33, %v5889_v46 }
 0x311   : > { %v1701_v41 = vadd.f32 %v1699_v12, %v1695_v18  ;;  %v1716_v21 = vperm.slane %v5927_v44, 7  ;;  %v1711_v62 = vmul.f32 %v1709_v49, %v5742_v17  ;;  %v1712_v61 = vmul.f32 %v1710_v29, %v5742_v17  ;;  %v3029_v44 = vld [vmem:[%s6011_s4 + $0x10] sm:$0xff]  ;;  %v3030_v17 = vld [vmem:[%s6011_s4 + $0x18] sm:$0xff] }
 0x312   : > { %v1702_v31 = vadd.f32 %v1700_v16, %v1696_v32  ;;  %v1717_v55 = vmul.f32 %v1715_v28, %v5814_v24 }
 0x313   : > { %v1707_v10 = vadd.f32 %v1705_v58, %v1701_v41  ;;  %v1718_v47 = vmul.f32 %v1716_v21, %v5814_v24 }
 0x314   : > { %v1708_v15 = vadd.f32 %v1706_v14, %v1702_v31 }
 0x315   : > { %v1713_v37 = vadd.f32 %v1711_v62, %v1707_v10 }
 0x316   : > { %2628 = vadd.xlane.f32.xlu1 %v2627_v20  ;;  %v1714_v0 = vadd.f32 %v1712_v61, %v1708_v15 }
 0x317   : > { %v1719_v27 = vadd.f32 %v1717_v55, %v1713_v37 }
 0x318   : > { %v1720_v39 = vadd.f32 %v1718_v47, %v1714_v0 }
 0x319   : > { %v1721_v46 = vadd.f32 %v1719_v27, %v5929_v30 }
 0x31a   : > { %v1722_v42 = vadd.f32 %v1720_v39, %v5929_v30 }
 0x31b   : > { %v1723_v38 = vsub.f32 %v1721_v46, %v3029_v44 }
 0x31c   : > { %v1724_v7 = vsub.f32 %v1722_v42, %v3030_v17 }
 0x31d   : > { %v1725_v5 = vmul.f32 %v1723_v38, %v1723_v38 }
 0x31e   : > { %v1726_v1 = vmul.f32 %v1724_v7, %v1724_v7 }
 0x31f   : > { %v1727_v24 = vrot.slane %v1725_v5, 4 }
 0x320   : > { %v1733_v56 = vrot.slane %v1726_v1, 4 }
 0x321   : > { %v1728_v48 = vadd.f32 %v1727_v24, %v1725_v5 }
 0x322   : > { %v1734_v4 = vadd.f32 %v1733_v56, %v1726_v1 }
 0x323   : > { %v1729_v2 = vrot.slane %v1728_v48, 2 }
 0x324   : > { %v1735_v59 = vrot.slane %v1734_v4, 2 }
 0x325   : > { %v1730_v30 = vadd.f32 %v1729_v2, %v1728_v48 }
 0x326   : > { %v1736_v57 = vadd.f32 %v1735_v59, %v1734_v4 }
 0x327   : > { %v1731_v54 = vrot.slane %v1730_v30, 1 }
 0x328   : > { %v1737_v9 = vrot.slane %v1736_v57, 1 }
 0x329   : > { %v1732_v8 = vadd.f32 %v1731_v54, %v1730_v30 }
 0x32a   : > { %v1738_v34 = vadd.f32 %v1737_v9, %v1736_v57 }
 0x32c   : > { %v1739_v11 = vadd.f32 %v1738_v34, %v1732_v8 }
 0x32e   : > { %1740 = vadd.xlane.f32.xlu0 %v1739_v11 }
 0x381   : > { %v1296_v35 = vpop.xlane.xlu1 %1295  ;;  %v2185_v60 = vpop.xlane.xlu2 %2184 }
 0x382   : > { %1298 = vst.msk [vmem:[%s544_s29] sm:$0x1] %vm1297_vm2, %v1296_v35 }
 0x383   : > { %2186 = vst.msk [vmem:[%s544_s29 + $0x2] sm:$0x1] %vm1297_vm2, %v2185_v60 }
 0x389   : > { %v2629_v23 = vpop.xlane.xlu1 %2628 }
 0x38a   : > { %2630 = vst.msk [vmem:[%s544_s29 + $0x3] sm:$0x1] %vm1297_vm2, %v2629_v23 }
 0x3a1   : > { %v1741_v19 = vpop.xlane.xlu0 %1740 }
 0x3a2   : > { %1742 = vst.msk [vmem:[%s544_s29 + $0x1] sm:$0x1] %vm1297_vm2, %v1741_v19 }
 0x3a3 PF: > { %s24_s21 = sadd.s32 1, %s3090_s21  }
 0x3a4   : > { %p21_p7 = scmp.ge.s32.totalorder %s24_s21, 4  }
 0x3a6   :  { %23 = sbr.rel (!%p21_p7) target bundleno = 7 (0x7), region = 135 }
 0x3ab   :  { %2650 = vsyncpa [#allocation3], 1 }
 0x3ac   :  { %2652 = vsyncpa [#allocation3 + $0x1], 1 }
 0x3ad   :  { %2653 = vsyncpa [#allocation5], 1 }

</bundles_post_ra>
